<compile_context>
chip_gen: v7x
topology: tpu7x:2x2x1
jax: 0.10.0
libtpu: 0.0.40
codegen_flags: <defaults>
</compile_context>

<pallas_src>
import functools

import jax
import jax.numpy as jnp
from jax import lax
from jax.experimental import pallas as pl
from jax.experimental.pallas import tpu as pltpu


# ---------------------------------------------------------------------------
# Fused kernel: depthwise3x3 -> pointwise1x1 -> (+residual) -> ReLU for ALL
# layers, `pack` batch images per grid step (packed on the sublane axis).
# ---------------------------------------------------------------------------
def _make_fused_kernel(layer_dims, pack, W, HW, base, length, R):
    """layer_dims: per-layer per-image (cin, cout); layer 0 = conv_b (no residual)."""

    def kernel(x_ref, w_ref, o_ref, xrp_ref):
        # Zero ONLY the two halo lane-tile regions; the interior [base, base+HW)
        # is fully overwritten by every layer's staging store.  Done every step
        # (not pl.when(pid==0)) so the "parallel" grid is megacore-safe.
        xrp_ref[:, :base] = jnp.zeros((R, base), jnp.float32)
        xrp_ref[:, base + HW:length] = jnp.zeros((R, length - base - HW), jnp.float32)

        act = x_ref[0].astype(jnp.float32)                 # (pack*cin0, HW), lane-dense
        for li, (cin, cout) in enumerate(layer_dims):
            cin_p, cout_p = pack * cin, pack * cout

            # Stage the activation at a lane-tile-aligned offset (unmasked vst),
            # then load the row-padded buffer once.
            xrp_ref[:cin_p, base:base + HW] = act
            xrp = xrp_ref[:cin_p, :]

            # Depthwise 3x3: 9 lane-shifted views x pre-broadcast / pre-masked taps.
            # Tap (kh,kw) of pixel p reads flat index base + p + (kh-1)*W + (kw-1);
            # out-of-image rows hit the zeroed halo, out-of-image columns (row wrap)
            # are already zeroed inside the weight planes.
            acc = jnp.zeros((cin_p, HW), jnp.float32)
            for t in range(9):
                kh, kw = divmod(t, 3)
                start = base + (kh - 1) * W + (kw - 1)
                acc = acc + xrp[:, start:start + HW] * w_ref[li, t, :cin_p, :]

            # Pointwise 1x1 as exact-f32 VPU rank-1 updates, per packed image
            # (weights shared across images -> no zero-block waste).
            y_imgs = []
            for im in range(pack):
                y_im = jnp.zeros((cout, HW), jnp.float32)
                for ci in range(cin):
                    r = im * cin + ci
                    y_im = y_im + w_ref[li, 9 + ci, :cout, :] * acc[r:r + 1, :]
                y_imgs.append(y_im)
            y = y_imgs[0] if pack == 1 else jnp.concatenate(y_imgs, axis=0)

            if li > 0:                                     # residual blocks
                y = y + act
            act = jnp.maximum(y, 0.0)                      # layer 0: relu(conv_b(x))

        o_ref[0] = act                                     # (pack*cout, HW): unmasked vst

    return kernel


# ---------------------------------------------------------------------------
# Wrapper-side weight slab: (n_layers, P, R, HW)
#   planes 0..8       : depthwise tap t, rows [0, pack*cin), pre-broadcast to HW lanes,
#                       pre-multiplied by the left/right column-edge mask of that tap.
#   planes 9..9+cin-1 : pointwise column ci (pw[ci, :]) broadcast to HW lanes, rows [0, cout).
# ---------------------------------------------------------------------------
def _build_weight_slab(layer_ws, pack, W, HW, R, P):
    col = jnp.arange(HW, dtype=jnp.int32) % W
    ones = jnp.ones((HW,), jnp.float32)
    mask_l = (col > 0).astype(jnp.float32)       # taps reading column w-1
    mask_r = (col < W - 1).astype(jnp.float32)   # taps reading column w+1
    colmask = jnp.stack(
        [mask_l if (t % 3) == 0 else (mask_r if (t % 3) == 2 else ones) for t in range(9)])

    slabs = []
    for dw, pw in layer_ws:                       # dw (3,3,cin), pw (cin,cout)
        cin, cout = pw.shape
        dw_cm = jnp.transpose(dw, (2, 0, 1)).reshape(cin, 9)     # (cin, 9)
        dw_p = jnp.tile(dw_cm, (pack, 1))                        # (pack*cin, 9)
        dwb = dw_p.T[:, :, None] * colmask[:, None, :]           # (9, pack*cin, HW)
        dwb = jnp.pad(dwb, ((0, 0), (0, R - pack * cin), (0, 0)))
        pwb = jnp.broadcast_to(pw[:, :, None], (cin, cout, HW))  # (cin, cout, HW)
        pwb = jnp.pad(pwb, ((0, P - 9 - cin), (0, R - cout), (0, 0)))
        slabs.append(jnp.concatenate([dwb, pwb], axis=0))        # (P, R, HW)
    return jnp.stack(slabs)                                      # (n_layers, P, R, HW)


# ---------------------------------------------------------------------------
# DecoderConv forward (sampler=None configuration)
# ---------------------------------------------------------------------------
def init_decoder_conv_params(key, inp_chns, out_chns, block_num):
    """Deterministic synthetic weights. Depthwise stored (3,3,C), pointwise (Cin,Cout)."""
    keys = jax.random.split(key, 2 * (block_num + 1))
    scale = 0.2

    def dw_pw(k1, k2, cin, cout):
        dw = scale * jax.random.normal(k1, (3, 3, cin), jnp.float32)
        pw = scale * jax.random.normal(k2, (cin, cout), jnp.float32)
        return dw, pw

    params = {"conv_b": dw_pw(keys[0], keys[1], inp_chns, out_chns), "blocks": []}
    for i in range(block_num):
        params["blocks"].append(dw_pw(keys[2 + 2 * i], keys[3 + 2 * i], out_chns, out_chns))
    return params


@functools.partial(jax.jit, static_argnames=("sampler", "images_per_step"))
def decoder_conv_forward(x_nchw, params, sampler=None, images_per_step=None):
    """Matches DecoderConv.forward for sampler=None.  Input/output are NCHW.

    images_per_step: how many batch images to fold onto the sublane axis per grid
    step (default: 2 when N is even -> collapses the demo batch to one step; use 1
    on v7x if you want the grid to stay a multiple of 2 for megacore sharding).
    """
    assert sampler is None, "only sampler=None implemented (see TODO above)"
    N, C0, H, W = x_nchw.shape
    HW = H * W
    pack = images_per_step if images_per_step is not None else (2 if N % 2 == 0 else 1)
    assert N % pack == 0, (N, pack)
    n_steps = N // pack

    layer_ws = [params["conv_b"]] + list(params["blocks"])
    layer_dims = tuple((pw.shape[0], pw.shape[1]) for _, pw in layer_ws)  # per-image (cin, cout)
    n_layers = len(layer_dims)
    c_out = layer_dims[-1][1]
    R = pack * max(max(d) for d in layer_dims)        # row dim of all weight planes / scratch
    P = 9 + max(c for c, _ in layer_dims)             # planes per layer in the slab

    # Row-padded flat scratch: interior starts on a lane-tile boundary so the
    # per-layer staging store is aligned; taps read at +/- (W+1) lane offsets.
    base = ((W + 1 + 127) // 128) * 128
    length = ((base + HW + W + 1 + 127) // 128) * 128

    # NCHW viewed as (steps, pack*C, H*W): channels of the packed images on sublanes,
    # spatial on lanes.  Pure reshapes -- no transposes anywhere in the wrapper.
    x_packed = x_nchw.reshape(n_steps, pack * C0, HW)
    slab = _build_weight_slab(layer_ws, pack, W, HW, R, P)

    kernel = _make_fused_kernel(layer_dims, pack, W, HW, base, length, R)

    out = pl.pallas_call(
        kernel,
        out_shape=jax.ShapeDtypeStruct((n_steps, pack * c_out, HW), jnp.float32),
        grid=(n_steps,),
        in_specs=[
            pl.BlockSpec((1, pack * C0, HW), lambda n: (n, 0, 0)),
            pl.BlockSpec((n_layers, P, R, HW), lambda n: (0, 0, 0, 0)),  # weights: one DMA
        ],
        out_specs=pl.BlockSpec((1, pack * c_out, HW), lambda n: (n, 0, 0)),
        scratch_shapes=[pltpu.VMEM((R, length), jnp.float32)],
        compiler_params=pltpu.CompilerParams(
            dimension_semantics=("parallel",)),
    )(x_packed, slab)
    return out.reshape(N, c_out, H, W)


# ---------------------------------------------------------------------------
# Pure-JAX reference (correctness check only; HIGHEST precision so the f32
# reference itself is exact, matching the kernel's exact-f32 VPU math).
# ---------------------------------------------------------------------------
def _ref_dsconv(x_nhwc, dw, pw):
    cin = x_nhwc.shape[-1]
    cout = pw.shape[1]
    y = lax.conv_general_dilated(
        x_nhwc, dw.reshape(3, 3, 1, cin), (1, 1), "SAME",
        dimension_numbers=("NHWC", "HWIO", "NHWC"), feature_group_count=cin,
        precision=lax.Precision.HIGHEST)
    y = lax.conv_general_dilated(
        y, pw.reshape(1, 1, cin, cout), (1, 1), "SAME",
        dimension_numbers=("NHWC", "HWIO", "NHWC"),
        precision=lax.Precision.HIGHEST)
    return y


def _ref_forward(x_nchw, params):
    x = jnp.transpose(x_nchw, (0, 2, 3, 1))
    dw, pw = params["conv_b"]
    x = jax.nn.relu(_ref_dsconv(x, dw, pw))
    for dw_i, pw_i in params["blocks"]:
        x = jax.nn.relu(x + _ref_dsconv(x, dw_i, pw_i))
    return jnp.transpose(x, (0, 3, 1, 2))


if __name__ == "__main__":
    key = jax.random.PRNGKey(0)
    k_x, k_p = jax.random.split(key)

    N, Cin, H, W = 2, 4, 16, 16
    Cout, block_num = 8, 2

    x = jax.random.normal(k_x, (N, Cin, H, W), jnp.float32)
    params = init_decoder_conv_params(k_p, Cin, Cout, block_num)

    out = decoder_conv_forward(x, params, sampler=None)
    out = jax.block_until_ready(out)

    ref = jax.block_until_ready(_ref_forward(x, params))
    assert out.shape == (N, Cout, H, W), out.shape
    err = float(jnp.max(jnp.abs(out - ref)))
    assert jnp.allclose(out, ref, atol=2e-4, rtol=2e-4), f"mismatch vs reference, max |err|={err}"

    print("KERNEL_OK")
</pallas_src>

<mosaic_0001>
module attributes {stable_mosaic.version = 11 : i64} {
  func.func @kernel(%arg0: i32, %arg1: memref<1x8x256xf32, #tpu.memory_space<vmem>>, %arg2: memref<3x17x16x256xf32, #tpu.memory_space<vmem>>, %arg3: memref<1x16x256xf32, #tpu.memory_space<vmem>>, %arg4: memref<16x512xf32, #tpu.memory_space<vmem>>) attributes {dimension_semantics = [#tpu.dimension_semantics<parallel>], iteration_bounds = array<i64: 1>, scalar_prefetch = 0 : i64, scratch_operands = 1 : i64, tpu.core_type = #tpu.core_type<tc>, window_params = [{transform_indices = @transform_0, window_bounds = array<i64: 1, 8, 256>}, {pipeline_mode = #tpu.pipeline_mode<synchronous>, transform_indices = @transform_1, window_bounds = array<i64: 3, 17, 16, 256>}, {transform_indices = @transform_2, window_bounds = array<i64: 1, 16, 256>}]} {
    %cst = arith.constant 0.000000e+00 : f32
    %0 = vector.broadcast %cst : f32 to vector<16x128xf32>
    %c0 = arith.constant 0 : index
    %c0_0 = arith.constant 0 : index
    %1 = vector.load %arg4[%c0, %c0_0] : memref<16x512xf32, #tpu.memory_space<vmem>>, vector<16x128xf32>
    tpu.vector_store %arg4[%c0, %c0_0], %0 {strides = array<i32>} : memref<16x512xf32, #tpu.memory_space<vmem>>, vector<16x128xf32>,
    %cst_1 = arith.constant 0.000000e+00 : f32
    %2 = vector.broadcast %cst_1 : f32 to vector<16x128xf32>
    %c0_2 = arith.constant 0 : index
    %c384 = arith.constant 384 : index
    %3 = vector.load %arg4[%c0_2, %c384] : memref<16x512xf32, #tpu.memory_space<vmem>>, vector<16x128xf32>
    tpu.vector_store %arg4[%c0_2, %c384], %2 {strides = array<i32>} : memref<16x512xf32, #tpu.memory_space<vmem>>, vector<16x128xf32>,
    %c0_3 = arith.constant 0 : index
    %c0_4 = arith.constant 0 : index
    %c0_5 = arith.constant 0 : index
    %4 = vector.load %arg1[%c0_3, %c0_4, %c0_5] : memref<1x8x256xf32, #tpu.memory_space<vmem>>, vector<1x8x256xf32>
    %5 = vector.shape_cast %4 : vector<1x8x256xf32> to vector<8x256xf32>
    %c0_6 = arith.constant 0 : index
    %c128 = arith.constant 128 : index
    %6 = vector.load %arg4[%c0_6, %c128] : memref<16x512xf32, #tpu.memory_space<vmem>>, vector<8x256xf32>
    tpu.vector_store %arg4[%c0_6, %c128], %5 {strides = array<i32>} : memref<16x512xf32, #tpu.memory_space<vmem>>, vector<8x256xf32>,
    %c0_7 = arith.constant 0 : index
    %c0_8 = arith.constant 0 : index
    %7 = vector.load %arg4[%c0_7, %c0_8] : memref<16x512xf32, #tpu.memory_space<vmem>>, vector<8x512xf32>
    %cst_9 = arith.constant 0.000000e+00 : f32
    %8 = vector.broadcast %cst_9 : f32 to vector<8x256xf32>
    %9 = vector.extract_strided_slice %7 {offsets = [0, 111], sizes = [8, 256], strides = [1, 1]} : vector<8x512xf32> to vector<8x256xf32>
    %c0_10 = arith.constant 0 : index
    %c0_11 = arith.constant 0 : index
    %c0_12 = arith.constant 0 : index
    %c0_13 = arith.constant 0 : index
    %10 = vector.load %arg2[%c0_10, %c0_11, %c0_12, %c0_13] : memref<3x17x16x256xf32, #tpu.memory_space<vmem>>, vector<1x1x8x256xf32>
    %11 = vector.shape_cast %10 : vector<1x1x8x256xf32> to vector<8x256xf32>
    %12 = arith.mulf %9, %11 : vector<8x256xf32>
    %13 = arith.addf %8, %12 : vector<8x256xf32>
    %14 = vector.extract_strided_slice %7 {offsets = [0, 112], sizes = [8, 256], strides = [1, 1]} : vector<8x512xf32> to vector<8x256xf32>
    %c0_14 = arith.constant 0 : index
    %c1 = arith.constant 1 : index
    %c0_15 = arith.constant 0 : index
    %c0_16 = arith.constant 0 : index
    %15 = vector.load %arg2[%c0_14, %c1, %c0_15, %c0_16] : memref<3x17x16x256xf32, #tpu.memory_space<vmem>>, vector<1x1x8x256xf32>
    %16 = vector.shape_cast %15 : vector<1x1x8x256xf32> to vector<8x256xf32>
    %17 = arith.mulf %14, %16 : vector<8x256xf32>
    %18 = arith.addf %13, %17 : vector<8x256xf32>
    %19 = vector.extract_strided_slice %7 {offsets = [0, 113], sizes = [8, 256], strides = [1, 1]} : vector<8x512xf32> to vector<8x256xf32>
    %c0_17 = arith.constant 0 : index
    %c2 = arith.constant 2 : index
    %c0_18 = arith.constant 0 : index
    %c0_19 = arith.constant 0 : index
    %20 = vector.load %arg2[%c0_17, %c2, %c0_18, %c0_19] : memref<3x17x16x256xf32, #tpu.memory_space<vmem>>, vector<1x1x8x256xf32>
    %21 = vector.shape_cast %20 : vector<1x1x8x256xf32> to vector<8x256xf32>
    %22 = arith.mulf %19, %21 : vector<8x256xf32>
    %23 = arith.addf %18, %22 : vector<8x256xf32>
    %24 = vector.extract_strided_slice %7 {offsets = [0, 127], sizes = [8, 256], strides = [1, 1]} : vector<8x512xf32> to vector<8x256xf32>
    %c0_20 = arith.constant 0 : index
    %c3 = arith.constant 3 : index
    %c0_21 = arith.constant 0 : index
    %c0_22 = arith.constant 0 : index
    %25 = vector.load %arg2[%c0_20, %c3, %c0_21, %c0_22] : memref<3x17x16x256xf32, #tpu.memory_space<vmem>>, vector<1x1x8x256xf32>
    %26 = vector.shape_cast %25 : vector<1x1x8x256xf32> to vector<8x256xf32>
    %27 = arith.mulf %24, %26 : vector<8x256xf32>
    %28 = arith.addf %23, %27 : vector<8x256xf32>
    %29 = vector.extract_strided_slice %7 {offsets = [0, 128], sizes = [8, 256], strides = [1, 1]} : vector<8x512xf32> to vector<8x256xf32>
    %c0_23 = arith.constant 0 : index
    %c4 = arith.constant 4 : index
    %c0_24 = arith.constant 0 : index
    %c0_25 = arith.constant 0 : index
    %30 = vector.load %arg2[%c0_23, %c4, %c0_24, %c0_25] : memref<3x17x16x256xf32, #tpu.memory_space<vmem>>, vector<1x1x8x256xf32>
    %31 = vector.shape_cast %30 : vector<1x1x8x256xf32> to vector<8x256xf32>
    %32 = arith.mulf %29, %31 : vector<8x256xf32>
    %33 = arith.addf %28, %32 : vector<8x256xf32>
    %34 = vector.extract_strided_slice %7 {offsets = [0, 129], sizes = [8, 256], strides = [1, 1]} : vector<8x512xf32> to vector<8x256xf32>
    %c0_26 = arith.constant 0 : index
    %c5 = arith.constant 5 : index
    %c0_27 = arith.constant 0 : index
    %c0_28 = arith.constant 0 : index
    %35 = vector.load %arg2[%c0_26, %c5, %c0_27, %c0_28] : memref<3x17x16x256xf32, #tpu.memory_space<vmem>>, vector<1x1x8x256xf32>
    %36 = vector.shape_cast %35 : vector<1x1x8x256xf32> to vector<8x256xf32>
    %37 = arith.mulf %34, %36 : vector<8x256xf32>
    %38 = arith.addf %33, %37 : vector<8x256xf32>
    %39 = vector.extract_strided_slice %7 {offsets = [0, 143], sizes = [8, 256], strides = [1, 1]} : vector<8x512xf32> to vector<8x256xf32>
    %c0_29 = arith.constant 0 : index
    %c6 = arith.constant 6 : index
    %c0_30 = arith.constant 0 : index
    %c0_31 = arith.constant 0 : index
    %40 = vector.load %arg2[%c0_29, %c6, %c0_30, %c0_31] : memref<3x17x16x256xf32, #tpu.memory_space<vmem>>, vector<1x1x8x256xf32>
    %41 = vector.shape_cast %40 : vector<1x1x8x256xf32> to vector<8x256xf32>
    %42 = arith.mulf %39, %41 : vector<8x256xf32>
    %43 = arith.addf %38, %42 : vector<8x256xf32>
    %44 = vector.extract_strided_slice %7 {offsets = [0, 144], sizes = [8, 256], strides = [1, 1]} : vector<8x512xf32> to vector<8x256xf32>
    %c0_32 = arith.constant 0 : index
    %c7 = arith.constant 7 : index
    %c0_33 = arith.constant 0 : index
    %c0_34 = arith.constant 0 : index
    %45 = vector.load %arg2[%c0_32, %c7, %c0_33, %c0_34] : memref<3x17x16x256xf32, #tpu.memory_space<vmem>>, vector<1x1x8x256xf32>
    %46 = vector.shape_cast %45 : vector<1x1x8x256xf32> to vector<8x256xf32>
    %47 = arith.mulf %44, %46 : vector<8x256xf32>
    %48 = arith.addf %43, %47 : vector<8x256xf32>
    %49 = vector.extract_strided_slice %7 {offsets = [0, 145], sizes = [8, 256], strides = [1, 1]} : vector<8x512xf32> to vector<8x256xf32>
    %c0_35 = arith.constant 0 : index
    %c8 = arith.constant 8 : index
    %c0_36 = arith.constant 0 : index
    %c0_37 = arith.constant 0 : index
    %50 = vector.load %arg2[%c0_35, %c8, %c0_36, %c0_37] : memref<3x17x16x256xf32, #tpu.memory_space<vmem>>, vector<1x1x8x256xf32>
    %51 = vector.shape_cast %50 : vector<1x1x8x256xf32> to vector<8x256xf32>
    %52 = arith.mulf %49, %51 : vector<8x256xf32>
    %53 = arith.addf %48, %52 : vector<8x256xf32>
    %cst_38 = arith.constant 0.000000e+00 : f32
    %54 = vector.broadcast %cst_38 : f32 to vector<8x256xf32>
    %c0_39 = arith.constant 0 : index
    %c9 = arith.constant 9 : index
    %c0_40 = arith.constant 0 : index
    %c0_41 = arith.constant 0 : index
    %55 = vector.load %arg2[%c0_39, %c9, %c0_40, %c0_41] : memref<3x17x16x256xf32, #tpu.memory_space<vmem>>, vector<1x1x8x256xf32>
    %56 = vector.shape_cast %55 : vector<1x1x8x256xf32> to vector<8x256xf32>
    %57 = vector.extract_strided_slice %53 {offsets = [0, 0], sizes = [1, 256], strides = [1, 1]} : vector<8x256xf32> to vector<1x256xf32>
    %58 = vector.broadcast %57 : vector<1x256xf32> to vector<8x256xf32>
    %59 = arith.mulf %56, %58 : vector<8x256xf32>
    %60 = arith.addf %54, %59 : vector<8x256xf32>
    %c0_42 = arith.constant 0 : index
    %c10 = arith.constant 10 : index
    %c0_43 = arith.constant 0 : index
    %c0_44 = arith.constant 0 : index
    %61 = vector.load %arg2[%c0_42, %c10, %c0_43, %c0_44] : memref<3x17x16x256xf32, #tpu.memory_space<vmem>>, vector<1x1x8x256xf32>
    %62 = vector.shape_cast %61 : vector<1x1x8x256xf32> to vector<8x256xf32>
    %63 = vector.extract_strided_slice %53 {offsets = [1, 0], sizes = [1, 256], strides = [1, 1]} : vector<8x256xf32> to vector<1x256xf32>
    %64 = vector.broadcast %63 : vector<1x256xf32> to vector<8x256xf32>
    %65 = arith.mulf %62, %64 : vector<8x256xf32>
    %66 = arith.addf %60, %65 : vector<8x256xf32>
    %c0_45 = arith.constant 0 : index
    %c11 = arith.constant 11 : index
    %c0_46 = arith.constant 0 : index
    %c0_47 = arith.constant 0 : index
    %67 = vector.load %arg2[%c0_45, %c11, %c0_46, %c0_47] : memref<3x17x16x256xf32, #tpu.memory_space<vmem>>, vector<1x1x8x256xf32>
    %68 = vector.shape_cast %67 : vector<1x1x8x256xf32> to vector<8x256xf32>
    %69 = vector.extract_strided_slice %53 {offsets = [2, 0], sizes = [1, 256], strides = [1, 1]} : vector<8x256xf32> to vector<1x256xf32>
    %70 = vector.broadcast %69 : vector<1x256xf32> to vector<8x256xf32>
    %71 = arith.mulf %68, %70 : vector<8x256xf32>
    %72 = arith.addf %66, %71 : vector<8x256xf32>
    %c0_48 = arith.constant 0 : index
    %c12 = arith.constant 12 : index
    %c0_49 = arith.constant 0 : index
    %c0_50 = arith.constant 0 : index
    %73 = vector.load %arg2[%c0_48, %c12, %c0_49, %c0_50] : memref<3x17x16x256xf32, #tpu.memory_space<vmem>>, vector<1x1x8x256xf32>
    %74 = vector.shape_cast %73 : vector<1x1x8x256xf32> to vector<8x256xf32>
    %75 = vector.extract_strided_slice %53 {offsets = [3, 0], sizes = [1, 256], strides = [1, 1]} : vector<8x256xf32> to vector<1x256xf32>
    %76 = vector.broadcast %75 : vector<1x256xf32> to vector<8x256xf32>
    %77 = arith.mulf %74, %76 : vector<8x256xf32>
    %78 = arith.addf %72, %77 : vector<8x256xf32>
    %cst_51 = arith.constant 0.000000e+00 : f32
    %79 = vector.broadcast %cst_51 : f32 to vector<8x256xf32>
    %c0_52 = arith.constant 0 : index
    %c9_53 = arith.constant 9 : index
    %c0_54 = arith.constant 0 : index
    %c0_55 = arith.constant 0 : index
    %80 = vector.load %arg2[%c0_52, %c9_53, %c0_54, %c0_55] : memref<3x17x16x256xf32, #tpu.memory_space<vmem>>, vector<1x1x8x256xf32>
    %81 = vector.shape_cast %80 : vector<1x1x8x256xf32> to vector<8x256xf32>
    %82 = vector.extract_strided_slice %53 {offsets = [4, 0], sizes = [1, 256], strides = [1, 1]} : vector<8x256xf32> to vector<1x256xf32>
    %83 = vector.broadcast %82 : vector<1x256xf32> to vector<8x256xf32>
    %84 = arith.mulf %81, %83 : vector<8x256xf32>
    %85 = arith.addf %79, %84 : vector<8x256xf32>
    %c0_56 = arith.constant 0 : index
    %c10_57 = arith.constant 10 : index
    %c0_58 = arith.constant 0 : index
    %c0_59 = arith.constant 0 : index
    %86 = vector.load %arg2[%c0_56, %c10_57, %c0_58, %c0_59] : memref<3x17x16x256xf32, #tpu.memory_space<vmem>>, vector<1x1x8x256xf32>
    %87 = vector.shape_cast %86 : vector<1x1x8x256xf32> to vector<8x256xf32>
    %88 = vector.extract_strided_slice %53 {offsets = [5, 0], sizes = [1, 256], strides = [1, 1]} : vector<8x256xf32> to vector<1x256xf32>
    %89 = vector.broadcast %88 : vector<1x256xf32> to vector<8x256xf32>
    %90 = arith.mulf %87, %89 : vector<8x256xf32>
    %91 = arith.addf %85, %90 : vector<8x256xf32>
    %c0_60 = arith.constant 0 : index
    %c11_61 = arith.constant 11 : index
    %c0_62 = arith.constant 0 : index
    %c0_63 = arith.constant 0 : index
    %92 = vector.load %arg2[%c0_60, %c11_61, %c0_62, %c0_63] : memref<3x17x16x256xf32, #tpu.memory_space<vmem>>, vector<1x1x8x256xf32>
    %93 = vector.shape_cast %92 : vector<1x1x8x256xf32> to vector<8x256xf32>
    %94 = vector.extract_strided_slice %53 {offsets = [6, 0], sizes = [1, 256], strides = [1, 1]} : vector<8x256xf32> to vector<1x256xf32>
    %95 = vector.broadcast %94 : vector<1x256xf32> to vector<8x256xf32>
    %96 = arith.mulf %93, %95 : vector<8x256xf32>
    %97 = arith.addf %91, %96 : vector<8x256xf32>
    %c0_64 = arith.constant 0 : index
    %c12_65 = arith.constant 12 : index
    %c0_66 = arith.constant 0 : index
    %c0_67 = arith.constant 0 : index
    %98 = vector.load %arg2[%c0_64, %c12_65, %c0_66, %c0_67] : memref<3x17x16x256xf32, #tpu.memory_space<vmem>>, vector<1x1x8x256xf32>
    %99 = vector.shape_cast %98 : vector<1x1x8x256xf32> to vector<8x256xf32>
    %100 = vector.extract_strided_slice %53 {offsets = [7, 0], sizes = [1, 256], strides = [1, 1]} : vector<8x256xf32> to vector<1x256xf32>
    %101 = vector.broadcast %100 : vector<1x256xf32> to vector<8x256xf32>
    %102 = arith.mulf %99, %101 : vector<8x256xf32>
    %103 = arith.addf %97, %102 : vector<8x256xf32>
    %104 = tpu.concatenate %78, %103 in 0 : vector<8x256xf32>, vector<8x256xf32> -> vector<16x256xf32>
    %cst_68 = arith.constant 0.000000e+00 : f32
    %105 = vector.broadcast %cst_68 : f32 to vector<16x256xf32>
    %106 = arith.maximumf %104, %105 : vector<16x256xf32>
    %c0_69 = arith.constant 0 : index
    %c128_70 = arith.constant 128 : index
    %107 = vector.load %arg4[%c0_69, %c128_70] : memref<16x512xf32, #tpu.memory_space<vmem>>, vector<16x256xf32>
    tpu.vector_store %arg4[%c0_69, %c128_70], %106 {strides = array<i32>} : memref<16x512xf32, #tpu.memory_space<vmem>>, vector<16x256xf32>,
    %c0_71 = arith.constant 0 : index
    %c0_72 = arith.constant 0 : index
    %108 = vector.load %arg4[%c0_71, %c0_72] : memref<16x512xf32, #tpu.memory_space<vmem>>, vector<16x512xf32>
    %cst_73 = arith.constant 0.000000e+00 : f32
    %109 = vector.broadcast %cst_73 : f32 to vector<16x256xf32>
    %110 = vector.extract_strided_slice %108 {offsets = [0, 111], sizes = [16, 256], strides = [1, 1]} : vector<16x512xf32> to vector<16x256xf32>
    %c1_74 = arith.constant 1 : index
    %c0_75 = arith.constant 0 : index
    %c0_76 = arith.constant 0 : index
    %c0_77 = arith.constant 0 : index
    %111 = vector.load %arg2[%c1_74, %c0_75, %c0_76, %c0_77] : memref<3x17x16x256xf32, #tpu.memory_space<vmem>>, vector<1x1x16x256xf32>
    %112 = vector.shape_cast %111 : vector<1x1x16x256xf32> to vector<16x256xf32>
    %113 = arith.mulf %110, %112 : vector<16x256xf32>
    %114 = arith.addf %109, %113 : vector<16x256xf32>
    %115 = vector.extract_strided_slice %108 {offsets = [0, 112], sizes = [16, 256], strides = [1, 1]} : vector<16x512xf32> to vector<16x256xf32>
    %c1_78 = arith.constant 1 : index
    %c1_79 = arith.constant 1 : index
    %c0_80 = arith.constant 0 : index
    %c0_81 = arith.constant 0 : index
    %116 = vector.load %arg2[%c1_78, %c1_79, %c0_80, %c0_81] : memref<3x17x16x256xf32, #tpu.memory_space<vmem>>, vector<1x1x16x256xf32>
    %117 = vector.shape_cast %116 : vector<1x1x16x256xf32> to vector<16x256xf32>
    %118 = arith.mulf %115, %117 : vector<16x256xf32>
    %119 = arith.addf %114, %118 : vector<16x256xf32>
    %120 = vector.extract_strided_slice %108 {offsets = [0, 113], sizes = [16, 256], strides = [1, 1]} : vector<16x512xf32> to vector<16x256xf32>
    %c1_82 = arith.constant 1 : index
    %c2_83 = arith.constant 2 : index
    %c0_84 = arith.constant 0 : index
    %c0_85 = arith.constant 0 : index
    %121 = vector.load %arg2[%c1_82, %c2_83, %c0_84, %c0_85] : memref<3x17x16x256xf32, #tpu.memory_space<vmem>>, vector<1x1x16x256xf32>
    %122 = vector.shape_cast %121 : vector<1x1x16x256xf32> to vector<16x256xf32>
    %123 = arith.mulf %120, %122 : vector<16x256xf32>
    %124 = arith.addf %119, %123 : vector<16x256xf32>
    %125 = vector.extract_strided_slice %108 {offsets = [0, 127], sizes = [16, 256], strides = [1, 1]} : vector<16x512xf32> to vector<16x256xf32>
    %c1_86 = arith.constant 1 : index
    %c3_87 = arith.constant 3 : index
    %c0_88 = arith.constant 0 : index
    %c0_89 = arith.constant 0 : index
    %126 = vector.load %arg2[%c1_86, %c3_87, %c0_88, %c0_89] : memref<3x17x16x256xf32, #tpu.memory_space<vmem>>, vector<1x1x16x256xf32>
    %127 = vector.shape_cast %126 : vector<1x1x16x256xf32> to vector<16x256xf32>
    %128 = arith.mulf %125, %127 : vector<16x256xf32>
    %129 = arith.addf %124, %128 : vector<16x256xf32>
    %130 = vector.extract_strided_slice %108 {offsets = [0, 128], sizes = [16, 256], strides = [1, 1]} : vector<16x512xf32> to vector<16x256xf32>
    %c1_90 = arith.constant 1 : index
    %c4_91 = arith.constant 4 : index
    %c0_92 = arith.constant 0 : index
    %c0_93 = arith.constant 0 : index
    %131 = vector.load %arg2[%c1_90, %c4_91, %c0_92, %c0_93] : memref<3x17x16x256xf32, #tpu.memory_space<vmem>>, vector<1x1x16x256xf32>
    %132 = vector.shape_cast %131 : vector<1x1x16x256xf32> to vector<16x256xf32>
    %133 = arith.mulf %130, %132 : vector<16x256xf32>
    %134 = arith.addf %129, %133 : vector<16x256xf32>
    %135 = vector.extract_strided_slice %108 {offsets = [0, 129], sizes = [16, 256], strides = [1, 1]} : vector<16x512xf32> to vector<16x256xf32>
    %c1_94 = arith.constant 1 : index
    %c5_95 = arith.constant 5 : index
    %c0_96 = arith.constant 0 : index
    %c0_97 = arith.constant 0 : index
    %136 = vector.load %arg2[%c1_94, %c5_95, %c0_96, %c0_97] : memref<3x17x16x256xf32, #tpu.memory_space<vmem>>, vector<1x1x16x256xf32>
    %137 = vector.shape_cast %136 : vector<1x1x16x256xf32> to vector<16x256xf32>
    %138 = arith.mulf %135, %137 : vector<16x256xf32>
    %139 = arith.addf %134, %138 : vector<16x256xf32>
    %140 = vector.extract_strided_slice %108 {offsets = [0, 143], sizes = [16, 256], strides = [1, 1]} : vector<16x512xf32> to vector<16x256xf32>
    %c1_98 = arith.constant 1 : index
    %c6_99 = arith.constant 6 : index
    %c0_100 = arith.constant 0 : index
    %c0_101 = arith.constant 0 : index
    %141 = vector.load %arg2[%c1_98, %c6_99, %c0_100, %c0_101] : memref<3x17x16x256xf32, #tpu.memory_space<vmem>>, vector<1x1x16x256xf32>
    %142 = vector.shape_cast %141 : vector<1x1x16x256xf32> to vector<16x256xf32>
    %143 = arith.mulf %140, %142 : vector<16x256xf32>
    %144 = arith.addf %139, %143 : vector<16x256xf32>
    %145 = vector.extract_strided_slice %108 {offsets = [0, 144], sizes = [16, 256], strides = [1, 1]} : vector<16x512xf32> to vector<16x256xf32>
    %c1_102 = arith.constant 1 : index
    %c7_103 = arith.constant 7 : index
    %c0_104 = arith.constant 0 : index
    %c0_105 = arith.constant 0 : index
    %146 = vector.load %arg2[%c1_102, %c7_103, %c0_104, %c0_105] : memref<3x17x16x256xf32, #tpu.memory_space<vmem>>, vector<1x1x16x256xf32>
    %147 = vector.shape_cast %146 : vector<1x1x16x256xf32> to vector<16x256xf32>
    %148 = arith.mulf %145, %147 : vector<16x256xf32>
    %149 = arith.addf %144, %148 : vector<16x256xf32>
    %150 = vector.extract_strided_slice %108 {offsets = [0, 145], sizes = [16, 256], strides = [1, 1]} : vector<16x512xf32> to vector<16x256xf32>
    %c1_106 = arith.constant 1 : index
    %c8_107 = arith.constant 8 : index
    %c0_108 = arith.constant 0 : index
    %c0_109 = arith.constant 0 : index
    %151 = vector.load %arg2[%c1_106, %c8_107, %c0_108, %c0_109] : memref<3x17x16x256xf32, #tpu.memory_space<vmem>>, vector<1x1x16x256xf32>
    %152 = vector.shape_cast %151 : vector<1x1x16x256xf32> to vector<16x256xf32>
    %153 = arith.mulf %150, %152 : vector<16x256xf32>
    %154 = arith.addf %149, %153 : vector<16x256xf32>
    %cst_110 = arith.constant 0.000000e+00 : f32
    %155 = vector.broadcast %cst_110 : f32 to vector<8x256xf32>
    %c1_111 = arith.constant 1 : index
    %c9_112 = arith.constant 9 : index
    %c0_113 = arith.constant 0 : index
    %c0_114 = arith.constant 0 : index
    %156 = vector.load %arg2[%c1_111, %c9_112, %c0_113, %c0_114] : memref<3x17x16x256xf32, #tpu.memory_space<vmem>>, vector<1x1x8x256xf32>
    %157 = vector.shape_cast %156 : vector<1x1x8x256xf32> to vector<8x256xf32>
    %158 = vector.extract_strided_slice %154 {offsets = [0, 0], sizes = [1, 256], strides = [1, 1]} : vector<16x256xf32> to vector<1x256xf32>
    %159 = vector.broadcast %158 : vector<1x256xf32> to vector<8x256xf32>
    %160 = arith.mulf %157, %159 : vector<8x256xf32>
    %161 = arith.addf %155, %160 : vector<8x256xf32>
    %c1_115 = arith.constant 1 : index
    %c10_116 = arith.constant 10 : index
    %c0_117 = arith.constant 0 : index
    %c0_118 = arith.constant 0 : index
    %162 = vector.load %arg2[%c1_115, %c10_116, %c0_117, %c0_118] : memref<3x17x16x256xf32, #tpu.memory_space<vmem>>, vector<1x1x8x256xf32>
    %163 = vector.shape_cast %162 : vector<1x1x8x256xf32> to vector<8x256xf32>
    %164 = vector.extract_strided_slice %154 {offsets = [1, 0], sizes = [1, 256], strides = [1, 1]} : vector<16x256xf32> to vector<1x256xf32>
    %165 = vector.broadcast %164 : vector<1x256xf32> to vector<8x256xf32>
    %166 = arith.mulf %163, %165 : vector<8x256xf32>
    %167 = arith.addf %161, %166 : vector<8x256xf32>
    %c1_119 = arith.constant 1 : index
    %c11_120 = arith.constant 11 : index
    %c0_121 = arith.constant 0 : index
    %c0_122 = arith.constant 0 : index
    %168 = vector.load %arg2[%c1_119, %c11_120, %c0_121, %c0_122] : memref<3x17x16x256xf32, #tpu.memory_space<vmem>>, vector<1x1x8x256xf32>
    %169 = vector.shape_cast %168 : vector<1x1x8x256xf32> to vector<8x256xf32>
    %170 = vector.extract_strided_slice %154 {offsets = [2, 0], sizes = [1, 256], strides = [1, 1]} : vector<16x256xf32> to vector<1x256xf32>
    %171 = vector.broadcast %170 : vector<1x256xf32> to vector<8x256xf32>
    %172 = arith.mulf %169, %171 : vector<8x256xf32>
    %173 = arith.addf %167, %172 : vector<8x256xf32>
    %c1_123 = arith.constant 1 : index
    %c12_124 = arith.constant 12 : index
    %c0_125 = arith.constant 0 : index
    %c0_126 = arith.constant 0 : index
    %174 = vector.load %arg2[%c1_123, %c12_124, %c0_125, %c0_126] : memref<3x17x16x256xf32, #tpu.memory_space<vmem>>, vector<1x1x8x256xf32>
    %175 = vector.shape_cast %174 : vector<1x1x8x256xf32> to vector<8x256xf32>
    %176 = vector.extract_strided_slice %154 {offsets = [3, 0], sizes = [1, 256], strides = [1, 1]} : vector<16x256xf32> to vector<1x256xf32>
    %177 = vector.broadcast %176 : vector<1x256xf32> to vector<8x256xf32>
    %178 = arith.mulf %175, %177 : vector<8x256xf32>
    %179 = arith.addf %173, %178 : vector<8x256xf32>
    %c1_127 = arith.constant 1 : index
    %c13 = arith.constant 13 : index
    %c0_128 = arith.constant 0 : index
    %c0_129 = arith.constant 0 : index
    %180 = vector.load %arg2[%c1_127, %c13, %c0_128, %c0_129] : memref<3x17x16x256xf32, #tpu.memory_space<vmem>>, vector<1x1x8x256xf32>
    %181 = vector.shape_cast %180 : vector<1x1x8x256xf32> to vector<8x256xf32>
    %182 = vector.extract_strided_slice %154 {offsets = [4, 0], sizes = [1, 256], strides = [1, 1]} : vector<16x256xf32> to vector<1x256xf32>
    %183 = vector.broadcast %182 : vector<1x256xf32> to vector<8x256xf32>
    %184 = arith.mulf %181, %183 : vector<8x256xf32>
    %185 = arith.addf %179, %184 : vector<8x256xf32>
    %c1_130 = arith.constant 1 : index
    %c14 = arith.constant 14 : index
    %c0_131 = arith.constant 0 : index
    %c0_132 = arith.constant 0 : index
    %186 = vector.load %arg2[%c1_130, %c14, %c0_131, %c0_132] : memref<3x17x16x256xf32, #tpu.memory_space<vmem>>, vector<1x1x8x256xf32>
    %187 = vector.shape_cast %186 : vector<1x1x8x256xf32> to vector<8x256xf32>
    %188 = vector.extract_strided_slice %154 {offsets = [5, 0], sizes = [1, 256], strides = [1, 1]} : vector<16x256xf32> to vector<1x256xf32>
    %189 = vector.broadcast %188 : vector<1x256xf32> to vector<8x256xf32>
    %190 = arith.mulf %187, %189 : vector<8x256xf32>
    %191 = arith.addf %185, %190 : vector<8x256xf32>
    %c1_133 = arith.constant 1 : index
    %c15 = arith.constant 15 : index
    %c0_134 = arith.constant 0 : index
    %c0_135 = arith.constant 0 : index
    %192 = vector.load %arg2[%c1_133, %c15, %c0_134, %c0_135] : memref<3x17x16x256xf32, #tpu.memory_space<vmem>>, vector<1x1x8x256xf32>
    %193 = vector.shape_cast %192 : vector<1x1x8x256xf32> to vector<8x256xf32>
    %194 = vector.extract_strided_slice %154 {offsets = [6, 0], sizes = [1, 256], strides = [1, 1]} : vector<16x256xf32> to vector<1x256xf32>
    %195 = vector.broadcast %194 : vector<1x256xf32> to vector<8x256xf32>
    %196 = arith.mulf %193, %195 : vector<8x256xf32>
    %197 = arith.addf %191, %196 : vector<8x256xf32>
    %c1_136 = arith.constant 1 : index
    %c16 = arith.constant 16 : index
    %c0_137 = arith.constant 0 : index
    %c0_138 = arith.constant 0 : index
    %198 = vector.load %arg2[%c1_136, %c16, %c0_137, %c0_138] : memref<3x17x16x256xf32, #tpu.memory_space<vmem>>, vector<1x1x8x256xf32>
    %199 = vector.shape_cast %198 : vector<1x1x8x256xf32> to vector<8x256xf32>
    %200 = vector.extract_strided_slice %154 {offsets = [7, 0], sizes = [1, 256], strides = [1, 1]} : vector<16x256xf32> to vector<1x256xf32>
    %201 = vector.broadcast %200 : vector<1x256xf32> to vector<8x256xf32>
    %202 = arith.mulf %199, %201 : vector<8x256xf32>
    %203 = arith.addf %197, %202 : vector<8x256xf32>
    %cst_139 = arith.constant 0.000000e+00 : f32
    %204 = vector.broadcast %cst_139 : f32 to vector<8x256xf32>
    %c1_140 = arith.constant 1 : index
    %c9_141 = arith.constant 9 : index
    %c0_142 = arith.constant 0 : index
    %c0_143 = arith.constant 0 : index
    %205 = vector.load %arg2[%c1_140, %c9_141, %c0_142, %c0_143] : memref<3x17x16x256xf32, #tpu.memory_space<vmem>>, vector<1x1x8x256xf32>
    %206 = vector.shape_cast %205 : vector<1x1x8x256xf32> to vector<8x256xf32>
    %207 = vector.extract_strided_slice %154 {offsets = [8, 0], sizes = [1, 256], strides = [1, 1]} : vector<16x256xf32> to vector<1x256xf32>
    %208 = vector.broadcast %207 : vector<1x256xf32> to vector<8x256xf32>
    %209 = arith.mulf %206, %208 : vector<8x256xf32>
    %210 = arith.addf %204, %209 : vector<8x256xf32>
    %c1_144 = arith.constant 1 : index
    %c10_145 = arith.constant 10 : index
    %c0_146 = arith.constant 0 : index
    %c0_147 = arith.constant 0 : index
    %211 = vector.load %arg2[%c1_144, %c10_145, %c0_146, %c0_147] : memref<3x17x16x256xf32, #tpu.memory_space<vmem>>, vector<1x1x8x256xf32>
    %212 = vector.shape_cast %211 : vector<1x1x8x256xf32> to vector<8x256xf32>
    %213 = vector.extract_strided_slice %154 {offsets = [9, 0], sizes = [1, 256], strides = [1, 1]} : vector<16x256xf32> to vector<1x256xf32>
    %214 = vector.broadcast %213 : vector<1x256xf32> to vector<8x256xf32>
    %215 = arith.mulf %212, %214 : vector<8x256xf32>
    %216 = arith.addf %210, %215 : vector<8x256xf32>
    %c1_148 = arith.constant 1 : index
    %c11_149 = arith.constant 11 : index
    %c0_150 = arith.constant 0 : index
    %c0_151 = arith.constant 0 : index
    %217 = vector.load %arg2[%c1_148, %c11_149, %c0_150, %c0_151] : memref<3x17x16x256xf32, #tpu.memory_space<vmem>>, vector<1x1x8x256xf32>
    %218 = vector.shape_cast %217 : vector<1x1x8x256xf32> to vector<8x256xf32>
    %219 = vector.extract_strided_slice %154 {offsets = [10, 0], sizes = [1, 256], strides = [1, 1]} : vector<16x256xf32> to vector<1x256xf32>
    %220 = vector.broadcast %219 : vector<1x256xf32> to vector<8x256xf32>
    %221 = arith.mulf %218, %220 : vector<8x256xf32>
    %222 = arith.addf %216, %221 : vector<8x256xf32>
    %c1_152 = arith.constant 1 : index
    %c12_153 = arith.constant 12 : index
    %c0_154 = arith.constant 0 : index
    %c0_155 = arith.constant 0 : index
    %223 = vector.load %arg2[%c1_152, %c12_153, %c0_154, %c0_155] : memref<3x17x16x256xf32, #tpu.memory_space<vmem>>, vector<1x1x8x256xf32>
    %224 = vector.shape_cast %223 : vector<1x1x8x256xf32> to vector<8x256xf32>
    %225 = vector.extract_strided_slice %154 {offsets = [11, 0], sizes = [1, 256], strides = [1, 1]} : vector<16x256xf32> to vector<1x256xf32>
    %226 = vector.broadcast %225 : vector<1x256xf32> to vector<8x256xf32>
    %227 = arith.mulf %224, %226 : vector<8x256xf32>
    %228 = arith.addf %222, %227 : vector<8x256xf32>
    %c1_156 = arith.constant 1 : index
    %c13_157 = arith.constant 13 : index
    %c0_158 = arith.constant 0 : index
    %c0_159 = arith.constant 0 : index
    %229 = vector.load %arg2[%c1_156, %c13_157, %c0_158, %c0_159] : memref<3x17x16x256xf32, #tpu.memory_space<vmem>>, vector<1x1x8x256xf32>
    %230 = vector.shape_cast %229 : vector<1x1x8x256xf32> to vector<8x256xf32>
    %231 = vector.extract_strided_slice %154 {offsets = [12, 0], sizes = [1, 256], strides = [1, 1]} : vector<16x256xf32> to vector<1x256xf32>
    %232 = vector.broadcast %231 : vector<1x256xf32> to vector<8x256xf32>
    %233 = arith.mulf %230, %232 : vector<8x256xf32>
    %234 = arith.addf %228, %233 : vector<8x256xf32>
    %c1_160 = arith.constant 1 : index
    %c14_161 = arith.constant 14 : index
    %c0_162 = arith.constant 0 : index
    %c0_163 = arith.constant 0 : index
    %235 = vector.load %arg2[%c1_160, %c14_161, %c0_162, %c0_163] : memref<3x17x16x256xf32, #tpu.memory_space<vmem>>, vector<1x1x8x256xf32>
    %236 = vector.shape_cast %235 : vector<1x1x8x256xf32> to vector<8x256xf32>
    %237 = vector.extract_strided_slice %154 {offsets = [13, 0], sizes = [1, 256], strides = [1, 1]} : vector<16x256xf32> to vector<1x256xf32>
    %238 = vector.broadcast %237 : vector<1x256xf32> to vector<8x256xf32>
    %239 = arith.mulf %236, %238 : vector<8x256xf32>
    %240 = arith.addf %234, %239 : vector<8x256xf32>
    %c1_164 = arith.constant 1 : index
    %c15_165 = arith.constant 15 : index
    %c0_166 = arith.constant 0 : index
    %c0_167 = arith.constant 0 : index
    %241 = vector.load %arg2[%c1_164, %c15_165, %c0_166, %c0_167] : memref<3x17x16x256xf32, #tpu.memory_space<vmem>>, vector<1x1x8x256xf32>
    %242 = vector.shape_cast %241 : vector<1x1x8x256xf32> to vector<8x256xf32>
    %243 = vector.extract_strided_slice %154 {offsets = [14, 0], sizes = [1, 256], strides = [1, 1]} : vector<16x256xf32> to vector<1x256xf32>
    %244 = vector.broadcast %243 : vector<1x256xf32> to vector<8x256xf32>
    %245 = arith.mulf %242, %244 : vector<8x256xf32>
    %246 = arith.addf %240, %245 : vector<8x256xf32>
    %c1_168 = arith.constant 1 : index
    %c16_169 = arith.constant 16 : index
    %c0_170 = arith.constant 0 : index
    %c0_171 = arith.constant 0 : index
    %247 = vector.load %arg2[%c1_168, %c16_169, %c0_170, %c0_171] : memref<3x17x16x256xf32, #tpu.memory_space<vmem>>, vector<1x1x8x256xf32>
    %248 = vector.shape_cast %247 : vector<1x1x8x256xf32> to vector<8x256xf32>
    %249 = vector.extract_strided_slice %154 {offsets = [15, 0], sizes = [1, 256], strides = [1, 1]} : vector<16x256xf32> to vector<1x256xf32>
    %250 = vector.broadcast %249 : vector<1x256xf32> to vector<8x256xf32>
    %251 = arith.mulf %248, %250 : vector<8x256xf32>
    %252 = arith.addf %246, %251 : vector<8x256xf32>
    %253 = tpu.concatenate %203, %252 in 0 : vector<8x256xf32>, vector<8x256xf32> -> vector<16x256xf32>
    %254 = arith.addf %253, %106 : vector<16x256xf32>
    %cst_172 = arith.constant 0.000000e+00 : f32
    %255 = vector.broadcast %cst_172 : f32 to vector<16x256xf32>
    %256 = arith.maximumf %254, %255 : vector<16x256xf32>
    %c0_173 = arith.constant 0 : index
    %c128_174 = arith.constant 128 : index
    %257 = vector.load %arg4[%c0_173, %c128_174] : memref<16x512xf32, #tpu.memory_space<vmem>>, vector<16x256xf32>
    tpu.vector_store %arg4[%c0_173, %c128_174], %256 {strides = array<i32>} : memref<16x512xf32, #tpu.memory_space<vmem>>, vector<16x256xf32>,
    %c0_175 = arith.constant 0 : index
    %c0_176 = arith.constant 0 : index
    %258 = vector.load %arg4[%c0_175, %c0_176] : memref<16x512xf32, #tpu.memory_space<vmem>>, vector<16x512xf32>
    %cst_177 = arith.constant 0.000000e+00 : f32
    %259 = vector.broadcast %cst_177 : f32 to vector<16x256xf32>
    %260 = vector.extract_strided_slice %258 {offsets = [0, 111], sizes = [16, 256], strides = [1, 1]} : vector<16x512xf32> to vector<16x256xf32>
    %c2_178 = arith.constant 2 : index
    %c0_179 = arith.constant 0 : index
    %c0_180 = arith.constant 0 : index
    %c0_181 = arith.constant 0 : index
    %261 = vector.load %arg2[%c2_178, %c0_179, %c0_180, %c0_181] : memref<3x17x16x256xf32, #tpu.memory_space<vmem>>, vector<1x1x16x256xf32>
    %262 = vector.shape_cast %261 : vector<1x1x16x256xf32> to vector<16x256xf32>
    %263 = arith.mulf %260, %262 : vector<16x256xf32>
    %264 = arith.addf %259, %263 : vector<16x256xf32>
    %265 = vector.extract_strided_slice %258 {offsets = [0, 112], sizes = [16, 256], strides = [1, 1]} : vector<16x512xf32> to vector<16x256xf32>
    %c2_182 = arith.constant 2 : index
    %c1_183 = arith.constant 1 : index
    %c0_184 = arith.constant 0 : index
    %c0_185 = arith.constant 0 : index
    %266 = vector.load %arg2[%c2_182, %c1_183, %c0_184, %c0_185] : memref<3x17x16x256xf32, #tpu.memory_space<vmem>>, vector<1x1x16x256xf32>
    %267 = vector.shape_cast %266 : vector<1x1x16x256xf32> to vector<16x256xf32>
    %268 = arith.mulf %265, %267 : vector<16x256xf32>
    %269 = arith.addf %264, %268 : vector<16x256xf32>
    %270 = vector.extract_strided_slice %258 {offsets = [0, 113], sizes = [16, 256], strides = [1, 1]} : vector<16x512xf32> to vector<16x256xf32>
    %c2_186 = arith.constant 2 : index
    %c2_187 = arith.constant 2 : index
    %c0_188 = arith.constant 0 : index
    %c0_189 = arith.constant 0 : index
    %271 = vector.load %arg2[%c2_186, %c2_187, %c0_188, %c0_189] : memref<3x17x16x256xf32, #tpu.memory_space<vmem>>, vector<1x1x16x256xf32>
    %272 = vector.shape_cast %271 : vector<1x1x16x256xf32> to vector<16x256xf32>
    %273 = arith.mulf %270, %272 : vector<16x256xf32>
    %274 = arith.addf %269, %273 : vector<16x256xf32>
    %275 = vector.extract_strided_slice %258 {offsets = [0, 127], sizes = [16, 256], strides = [1, 1]} : vector<16x512xf32> to vector<16x256xf32>
    %c2_190 = arith.constant 2 : index
    %c3_191 = arith.constant 3 : index
    %c0_192 = arith.constant 0 : index
    %c0_193 = arith.constant 0 : index
    %276 = vector.load %arg2[%c2_190, %c3_191, %c0_192, %c0_193] : memref<3x17x16x256xf32, #tpu.memory_space<vmem>>, vector<1x1x16x256xf32>
    %277 = vector.shape_cast %276 : vector<1x1x16x256xf32> to vector<16x256xf32>
    %278 = arith.mulf %275, %277 : vector<16x256xf32>
    %279 = arith.addf %274, %278 : vector<16x256xf32>
    %280 = vector.extract_strided_slice %258 {offsets = [0, 128], sizes = [16, 256], strides = [1, 1]} : vector<16x512xf32> to vector<16x256xf32>
    %c2_194 = arith.constant 2 : index
    %c4_195 = arith.constant 4 : index
    %c0_196 = arith.constant 0 : index
    %c0_197 = arith.constant 0 : index
    %281 = vector.load %arg2[%c2_194, %c4_195, %c0_196, %c0_197] : memref<3x17x16x256xf32, #tpu.memory_space<vmem>>, vector<1x1x16x256xf32>
    %282 = vector.shape_cast %281 : vector<1x1x16x256xf32> to vector<16x256xf32>
    %283 = arith.mulf %280, %282 : vector<16x256xf32>
    %284 = arith.addf %279, %283 : vector<16x256xf32>
    %285 = vector.extract_strided_slice %258 {offsets = [0, 129], sizes = [16, 256], strides = [1, 1]} : vector<16x512xf32> to vector<16x256xf32>
    %c2_198 = arith.constant 2 : index
    %c5_199 = arith.constant 5 : index
    %c0_200 = arith.constant 0 : index
    %c0_201 = arith.constant 0 : index
    %286 = vector.load %arg2[%c2_198, %c5_199, %c0_200, %c0_201] : memref<3x17x16x256xf32, #tpu.memory_space<vmem>>, vector<1x1x16x256xf32>
    %287 = vector.shape_cast %286 : vector<1x1x16x256xf32> to vector<16x256xf32>
    %288 = arith.mulf %285, %287 : vector<16x256xf32>
    %289 = arith.addf %284, %288 : vector<16x256xf32>
    %290 = vector.extract_strided_slice %258 {offsets = [0, 143], sizes = [16, 256], strides = [1, 1]} : vector<16x512xf32> to vector<16x256xf32>
    %c2_202 = arith.constant 2 : index
    %c6_203 = arith.constant 6 : index
    %c0_204 = arith.constant 0 : index
    %c0_205 = arith.constant 0 : index
    %291 = vector.load %arg2[%c2_202, %c6_203, %c0_204, %c0_205] : memref<3x17x16x256xf32, #tpu.memory_space<vmem>>, vector<1x1x16x256xf32>
    %292 = vector.shape_cast %291 : vector<1x1x16x256xf32> to vector<16x256xf32>
    %293 = arith.mulf %290, %292 : vector<16x256xf32>
    %294 = arith.addf %289, %293 : vector<16x256xf32>
    %295 = vector.extract_strided_slice %258 {offsets = [0, 144], sizes = [16, 256], strides = [1, 1]} : vector<16x512xf32> to vector<16x256xf32>
    %c2_206 = arith.constant 2 : index
    %c7_207 = arith.constant 7 : index
    %c0_208 = arith.constant 0 : index
    %c0_209 = arith.constant 0 : index
    %296 = vector.load %arg2[%c2_206, %c7_207, %c0_208, %c0_209] : memref<3x17x16x256xf32, #tpu.memory_space<vmem>>, vector<1x1x16x256xf32>
    %297 = vector.shape_cast %296 : vector<1x1x16x256xf32> to vector<16x256xf32>
    %298 = arith.mulf %295, %297 : vector<16x256xf32>
    %299 = arith.addf %294, %298 : vector<16x256xf32>
    %300 = vector.extract_strided_slice %258 {offsets = [0, 145], sizes = [16, 256], strides = [1, 1]} : vector<16x512xf32> to vector<16x256xf32>
    %c2_210 = arith.constant 2 : index
    %c8_211 = arith.constant 8 : index
    %c0_212 = arith.constant 0 : index
    %c0_213 = arith.constant 0 : index
    %301 = vector.load %arg2[%c2_210, %c8_211, %c0_212, %c0_213] : memref<3x17x16x256xf32, #tpu.memory_space<vmem>>, vector<1x1x16x256xf32>
    %302 = vector.shape_cast %301 : vector<1x1x16x256xf32> to vector<16x256xf32>
    %303 = arith.mulf %300, %302 : vector<16x256xf32>
    %304 = arith.addf %299, %303 : vector<16x256xf32>
    %cst_214 = arith.constant 0.000000e+00 : f32
    %305 = vector.broadcast %cst_214 : f32 to vector<8x256xf32>
    %c2_215 = arith.constant 2 : index
    %c9_216 = arith.constant 9 : index
    %c0_217 = arith.constant 0 : index
    %c0_218 = arith.constant 0 : index
    %306 = vector.load %arg2[%c2_215, %c9_216, %c0_217, %c0_218] : memref<3x17x16x256xf32, #tpu.memory_space<vmem>>, vector<1x1x8x256xf32>
    %307 = vector.shape_cast %306 : vector<1x1x8x256xf32> to vector<8x256xf32>
    %308 = vector.extract_strided_slice %304 {offsets = [0, 0], sizes = [1, 256], strides = [1, 1]} : vector<16x256xf32> to vector<1x256xf32>
    %309 = vector.broadcast %308 : vector<1x256xf32> to vector<8x256xf32>
    %310 = arith.mulf %307, %309 : vector<8x256xf32>
    %311 = arith.addf %305, %310 : vector<8x256xf32>
    %c2_219 = arith.constant 2 : index
    %c10_220 = arith.constant 10 : index
    %c0_221 = arith.constant 0 : index
    %c0_222 = arith.constant 0 : index
    %312 = vector.load %arg2[%c2_219, %c10_220, %c0_221, %c0_222] : memref<3x17x16x256xf32, #tpu.memory_space<vmem>>, vector<1x1x8x256xf32>
    %313 = vector.shape_cast %312 : vector<1x1x8x256xf32> to vector<8x256xf32>
    %314 = vector.extract_strided_slice %304 {offsets = [1, 0], sizes = [1, 256], strides = [1, 1]} : vector<16x256xf32> to vector<1x256xf32>
    %315 = vector.broadcast %314 : vector<1x256xf32> to vector<8x256xf32>
    %316 = arith.mulf %313, %315 : vector<8x256xf32>
    %317 = arith.addf %311, %316 : vector<8x256xf32>
    %c2_223 = arith.constant 2 : index
    %c11_224 = arith.constant 11 : index
    %c0_225 = arith.constant 0 : index
    %c0_226 = arith.constant 0 : index
    %318 = vector.load %arg2[%c2_223, %c11_224, %c0_225, %c0_226] : memref<3x17x16x256xf32, #tpu.memory_space<vmem>>, vector<1x1x8x256xf32>
    %319 = vector.shape_cast %318 : vector<1x1x8x256xf32> to vector<8x256xf32>
    %320 = vector.extract_strided_slice %304 {offsets = [2, 0], sizes = [1, 256], strides = [1, 1]} : vector<16x256xf32> to vector<1x256xf32>
    %321 = vector.broadcast %320 : vector<1x256xf32> to vector<8x256xf32>
    %322 = arith.mulf %319, %321 : vector<8x256xf32>
    %323 = arith.addf %317, %322 : vector<8x256xf32>
    %c2_227 = arith.constant 2 : index
    %c12_228 = arith.constant 12 : index
    %c0_229 = arith.constant 0 : index
    %c0_230 = arith.constant 0 : index
    %324 = vector.load %arg2[%c2_227, %c12_228, %c0_229, %c0_230] : memref<3x17x16x256xf32, #tpu.memory_space<vmem>>, vector<1x1x8x256xf32>
    %325 = vector.shape_cast %324 : vector<1x1x8x256xf32> to vector<8x256xf32>
    %326 = vector.extract_strided_slice %304 {offsets = [3, 0], sizes = [1, 256], strides = [1, 1]} : vector<16x256xf32> to vector<1x256xf32>
    %327 = vector.broadcast %326 : vector<1x256xf32> to vector<8x256xf32>
    %328 = arith.mulf %325, %327 : vector<8x256xf32>
    %329 = arith.addf %323, %328 : vector<8x256xf32>
    %c2_231 = arith.constant 2 : index
    %c13_232 = arith.constant 13 : index
    %c0_233 = arith.constant 0 : index
    %c0_234 = arith.constant 0 : index
    %330 = vector.load %arg2[%c2_231, %c13_232, %c0_233, %c0_234] : memref<3x17x16x256xf32, #tpu.memory_space<vmem>>, vector<1x1x8x256xf32>
    %331 = vector.shape_cast %330 : vector<1x1x8x256xf32> to vector<8x256xf32>
    %332 = vector.extract_strided_slice %304 {offsets = [4, 0], sizes = [1, 256], strides = [1, 1]} : vector<16x256xf32> to vector<1x256xf32>
    %333 = vector.broadcast %332 : vector<1x256xf32> to vector<8x256xf32>
    %334 = arith.mulf %331, %333 : vector<8x256xf32>
    %335 = arith.addf %329, %334 : vector<8x256xf32>
    %c2_235 = arith.constant 2 : index
    %c14_236 = arith.constant 14 : index
    %c0_237 = arith.constant 0 : index
    %c0_238 = arith.constant 0 : index
    %336 = vector.load %arg2[%c2_235, %c14_236, %c0_237, %c0_238] : memref<3x17x16x256xf32, #tpu.memory_space<vmem>>, vector<1x1x8x256xf32>
    %337 = vector.shape_cast %336 : vector<1x1x8x256xf32> to vector<8x256xf32>
    %338 = vector.extract_strided_slice %304 {offsets = [5, 0], sizes = [1, 256], strides = [1, 1]} : vector<16x256xf32> to vector<1x256xf32>
    %339 = vector.broadcast %338 : vector<1x256xf32> to vector<8x256xf32>
    %340 = arith.mulf %337, %339 : vector<8x256xf32>
    %341 = arith.addf %335, %340 : vector<8x256xf32>
    %c2_239 = arith.constant 2 : index
    %c15_240 = arith.constant 15 : index
    %c0_241 = arith.constant 0 : index
    %c0_242 = arith.constant 0 : index
    %342 = vector.load %arg2[%c2_239, %c15_240, %c0_241, %c0_242] : memref<3x17x16x256xf32, #tpu.memory_space<vmem>>, vector<1x1x8x256xf32>
    %343 = vector.shape_cast %342 : vector<1x1x8x256xf32> to vector<8x256xf32>
    %344 = vector.extract_strided_slice %304 {offsets = [6, 0], sizes = [1, 256], strides = [1, 1]} : vector<16x256xf32> to vector<1x256xf32>
    %345 = vector.broadcast %344 : vector<1x256xf32> to vector<8x256xf32>
    %346 = arith.mulf %343, %345 : vector<8x256xf32>
    %347 = arith.addf %341, %346 : vector<8x256xf32>
    %c2_243 = arith.constant 2 : index
    %c16_244 = arith.constant 16 : index
    %c0_245 = arith.constant 0 : index
    %c0_246 = arith.constant 0 : index
    %348 = vector.load %arg2[%c2_243, %c16_244, %c0_245, %c0_246] : memref<3x17x16x256xf32, #tpu.memory_space<vmem>>, vector<1x1x8x256xf32>
    %349 = vector.shape_cast %348 : vector<1x1x8x256xf32> to vector<8x256xf32>
    %350 = vector.extract_strided_slice %304 {offsets = [7, 0], sizes = [1, 256], strides = [1, 1]} : vector<16x256xf32> to vector<1x256xf32>
    %351 = vector.broadcast %350 : vector<1x256xf32> to vector<8x256xf32>
    %352 = arith.mulf %349, %351 : vector<8x256xf32>
    %353 = arith.addf %347, %352 : vector<8x256xf32>
    %cst_247 = arith.constant 0.000000e+00 : f32
    %354 = vector.broadcast %cst_247 : f32 to vector<8x256xf32>
    %c2_248 = arith.constant 2 : index
    %c9_249 = arith.constant 9 : index
    %c0_250 = arith.constant 0 : index
    %c0_251 = arith.constant 0 : index
    %355 = vector.load %arg2[%c2_248, %c9_249, %c0_250, %c0_251] : memref<3x17x16x256xf32, #tpu.memory_space<vmem>>, vector<1x1x8x256xf32>
    %356 = vector.shape_cast %355 : vector<1x1x8x256xf32> to vector<8x256xf32>
    %357 = vector.extract_strided_slice %304 {offsets = [8, 0], sizes = [1, 256], strides = [1, 1]} : vector<16x256xf32> to vector<1x256xf32>
    %358 = vector.broadcast %357 : vector<1x256xf32> to vector<8x256xf32>
    %359 = arith.mulf %356, %358 : vector<8x256xf32>
    %360 = arith.addf %354, %359 : vector<8x256xf32>
    %c2_252 = arith.constant 2 : index
    %c10_253 = arith.constant 10 : index
    %c0_254 = arith.constant 0 : index
    %c0_255 = arith.constant 0 : index
    %361 = vector.load %arg2[%c2_252, %c10_253, %c0_254, %c0_255] : memref<3x17x16x256xf32, #tpu.memory_space<vmem>>, vector<1x1x8x256xf32>
    %362 = vector.shape_cast %361 : vector<1x1x8x256xf32> to vector<8x256xf32>
    %363 = vector.extract_strided_slice %304 {offsets = [9, 0], sizes = [1, 256], strides = [1, 1]} : vector<16x256xf32> to vector<1x256xf32>
    %364 = vector.broadcast %363 : vector<1x256xf32> to vector<8x256xf32>
    %365 = arith.mulf %362, %364 : vector<8x256xf32>
    %366 = arith.addf %360, %365 : vector<8x256xf32>
    %c2_256 = arith.constant 2 : index
    %c11_257 = arith.constant 11 : index
    %c0_258 = arith.constant 0 : index
    %c0_259 = arith.constant 0 : index
    %367 = vector.load %arg2[%c2_256, %c11_257, %c0_258, %c0_259] : memref<3x17x16x256xf32, #tpu.memory_space<vmem>>, vector<1x1x8x256xf32>
    %368 = vector.shape_cast %367 : vector<1x1x8x256xf32> to vector<8x256xf32>
    %369 = vector.extract_strided_slice %304 {offsets = [10, 0], sizes = [1, 256], strides = [1, 1]} : vector<16x256xf32> to vector<1x256xf32>
    %370 = vector.broadcast %369 : vector<1x256xf32> to vector<8x256xf32>
    %371 = arith.mulf %368, %370 : vector<8x256xf32>
    %372 = arith.addf %366, %371 : vector<8x256xf32>
    %c2_260 = arith.constant 2 : index
    %c12_261 = arith.constant 12 : index
    %c0_262 = arith.constant 0 : index
    %c0_263 = arith.constant 0 : index
    %373 = vector.load %arg2[%c2_260, %c12_261, %c0_262, %c0_263] : memref<3x17x16x256xf32, #tpu.memory_space<vmem>>, vector<1x1x8x256xf32>
    %374 = vector.shape_cast %373 : vector<1x1x8x256xf32> to vector<8x256xf32>
    %375 = vector.extract_strided_slice %304 {offsets = [11, 0], sizes = [1, 256], strides = [1, 1]} : vector<16x256xf32> to vector<1x256xf32>
    %376 = vector.broadcast %375 : vector<1x256xf32> to vector<8x256xf32>
    %377 = arith.mulf %374, %376 : vector<8x256xf32>
    %378 = arith.addf %372, %377 : vector<8x256xf32>
    %c2_264 = arith.constant 2 : index
    %c13_265 = arith.constant 13 : index
    %c0_266 = arith.constant 0 : index
    %c0_267 = arith.constant 0 : index
    %379 = vector.load %arg2[%c2_264, %c13_265, %c0_266, %c0_267] : memref<3x17x16x256xf32, #tpu.memory_space<vmem>>, vector<1x1x8x256xf32>
    %380 = vector.shape_cast %379 : vector<1x1x8x256xf32> to vector<8x256xf32>
    %381 = vector.extract_strided_slice %304 {offsets = [12, 0], sizes = [1, 256], strides = [1, 1]} : vector<16x256xf32> to vector<1x256xf32>
    %382 = vector.broadcast %381 : vector<1x256xf32> to vector<8x256xf32>
    %383 = arith.mulf %380, %382 : vector<8x256xf32>
    %384 = arith.addf %378, %383 : vector<8x256xf32>
    %c2_268 = arith.constant 2 : index
    %c14_269 = arith.constant 14 : index
    %c0_270 = arith.constant 0 : index
    %c0_271 = arith.constant 0 : index
    %385 = vector.load %arg2[%c2_268, %c14_269, %c0_270, %c0_271] : memref<3x17x16x256xf32, #tpu.memory_space<vmem>>, vector<1x1x8x256xf32>
    %386 = vector.shape_cast %385 : vector<1x1x8x256xf32> to vector<8x256xf32>
    %387 = vector.extract_strided_slice %304 {offsets = [13, 0], sizes = [1, 256], strides = [1, 1]} : vector<16x256xf32> to vector<1x256xf32>
    %388 = vector.broadcast %387 : vector<1x256xf32> to vector<8x256xf32>
    %389 = arith.mulf %386, %388 : vector<8x256xf32>
    %390 = arith.addf %384, %389 : vector<8x256xf32>
    %c2_272 = arith.constant 2 : index
    %c15_273 = arith.constant 15 : index
    %c0_274 = arith.constant 0 : index
    %c0_275 = arith.constant 0 : index
    %391 = vector.load %arg2[%c2_272, %c15_273, %c0_274, %c0_275] : memref<3x17x16x256xf32, #tpu.memory_space<vmem>>, vector<1x1x8x256xf32>
    %392 = vector.shape_cast %391 : vector<1x1x8x256xf32> to vector<8x256xf32>
    %393 = vector.extract_strided_slice %304 {offsets = [14, 0], sizes = [1, 256], strides = [1, 1]} : vector<16x256xf32> to vector<1x256xf32>
    %394 = vector.broadcast %393 : vector<1x256xf32> to vector<8x256xf32>
    %395 = arith.mulf %392, %394 : vector<8x256xf32>
    %396 = arith.addf %390, %395 : vector<8x256xf32>
    %c2_276 = arith.constant 2 : index
    %c16_277 = arith.constant 16 : index
    %c0_278 = arith.constant 0 : index
    %c0_279 = arith.constant 0 : index
    %397 = vector.load %arg2[%c2_276, %c16_277, %c0_278, %c0_279] : memref<3x17x16x256xf32, #tpu.memory_space<vmem>>, vector<1x1x8x256xf32>
    %398 = vector.shape_cast %397 : vector<1x1x8x256xf32> to vector<8x256xf32>
    %399 = vector.extract_strided_slice %304 {offsets = [15, 0], sizes = [1, 256], strides = [1, 1]} : vector<16x256xf32> to vector<1x256xf32>
    %400 = vector.broadcast %399 : vector<1x256xf32> to vector<8x256xf32>
    %401 = arith.mulf %398, %400 : vector<8x256xf32>
    %402 = arith.addf %396, %401 : vector<8x256xf32>
    %403 = tpu.concatenate %353, %402 in 0 : vector<8x256xf32>, vector<8x256xf32> -> vector<16x256xf32>
    %404 = arith.addf %403, %256 : vector<16x256xf32>
    %cst_280 = arith.constant 0.000000e+00 : f32
    %405 = vector.broadcast %cst_280 : f32 to vector<16x256xf32>
    %406 = arith.maximumf %404, %405 : vector<16x256xf32>
    %c0_281 = arith.constant 0 : index
    %c0_282 = arith.constant 0 : index
    %c0_283 = arith.constant 0 : index
    %407 = vector.load %arg3[%c0_281, %c0_282, %c0_283] : memref<1x16x256xf32, #tpu.memory_space<vmem>>, vector<1x16x256xf32>
    %408 = vector.shape_cast %407 : vector<1x16x256xf32> to vector<16x256xf32>
    %409 = vector.shape_cast %406 : vector<16x256xf32> to vector<1x16x256xf32>
    tpu.vector_store %arg3[%c0_281, %c0_282, %c0_283], %409 {strides = array<i32>} : memref<1x16x256xf32, #tpu.memory_space<vmem>>, vector<1x16x256xf32>,
    return
  }
  func.func @transform_0(%arg0: i32) -> (i32, i32, i32) {
    %c0_i32 = arith.constant 0 : i32
    %c0_i32_0 = arith.constant 0 : i32
    %c0_i32_1 = arith.constant 0 : i32
    return %arg0, %c0_i32, %c0_i32_0 : i32, i32, i32
  }
  func.func @transform_1(%arg0: i32) -> (i32, i32, i32, i32) {
    %c0_i32 = arith.constant 0 : i32
    %c0_i32_0 = arith.constant 0 : i32
    %c0_i32_1 = arith.constant 0 : i32
    %c0_i32_2 = arith.constant 0 : i32
    %c0_i32_3 = arith.constant 0 : i32
    return %c0_i32, %c0_i32_0, %c0_i32_1, %c0_i32_2 : i32, i32, i32, i32
  }
  func.func @transform_2(%arg0: i32) -> (i32, i32, i32) {
    %c0_i32 = arith.constant 0 : i32
    %c0_i32_0 = arith.constant 0 : i32
    %c0_i32_1 = arith.constant 0 : i32
    return %arg0, %c0_i32, %c0_i32_0 : i32, i32, i32
  }
}

</mosaic_0001>

<bundles_post_ra>
// kernel: decoder_conv_forward.1
= control target key start
LH: loop header
LB: loop body
LE: loop exit
PB: predicated region body
PF: predicated region fallthrough
CT: control target
= control target key end

     0   :  { %s2770_s13 = smov 112   ;;  %s2771_s14 = smov 111   ;;  %vm51_vm0 = vcmask 916480   ;;  %vm86_vm1 = vcmask 924672   ;;  %vm68_vm2 = vcmask 1039360   ;;  %vm172_vm3 = vcmask 7168   ;;  %s4833_s1 = inlined_call_operand.vmem [shape: f32[3,17,16,256], index: 1, kind: input, shape index: {}]   ;;  %s4834_s0 = inlined_call_operand.vmem [shape: f32[1,8,256], index: 0, kind: input, shape index: {}]   ;;  %s4835_s2 = inlined_call_operand.vmem [shape: f32[1,16,256], index: 2, kind: output, shape index: {}]  }
   0x1   :  { %v2629_v0 = vld [vmem:[%s4833_s1 + $0x20] sm:$0xff]  ;;  %v2630_v2 = vld [vmem:[%s4833_s1 + $0x28] sm:$0xff]  ;;  %s2772_s25 = smov 113   ;;  %s2773_s8 = smov 127   ;;  %v2656_v24 = vld [vmem:[%s4833_s1 + $0x238] sm:$0xff]  ;;  %vm207_vm4 = vcmask 121856  }
   0x2   :  { %v23_v1 = vld [vmem:[%s4833_s1] sm:$0xff]  ;;  %47 = vrot.lane.b32.xlu1 %v2629_v0, %s2770_s13  ;;  %v24_v3 = vld [vmem:[%s4833_s1 + $0x8] sm:$0xff]  ;;  %s2774_s12 = smov 1   ;;  %s2775_s19 = smov 15   ;;  %v2655_v25 = vld [vmem:[%s4833_s1 + $0x230] sm:$0xff]  ;;  %vm242_vm5 = vcmask 130048  }
   0x3   :  { %27 = vrot.lane.b32.xlu0 %v23_v1, %s2771_s14  ;;  %v2631_v4 = vld [vmem:[%s4833_s1 + $0x40] sm:$0xff]  ;;  %v2632_v5 = vld [vmem:[%s4833_s1 + $0x48] sm:$0xff]  ;;  %s2776_s24 = smov 16   ;;  %s2777_s30 = smov 17   ;;  %v2660_v28 = vld [vmem:[%s4833_s1 + $0x258] sm:$0xff]  ;;  %vm277_vm6 = vcmask 138240  }
   0x4   :  { %v2634_v6 = vld [vmem:[%s4833_s1 + $0x68] sm:$0xff]  ;;  %v2633_v7 = vld [vmem:[%s4833_s1 + $0x60] sm:$0xff]  ;;  %v2659_v29 = vld [vmem:[%s4833_s1 + $0x250] sm:$0xff]  ;;  %s2778_s20 = smov 126   ;;  %s2779_s21 = smov 110   ;;  %vm31_vm7 = vcmask 908288  }
   0x5   :  { %v2831_v8 = vld [vmem:[%s4834_s0 + $0x8] sm:$0xff]  ;;  %v2839_v10 = vld [vmem:[%s4834_s0] sm:$0xff]  ;;  %v2664_v32 = vld [vmem:[%s4833_s1 + $0x278] sm:$0xff]  ;;  %s2780_s22 = smov 96   ;;  %s2781_s23 = smov 95   ;;  %vm189_vm8 = vcmask 900096  }
   0x6   :  { %49 = vrot.lane.b32.xlu1 %v2630_v2, %s2770_s13  ;;  %v2636_v9 = vld [vmem:[%s4833_s1 + $0x88] sm:$0xff]  ;;  %v2635_v11 = vld [vmem:[%s4833_s1 + $0x80] sm:$0xff]  ;;  %v2663_v33 = vld [vmem:[%s4833_s1 + $0x270] sm:$0xff]  ;;  %s2782_s26 = smov 94   ;;  %vm103_vm9 = vcmask 1031168   ;;  %vm224_vm10 = vcmask 785408  }
   0x7   :  { %29 = vrot.lane.b32.xlu0 %v24_v3, %s2771_s14  ;;  %v149_v12 = vmul.f32 %v2636_v9, %v2831_v8  ;;  %v148_v13 = vmul.f32 %v2635_v11, %v2839_v10  ;;  %v2638_v14 = vld [vmem:[%s4833_s1 + $0xa8] sm:$0xff]  ;;  %v2637_v15 = vld [vmem:[%s4833_s1 + $0xa0] sm:$0xff]  ;;  %v2668_v36 = vld [vmem:[%s4833_s1 + $0x298] sm:$0xff]  ;;  %vm259_vm11 = vcmask 777216   ;;  %vm294_vm12 = vcmask 769024  }
   0x8   :  { %v2639_v16 = vld [vmem:[%s4833_s1 + $0xc0] sm:$0xff]  ;;  %v2640_v17 = vld [vmem:[%s4833_s1 + $0xc8] sm:$0xff]  ;;  %v2667_v37 = vld [vmem:[%s4833_s1 + $0x290] sm:$0xff] }
   0x9   :  { %v2642_v18 = vld [vmem:[%s4833_s1 + $0xe8] sm:$0xff]  ;;  %v2641_v19 = vld [vmem:[%s4833_s1 + $0xe0] sm:$0xff] }
   0xa   :  { %82 = vrot.lane.b32.xlu1 %v2631_v4, %s2772_s25  ;;  %v2643_v20 = vld [vmem:[%s4833_s1 + $0x100] sm:$0xff]  ;;  %v2644_v21 = vld [vmem:[%s4833_s1 + $0x108] sm:$0xff] }
   0xb   :  { %84 = vrot.lane.b32.xlu0 %v2632_v5, %s2772_s25  ;;  %v2654_v22 = vld [vmem:[%s4833_s1 + $0x228] sm:$0xff]  ;;  %v2653_v23 = vld [vmem:[%s4833_s1 + $0x220] sm:$0xff] }
   0xc   :  { %v2658_v26 = vld [vmem:[%s4833_s1 + $0x248] sm:$0xff]  ;;  %v2657_v27 = vld [vmem:[%s4833_s1 + $0x240] sm:$0xff] }
   0xd   :  { %v2662_v30 = vld [vmem:[%s4833_s1 + $0x268] sm:$0xff]  ;;  %v2661_v31 = vld [vmem:[%s4833_s1 + $0x260] sm:$0xff] }
   0xe   :  { %119 = vrot.lane.b32.xlu1 %v2634_v6, %s2773_s8  ;;  %v2666_v34 = vld [vmem:[%s4833_s1 + $0x288] sm:$0xff]  ;;  %v2665_v35 = vld [vmem:[%s4833_s1 + $0x280] sm:$0xff] }
   0xf   :  { %117 = vrot.lane.b32.xlu0 %v2633_v7, %s2773_s8  ;;  %v2673_v38 = vld [vmem:[%s4833_s1 + $0x2c0] sm:$0xff] }
  0x12   :  { %152 = vrot.lane.b32.xlu1 %v148_v13, %s2771_s14 }
  0x13   :  { %154 = vrot.lane.b32.xlu0 %v149_v12, %s2771_s14 }
  0x16   :  { %168 = vrot.lane.b32.xlu1 %v2637_v15, %s2774_s12 }
  0x17   :  { %170 = vrot.lane.b32.xlu0 %v2638_v14, %s2774_s12 }
  0x1a   :  { %205 = vrot.lane.b32.xlu1 %v2640_v17, %s2775_s19 }
  0x1b   :  { %203 = vrot.lane.b32.xlu0 %v2639_v16, %s2775_s19 }
  0x1e   :  { %238 = vrot.lane.b32.xlu1 %v2641_v19, %s2776_s24 }
  0x1f   :  { %240 = vrot.lane.b32.xlu0 %v2642_v18, %s2776_s24 }
  0x22   :  { %275 = vrot.lane.b32.xlu1 %v2644_v21, %s2777_s30 }
  0x23   :  { %273 = vrot.lane.b32.xlu0 %v2643_v20, %s2777_s30 }
  0x26   :  { %572 = vrot.lane.b32.xlu1 %v2653_v23, %s2771_s14 }
  0x27   :  { %574 = vrot.lane.b32.xlu0 %v2654_v22, %s2771_s14 }
  0x2a   :  { %576 = vrot.lane.b32.xlu1 %v2655_v25, %s2771_s14 }
  0x2b   :  { %578 = vrot.lane.b32.xlu0 %v2656_v24, %s2771_s14 }
  0x2e   :  { %609 = vrot.lane.b32.xlu1 %v2657_v27, %s2770_s13 }
  0x2f   :  { %611 = vrot.lane.b32.xlu0 %v2658_v26, %s2770_s13 }
  0x32   :  { %613 = vrot.lane.b32.xlu1 %v2659_v29, %s2770_s13 }
  0x33   :  { %615 = vrot.lane.b32.xlu0 %v2660_v28, %s2770_s13 }
  0x36   :  { %674 = vrot.lane.b32.xlu1 %v2661_v31, %s2772_s25 }
  0x37   :  { %676 = vrot.lane.b32.xlu0 %v2662_v30, %s2772_s25 }
  0x3a   :  { %678 = vrot.lane.b32.xlu1 %v2663_v33, %s2772_s25 }
  0x3b   :  { %680 = vrot.lane.b32.xlu0 %v2664_v32, %s2772_s25 }
  0x3e   :  { %739 = vrot.lane.b32.xlu1 %v2665_v35, %s2773_s8 }
  0x3f   :  { %741 = vrot.lane.b32.xlu0 %v2666_v34, %s2773_s8 }
  0x42   :  { %743 = vrot.lane.b32.xlu1 %v2667_v37, %s2773_s8  ;;  %v2674_v37 = vld [vmem:[%s4833_s1 + $0x2c8] sm:$0xff] }
  0x43   :  { %745 = vrot.lane.b32.xlu0 %v2668_v36, %s2773_s8 }
  0x46   :  { %839 = vrot.lane.b32.xlu1 %v2673_v38, %s2774_s12  ;;  %v2675_v38 = vld [vmem:[%s4833_s1 + $0x2d0] sm:$0xff] }
  0x74   :  { %v2950_v39 = vpop.permute.xlu1 %47 }
  0x75   :  { %v2952_v40 = vpop.permute.xlu0 %27  ;;  %v56_v41 = vmul.f32 0.0, %v2950_v39 }
  0x77   :  { %62 = vrot.lane.b32.xlu0 %v56_v41, %s2773_s8 }
  0x78   :  { %v2956_v42 = vpop.permute.xlu1 %49 }
  0x79   :  { %v2958_v43 = vpop.permute.xlu0 %29  ;;  %v58_v44 = vmul.f32 %v2956_v42, %v2831_v8  ;;  %v52_v21 = vsel %vm51_vm0, %v2950_v39, %v2956_v42  ;;  %v2676_v39 = vld [vmem:[%s4833_s1 + $0x2d8] sm:$0xff] }
  0x7a   :  { %v57_v24 = vmul.f32 %v52_v21, %v2839_v10 }
  0x7b   :  { %66 = vrot.lane.b32.xlu0 %v58_v44, %s2773_s8 }
  0x7c   :  { %v2963_v45 = vpop.permute.xlu1 %82 }
  0x7d   :  { %v2965_v46 = vpop.permute.xlu0 %84  ;;  %v91_v47 = vmul.f32 0.0, %v2963_v45 }
  0x7e   :  { %v93_v48 = vmul.f32 %v2965_v46, %v2831_v8  ;;  %v87_v25 = vsel %vm86_vm1, %v2963_v45, %v2965_v46 }
  0x7f   :  { %97 = vrot.lane.b32.xlu1 %v91_v47, %s2778_s20  ;;  %v92_v27 = vmul.f32 %v87_v25, %v2839_v10 }
  0x80   :  { %v2971_v49 = vpop.permute.xlu1 %119 }
  0x81   :  { %v118_v50 = vpop.permute.xlu0 %117  ;;  %v127_v54 = vmul.f32 %v2971_v49, %v2831_v8 }
  0x82   :  { %v125_v51 = vmul.f32 0.0, %v118_v50  ;;  %v121_v26 = vsel %vm68_vm2, %v118_v50, %v2971_v49 }
  0x83   :  { %101 = vrot.lane.b32.xlu1 %v93_v48, %s2778_s20  ;;  %v126_v28 = vmul.f32 %v121_v26, %v2839_v10  ;;  %v2682_v26 = vld [vmem:[%s4833_s1 + $0x308] sm:$0xff] }
  0x84   :  { %131 = vrot.lane.b32.xlu0 %v125_v51, %s2770_s13  ;;  %v2977_v53 = vpop.permute.xlu1 %152 }
  0x85   :  { %v2975_v52 = vpop.permute.xlu0 %154 }
  0x88   :  { %135 = vrot.lane.b32.xlu0 %v127_v54, %s2770_s13  ;;  %v169_v56 = vpop.permute.xlu1 %168 }
  0x89   :  { %v171_v55 = vpop.permute.xlu0 %170  ;;  %v177_v57 = vmul.f32 %v169_v56, %v2839_v10 }
  0x8a   :  { %v179_v58 = vmul.f32 0.0, %v171_v55  ;;  %v173_v29 = vsel %vm172_vm3, %v169_v56, %v171_v55 }
  0x8b   :  { %183 = vrot.lane.b32.xlu1 %v177_v57, %s2779_s21  ;;  %v178_v31 = vmul.f32 %v173_v29, %v2831_v8 }
  0x8c   :  { %v206_v60 = vpop.permute.xlu1 %205 }
  0x8d   :  { %v204_v59 = vpop.permute.xlu0 %203  ;;  %v214_v0 = vmul.f32 0.0, %v206_v60 }
  0x8e   :  { %v212_v61 = vmul.f32 %v204_v59, %v2839_v10  ;;  %v208_v30 = vsel %vm207_vm4, %v204_v59, %v206_v60 }
  0x8f   :  { %187 = vrot.lane.b32.xlu1 %v179_v58, %s2779_s21  ;;  %v213_v32 = vmul.f32 %v208_v30, %v2831_v8 }
  0x90   :  { %218 = vrot.lane.b32.xlu0 %v212_v61, %s2780_s22  ;;  %v239_v63 = vpop.permute.xlu1 %238 }
  0x91   :  { %v241_v62 = vpop.permute.xlu0 %240  ;;  %v247_v1 = vmul.f32 %v239_v63, %v2839_v10 }
  0x92   :  { %v249_v2 = vmul.f32 0.0, %v241_v62  ;;  %v243_v33 = vsel %vm242_vm5, %v239_v63, %v241_v62 }
  0x93   :  { %253 = vrot.lane.b32.xlu1 %v247_v1, %s2781_s23  ;;  %v248_v35 = vmul.f32 %v243_v33, %v2831_v8  ;;  %v2685_v33 = vld [vmem:[%s4833_s1 + $0x320] sm:$0xff] }
  0x94   :  { %222 = vrot.lane.b32.xlu0 %v214_v0, %s2780_s22  ;;  %v276_v4 = vpop.permute.xlu1 %275 }
  0x95   :  { %v274_v3 = vpop.permute.xlu0 %273  ;;  %v284_v7 = vmul.f32 0.0, %v276_v4 }
  0x96   :  { %v282_v5 = vmul.f32 %v274_v3, %v2839_v10  ;;  %v278_v34 = vsel %vm277_vm6, %v274_v3, %v276_v4 }
  0x97   :  { %257 = vrot.lane.b32.xlu1 %v249_v2, %s2781_s23  ;;  %v283_v36 = vmul.f32 %v278_v34, %v2831_v8 }
  0x98   :  { %288 = vrot.lane.b32.xlu0 %v282_v5, %s2782_s26  ;;  %v2993_v6 = vpop.permute.xlu1 %572  ;;  %v2677_v5 = vld [vmem:[%s4833_s1 + $0x2e0] sm:$0xff] }
  0x99   :  { %4885 = vst [vmem:[#allocation3_spill] sm:$0xff] %v2993_v6  ;;  %v3059_v41 = vpop.permute.xlu0 %574 }
  0x9a   :  { %4887 = vst [vmem:[#allocation5_spill] sm:$0xff] %v3059_v41 }
  0x9c   :  { %292 = vrot.lane.b32.xlu0 %v284_v7, %s2782_s26  ;;  %v2996_v9 = vpop.permute.xlu1 %576 }
  0x9d   :  { %4886 = vst [vmem:[#allocation4_spill] sm:$0xff] %v2996_v9  ;;  %v3062_v42 = vpop.permute.xlu0 %578 }
  0x9e   :  { %4888 = vst [vmem:[#allocation6_spill] sm:$0xff] %v3062_v42 }
  0xa0   :  { %v2998_v11 = vpop.permute.xlu1 %609 }
  0xa1   :  { %v625_v12 = vmul.f32 0.0, %v2998_v11  ;;  %v3064_v44 = vpop.permute.xlu0 %611 }
  0xa3   :  { %637 = vrot.lane.b32.xlu1 %v625_v12, %s2773_s8  ;;  %v2678_v12 = vld [vmem:[%s4833_s1 + $0x2e8] sm:$0xff] }
  0xa4   :  { %v3002_v13 = vpop.permute.xlu1 %613 }
  0xa5   :  { %v628_v14 = vmul.f32 0.0, %v3002_v13  ;;  %v3066_v45 = vpop.permute.xlu0 %615 }
  0xa7   :  { %643 = vrot.lane.b32.xlu0 %v628_v14, %s2773_s8  ;;  %v2679_v14 = vld [vmem:[%s4833_s1 + $0x2f0] sm:$0xff] }
  0xa8   :  { %v3006_v15 = vpop.permute.xlu1 %674 }
  0xa9   :  { %v690_v16 = vmul.f32 0.0, %v3006_v15  ;;  %v3068_v46 = vpop.permute.xlu0 %676 }
  0xab   :  { %702 = vrot.lane.b32.xlu1 %v690_v16, %s2778_s20  ;;  %v2680_v16 = vld [vmem:[%s4833_s1 + $0x2f8] sm:$0xff] }
  0xac   :  { %v3010_v17 = vpop.permute.xlu1 %678 }
  0xad   :  { %v693_v18 = vmul.f32 0.0, %v3010_v17  ;;  %v3070_v47 = vpop.permute.xlu0 %680 }
  0xaf   :  { %708 = vrot.lane.b32.xlu0 %v693_v18, %s2778_s20 }
  0xb0   :  { %v3014_v19 = vpop.permute.xlu1 %739 }
  0xb1   :  { %v755_v20 = vmul.f32 0.0, %v3014_v19  ;;  %v3072_v48 = vpop.permute.xlu0 %741 }
  0xb3   :  { %767 = vrot.lane.b32.xlu1 %v755_v20, %s2770_s13 }
  0xb4   :  { %v3021_v22 = vpop.permute.xlu1 %743 }
  0xb5   :  { %v758_v23 = vmul.f32 0.0, %v3021_v22  ;;  %v3074_v49 = vpop.permute.xlu0 %745 }
  0xb7   :  { %773 = vrot.lane.b32.xlu0 %v758_v23, %s2770_s13  ;;  %64 = vrot.lane.b32.xlu1 %v57_v24, %s2773_s8  ;;  %v2681_v24 = vld [vmem:[%s4833_s1 + $0x300] sm:$0xff] }
  0xbb   :  { %99 = vrot.lane.b32.xlu0 %v92_v27, %s2778_s20  ;;  %133 = vrot.lane.b32.xlu1 %v126_v28, %s2770_s13  ;;  %v2683_v27 = vld [vmem:[%s4833_s1 + $0x310] sm:$0xff]  ;;  %v2684_v28 = vld [vmem:[%s4833_s1 + $0x318] sm:$0xff] }
  0xbf   :  { %185 = vrot.lane.b32.xlu0 %v178_v31, %s2779_s21  ;;  %220 = vrot.lane.b32.xlu1 %v213_v32, %s2780_s22 }
  0xc3   :  { %255 = vrot.lane.b32.xlu0 %v248_v35, %s2781_s23  ;;  %290 = vrot.lane.b32.xlu1 %v283_v36, %s2782_s26  ;;  %v2686_v35 = vld [vmem:[%s4833_s1 + $0x328] sm:$0xff]  ;;  %v2687_v36 = vld [vmem:[%s4833_s1 + $0x330] sm:$0xff] }
  0xc7   :  { %841 = vrot.lane.b32.xlu0 %v2674_v37, %s2774_s12  ;;  %843 = vrot.lane.b32.xlu1 %v2675_v38, %s2774_s12  ;;  %v2688_v37 = vld [vmem:[%s4833_s1 + $0x338] sm:$0xff] }
  0xcb   :  { %845 = vrot.lane.b32.xlu0 %v2676_v39, %s2774_s12  ;;  %v3182_v39 = vpop.permute.xlu1 %839 }
  0xe9   :  { %v3076_v50 = vpop.permute.xlu0 %62 }
  0xed   :  { %v3078_v51 = vpop.permute.xlu0 %66 }
  0xf6   :  { %v3080_v54 = vpop.permute.xlu0 %131 }
  0xfa   :  { %v3082_v55 = vpop.permute.xlu0 %135 }
 0x102   :  { %v3084_v56 = vpop.permute.xlu0 %218 }
 0x106   :  { %v3086_v57 = vpop.permute.xlu0 %222 }
 0x10a   :  { %v3088_v58 = vpop.permute.xlu0 %288 }
 0x10e   :  { %v3090_v59 = vpop.permute.xlu0 %292 }
 0x119   :  { %v3092_v60 = vpop.permute.xlu0 %643 }
 0x11a   :  { %4889 = vst [vmem:[#allocation7_spill] sm:$0xff] %v3092_v60 }
 0x121   :  { %v3094_v61 = vpop.permute.xlu0 %708 }
 0x122   :  { %4890 = vst [vmem:[#allocation8_spill] sm:$0xff] %v3094_v61 }
 0x129   :  { %v3096_v62 = vpop.permute.xlu0 %773 }
 0x12a   :  { %4891 = vst [vmem:[#allocation9_spill] sm:$0xff] %v3096_v62 }
 0x12d   :  { %v3098_v63 = vpop.permute.xlu0 %99 }
 0x131   :  { %v3100_v0 = vpop.permute.xlu0 %185 }
 0x135   :  { %v3102_v1 = vpop.permute.xlu0 %255 }
 0x139   :  { %v3104_v2 = vpop.permute.xlu0 %841 }
 0x13a   :  { %v857_v3 = vmul.f32 0.0, %v3104_v2 }
 0x13c   :  { %871 = vrot.lane.b32.xlu1 %v857_v3, %s2779_s21 }
 0x13d   :  { %v3108_v4 = vpop.permute.xlu0 %845 }
 0x13e   :  { %v860_v7 = vmul.f32 0.0, %v3108_v4 }
 0x140   :  { %877 = vrot.lane.b32.xlu0 %v860_v7, %s2779_s21  ;;  %904 = vrot.lane.b32.xlu1 %v2677_v5, %s2775_s19  ;;  %v3187_v7 = vpop.permute.xlu1 %97 }
 0x144   :  { %906 = vrot.lane.b32.xlu0 %v2678_v12, %s2775_s19  ;;  %908 = vrot.lane.b32.xlu1 %v2679_v14, %s2775_s19  ;;  %v2705_v14 = vld [vmem:[%s4833_s1 + $0x440] sm:$0xff] }
 0x148   :  { %910 = vrot.lane.b32.xlu0 %v2680_v16, %s2775_s19 }
 0x1b2   :  { %v3128_v18 = vpop.permute.xlu0 %877 }
 0x1b3   :  { %4892 = vst [vmem:[#allocation10_spill] sm:$0xff] %v3128_v18  ;;  %v38_v18 = vmul.f32 %v2958_v43, %v2831_v8 }
 0x1b5   :  { %v76_v42 = vadd.f32 %v3078_v51, %v38_v18 }
 0x1b6   :  { %v3130_v20 = vpop.permute.xlu0 %906 }
 0x1b7   :  { %v922_v21 = vmul.f32 0.0, %v3130_v20 }
 0x1b9   :  { %936 = vrot.lane.b32.xlu1 %v922_v21, %s2780_s22  ;;  %v2706_v21 = vld [vmem:[%s4833_s1 + $0x448] sm:$0xff] }
 0x1ba   :  { %v3134_v23 = vpop.permute.xlu0 %910 }
 0x1bb   :  { %v925_v25 = vmul.f32 0.0, %v3134_v23 }
 0x1bd   :  { %942 = vrot.lane.b32.xlu0 %v925_v25, %s2780_s22  ;;  %969 = vrot.lane.b32.xlu1 %v2681_v24, %s2776_s24  ;;  %v2707_v24 = vld [vmem:[%s4833_s1 + $0x450] sm:$0xff]  ;;  %v102_v25 = vpop.permute.xlu1 %101 }
 0x1c1   :  { %971 = vrot.lane.b32.xlu0 %v2682_v26, %s2776_s24  ;;  %973 = vrot.lane.b32.xlu1 %v2683_v27, %s2776_s24  ;;  %v2708_v26 = vld [vmem:[%s4833_s1 + $0x458] sm:$0xff]  ;;  %v2709_v27 = vld [vmem:[%s4833_s1 + $0x460] sm:$0xff] }
 0x1c5   :  { %975 = vrot.lane.b32.xlu0 %v2684_v28, %s2776_s24  ;;  %v3212_v28 = vpop.permute.xlu1 %183 }
 0x22f   :  { %v3154_v29 = vpop.permute.xlu0 %942 }
 0x230   :  { %4893 = vst [vmem:[#allocation11_spill] sm:$0xff] %v3154_v29 }
 0x233   :  { %v3156_v30 = vpop.permute.xlu0 %971 }
 0x234   :  { %v987_v31 = vmul.f32 0.0, %v3156_v30 }
 0x236   :  { %1001 = vrot.lane.b32.xlu1 %v987_v31, %s2781_s23  ;;  %v2710_v31 = vld [vmem:[%s4833_s1 + $0x468] sm:$0xff] }
 0x237   :  { %v3160_v32 = vpop.permute.xlu0 %975 }
 0x238   :  { %v990_v34 = vmul.f32 0.0, %v3160_v32 }
 0x23a   :  { %1007 = vrot.lane.b32.xlu0 %v990_v34, %s2781_s23  ;;  %1034 = vrot.lane.b32.xlu1 %v2685_v33, %s2777_s30  ;;  %v2711_v33 = vld [vmem:[%s4833_s1 + $0x470] sm:$0xff]  ;;  %v188_v34 = vpop.permute.xlu1 %187 }
 0x23b   :  { %v191_v18 = vsel %vm189_vm8, %v3100_v0, %v188_v34 }
 0x23e   :  { %1036 = vrot.lane.b32.xlu0 %v2686_v35, %s2777_s30  ;;  %1038 = vrot.lane.b32.xlu1 %v2687_v36, %s2777_s30  ;;  %v2712_v35 = vld [vmem:[%s4833_s1 + $0x478] sm:$0xff]  ;;  %v3228_v36 = vpop.permute.xlu1 %253 }
 0x242   :  { %1040 = vrot.lane.b32.xlu0 %v2688_v37, %s2777_s30  ;;  %v258_v37 = vpop.permute.xlu1 %257 }
 0x2ac   :  { %v3180_v38 = vpop.permute.xlu0 %1007 }
 0x2ad   :  { %4894 = vst [vmem:[#allocation12_spill] sm:$0xff] %v3180_v38 }
 0x2b0   :  { %v3184_v3 = vpop.permute.xlu0 %1036 }
 0x2b1   :  { %v1052_v5 = vmul.f32 0.0, %v3184_v3 }
 0x2b3   :  { %1066 = vrot.lane.b32.xlu1 %v1052_v5, %s2782_s26  ;;  %v3230_v5 = vpop.permute.xlu1 %637 }
 0x2b4   :  { %v3190_v12 = vpop.permute.xlu0 %1040  ;;  %4895 = vst [vmem:[#allocation13_spill] sm:$0xff] %v3230_v5 }
 0x2b5   :  { %v1055_v16 = vmul.f32 0.0, %v3190_v12 }
 0x2b7   :  { %1072 = vrot.lane.b32.xlu0 %v1055_v16, %s2782_s26  ;;  %1607 = vrot.lane.b32.xlu1 %v2705_v14, %s2771_s14  ;;  %v3232_v14 = vpop.permute.xlu1 %702 }
 0x2b8   :  { %4896 = vst [vmem:[#allocation14_spill] sm:$0xff] %v3232_v14 }
 0x2bb   :  { %1609 = vrot.lane.b32.xlu0 %v2706_v21, %s2771_s14  ;;  %1611 = vrot.lane.b32.xlu1 %v2707_v24, %s2771_s14  ;;  %v3234_v16 = vpop.permute.xlu1 %767 }
 0x2bc   :  { %4897 = vst [vmem:[#allocation15_spill] sm:$0xff] %v3234_v16 }
 0x2bf   :  { %1613 = vrot.lane.b32.xlu0 %v2708_v26, %s2771_s14  ;;  %1644 = vrot.lane.b32.xlu1 %v2709_v27, %s2770_s13  ;;  %v65_v21 = vpop.permute.xlu1 %64 }
 0x2c3   :  { %1646 = vrot.lane.b32.xlu0 %v2710_v31, %s2770_s13  ;;  %1648 = vrot.lane.b32.xlu1 %v2711_v33, %s2770_s13  ;;  %v3236_v24 = vpop.permute.xlu1 %133 }
 0x2c7   :  { %1650 = vrot.lane.b32.xlu0 %v2712_v35, %s2770_s13  ;;  %v3238_v26 = vpop.permute.xlu1 %220 }
 0x2cb   :  { %v3240_v27 = vpop.permute.xlu1 %290 }
 0x2cf   :  { %v3242_v31 = vpop.permute.xlu1 %843 }
 0x2d3   :  { %v3244_v33 = vpop.permute.xlu1 %871 }
 0x2d4   :  { %4898 = vst [vmem:[#allocation16_spill] sm:$0xff] %v3244_v33  ;;  %v111_v33 = vadd.f32 %v102_v25, %v76_v42  ;;  %v32_v42 = vsel %vm31_vm7, %v2952_v40, %v2958_v43  ;;  %v2715_v43 = vld [vmem:[%s4833_s1 + $0x490] sm:$0xff] }
 0x2d5   :  { %v37_v34 = vmul.f32 %v32_v42, %v2839_v10  ;;  %v2716_v10 = vld [vmem:[%s4833_s1 + $0x498] sm:$0xff]  ;;  %v36_v42 = vmul.f32 0.0, %v2952_v40  ;;  %v2718_v40 = vld [vmem:[%s4833_s1 + $0x4a8] sm:$0xff] }
 0x2d6   :  { %v144_v41 = vadd.f32 %v3082_v55, %v111_v33 }
 0x2d7   :  { %v3246_v35 = vpop.permute.xlu1 %904 }
 0x2d8   :  { %v162_v33 = vadd.f32 %v2975_v52, %v144_v41  ;;  %v105_v41 = vsel %vm103_vm9, %v3098_v63, %v102_v25 }
 0x2db   :  { %v3248_v62 = vpop.permute.xlu1 %908 }
 0x2df   :  { %v3250_v61 = vpop.permute.xlu1 %936 }
 0x2e0   :  { %4899 = vst [vmem:[#allocation17_spill] sm:$0xff] %v3250_v61 }
 0x2e3   :  { %v3252_v60 = vpop.permute.xlu1 %969 }
 0x2e7   :  { %v3254_v9 = vpop.permute.xlu1 %973 }
 0x2eb   :  { %v3256_v16 = vpop.permute.xlu1 %1001 }
 0x2ec   :  { %4900 = vst [vmem:[#allocation18_spill] sm:$0xff] %v3256_v16 }
 0x2ef   :  { %v3258_v14 = vpop.permute.xlu1 %1034 }
 0x2f3   :  { %v3260_v5 = vpop.permute.xlu1 %1038 }
 0x2f4   :  { %4901 = vst [vmem:[#allocation19_spill] sm:$0xff] %v3260_v5 }
 0x325   :  { %v3262_v6 = vpop.permute.xlu1 %1066 }
 0x326   :  { %4902 = vst [vmem:[#allocation20_spill] sm:$0xff] %v3262_v6 }
 0x329   :  { %v3264_v38 = vpop.permute.xlu1 %1607 }
 0x32a   :  { %4903 = vst [vmem:[#allocation21_spill] sm:$0xff] %v3264_v38  ;;  %v2714_v38 = vld [vmem:[%s4833_s1 + $0x488] sm:$0xff] }
 0x32d   :  { %v3266_v29 = vpop.permute.xlu1 %1611 }
 0x32e   :  { %4904 = vst [vmem:[#allocation22_spill] sm:$0xff] %v3266_v29  ;;  %v2713_v29 = vld [vmem:[%s4833_s1 + $0x480] sm:$0xff] }
 0x331   :  { %v3271_v61 = vpop.permute.xlu1 %1644 }
 0x332   :  { %4905 = vst [vmem:[#allocation23_spill] sm:$0xff] %v3271_v61  ;;  %v1660_v16 = vmul.f32 0.0, %v3271_v61 }
 0x334   :  { %1672 = vrot.lane.b32.xlu1 %v1660_v16, %s2773_s8  ;;  %v70_v16 = vsel %vm68_vm2, %v65_v21, %v3078_v51  ;;  %v69_v51 = vsel %vm68_vm2, %v3076_v50, %v65_v21  ;;  %v261_v50 = vsel %vm259_vm11, %v3102_v1, %v258_v37  ;;  %v2720_v37 = vld [vmem:[%s4833_s1 + $0x4b8] sm:$0xff] }
 0x335   :  { %v3276_v6 = vpop.permute.xlu1 %1648  ;;  %v74_v21 = vadd.f32 %v69_v51, %v36_v42  ;;  %v225_v42 = vsel %vm224_vm10, %v3084_v56, %v3238_v26 }
 0x336   :  { %4906 = vst [vmem:[#allocation24_spill] sm:$0xff] %v3276_v6  ;;  %v1663_v8 = vmul.f32 0.0, %v3276_v6  ;;  %v197_v6 = vadd.f32 %v191_v18, %v162_v33  ;;  %v306_v33 = vlaneseq }
 0x338   :  { %1709 = vrot.lane.b32.xlu1 %v2713_v29, %s2772_s25  ;;  %1678 = vrot.lane.b32.xlu0 %v1663_v8, %s2773_s8  ;;  %v75_v29 = vadd.f32 %v70_v16, %v37_v34  ;;  %v226_v8 = vsel %vm224_vm10, %v3238_v26, %v3086_v57  ;;  %v138_v57 = vsel %vm51_vm0, %v3236_v24, %v3082_v55  ;;  %v307_v34 = vshrl.u32 %v306_v33, 7 }
 0x339   :  { %v232_v18 = vadd.f32 %v226_v8, %v197_v6  ;;  %v296_v55 = vsel %vm294_vm12, %v3240_v27, %v3090_v59 }
 0x33a   :  { %v110_v25 = vadd.f32 %v105_v41, %v75_v29  ;;  %v3339_v8 = vsub.s32 1, %v307_v34  ;;  %v3357_v33 = vsub.s32 5, %v307_v34 }
 0x33c   :  { %1711 = vrot.lane.b32.xlu0 %v2714_v38, %s2772_s25  ;;  %1713 = vrot.lane.b32.xlu1 %v2715_v43, %s2772_s25  ;;  %v104_v38 = vsel %vm103_vm9, %v3187_v7, %v3098_v63  ;;  %v143_v16 = vadd.f32 %v138_v57, %v110_v25  ;;  %v267_v43 = vadd.f32 %v261_v50, %v232_v18 }
 0x33d   :  { %v109_v6 = vadd.f32 %v104_v38, %v74_v21  ;;  %v156_v63 = vsel %vm31_vm7, %v2977_v53, %v2975_v52  ;;  %v137_v7 = vsel %vm51_vm0, %v3080_v54, %v3236_v24  ;;  %4907 = vst [vmem:[#allocation25_spill] sm:$0xff] %v3339_v8  ;;  %v190_v52 = vsel %vm189_vm8, %v3212_v28, %v3100_v0 }
 0x33e   :  { %v161_v29 = vadd.f32 %v156_v63, %v143_v16  ;;  %v3337_v51 = vadd.f32 %v296_v55, %v267_v43  ;;  %4909 = vst [vmem:[#allocation27_spill] sm:$0xff] %v3357_v33  ;;  %v3366_v21 = vsub.s32 7, %v307_v34  ;;  %v3397_v63 = vsub.s32 4, %v307_v34 }
 0x33f   :  { %v142_v41 = vadd.f32 %v137_v7, %v109_v6 }
 0x340   :  { %1715 = vrot.lane.b32.xlu0 %v2716_v10, %s2772_s25  ;;  %v196_v24 = vadd.f32 %v190_v52, %v161_v29  ;;  %v349_v59 = vrot.slane %v3337_v51, %v3339_v8  ;;  %v3348_v10 = vsub.s32 3, %v307_v34  ;;  %v471_v26 = vrot.slane %v3337_v51, %v3357_v33  ;;  %4910 = vst [vmem:[#allocation28_spill] sm:$0xff] %v3366_v21  ;;  %v2726_v52 = vld [vmem:[%s4833_s1 + $0x4e8] sm:$0xff] }
 0x341   :  { %v160_v54 = vadd.f32 %v2977_v53, %v142_v41  ;;  %v260_v53 = vsel %vm259_vm11, %v3228_v36, %v3102_v1  ;;  %v529_v1 = vrot.slane %v3337_v51, %v3366_v21  ;;  %4913 = vst [vmem:[#allocation31_spill] sm:$0xff] %v3397_v63 }
 0x342   :  { %4908 = vst [vmem:[#allocation26_spill] sm:$0xff] %v3348_v10  ;;  %v231_v18 = vadd.f32 %v225_v42, %v196_v24  ;;  %v413_v0 = vrot.slane %v3337_v51, %v3348_v10  ;;  %v2732_v24 = vld [vmem:[%s4833_s1 + $0x518] sm:$0xff] }
 0x343   :  { %v195_v25 = vadd.f32 %v3212_v28, %v160_v54  ;;  %v295_v28 = vsel %vm294_vm12, %v3088_v58, %v3240_v27  ;;  %v3389_v27 = vsub.s32 2, %v307_v34  ;;  %v2730_v54 = vld [vmem:[%s4833_s1 + $0x508] sm:$0xff]  ;;  %v2736_v42 = vld [vmem:[%s4833_s1 + $0x538] sm:$0xff] }
 0x344   :  { %1776 = vrot.lane.b32.xlu0 %v2718_v40, %s2773_s8  ;;  %v266_v50 = vadd.f32 %v260_v53, %v231_v18  ;;  %v2738_v18 = vld [vmem:[%s4833_s1 + $0x548] sm:$0xff] }
 0x345   :  { %v230_v38 = vadd.f32 %v3084_v56, %v195_v25  ;;  %v3378_v56 = vsub.s32 0, %v307_v34  ;;  %4912 = vst [vmem:[#allocation30_spill] sm:$0xff] %v3389_v27  ;;  %v3436_v25 = vpop.permute.xlu0 %1072 }
 0x346   :  { %v3373_v40 = vadd.f32 %v295_v28, %v266_v50  ;;  %4915 = vst [vmem:[#allocation33_spill] sm:$0xff] %v3436_v25 }
 0x347   :  { %v265_v57 = vadd.f32 %v3228_v36, %v230_v38  ;;  %4911 = vst [vmem:[#allocation29_spill] sm:$0xff] %v3378_v56 }
 0x348   :  { %1780 = vrot.lane.b32.xlu0 %v2720_v37, %s2773_s8  ;;  %v313_v16 = vrot.slane %v3373_v40, %v3378_v56  ;;  %v377_v43 = vrot.slane %v3373_v40, %v3389_v27  ;;  %v438_v7 = vrot.slane %v3373_v40, %v3397_v63  ;;  %v3405_v37 = vsub.s32 6, %v307_v34  ;;  %v2728_v34 = vld [vmem:[%s4833_s1 + $0x4f8] sm:$0xff] }
 0x349   :  { %v3381_v6 = vadd.f32 %v3088_v58, %v265_v57  ;;  %v3446_v53 = vpop.permute.xlu0 %1609 }
 0x34a   :  { %4914 = vst [vmem:[#allocation32_spill] sm:$0xff] %v3405_v37  ;;  %v496_v41 = vrot.slane %v3373_v40, %v3405_v37  ;;  %4916 = vst [vmem:[#allocation34_spill] sm:$0xff] %v3446_v53 }
 0x34b   :  { %v341_v36 = vrot.slane %v3381_v6, %v3339_v8  ;;  %v405_v58 = vrot.slane %v3381_v6, %v3348_v10  ;;  %v463_v55 = vrot.slane %v3381_v6, %v3357_v33  ;;  %v521_v29 = vrot.slane %v3381_v6, %v3366_v21 }
 0x34c   :  { %357 = vrot.lane.b32.xlu0 %v349_v59, %s2777_s30  ;;  %v2734_v59 = vld [vmem:[%s4833_s1 + $0x528] sm:$0xff] }
 0x34d   :  { %v3449_v38 = vpop.permute.xlu0 %1613 }
 0x34e   :  { %4917 = vst [vmem:[#allocation35_spill] sm:$0xff] %v3449_v38 }
 0x350   :  { %421 = vrot.lane.b32.xlu0 %v413_v0, %s2777_s30  ;;  %v2740_v0 = vld [vmem:[%s4833_s1 + $0x558] sm:$0xff] }
 0x351   :  { %v3451_v50 = vpop.permute.xlu0 %1646 }
 0x352   :  { %4918 = vst [vmem:[#allocation36_spill] sm:$0xff] %v3451_v50 }
 0x354   :  { %479 = vrot.lane.b32.xlu0 %v471_v26, %s2777_s30 }
 0x355   :  { %v3453_v26 = vpop.permute.xlu0 %1650 }
 0x356   :  { %4919 = vst [vmem:[#allocation37_spill] sm:$0xff] %v3453_v26 }
 0x358   :  { %537 = vrot.lane.b32.xlu0 %v529_v1, %s2777_s30 }
 0x35c   :  { %323 = vrot.lane.b32.xlu0 %v313_v16, %s2777_s30 }
 0x360   :  { %353 = vrot.lane.b32.xlu0 %v341_v36, %s2777_s30 }
 0x364   :  { %387 = vrot.lane.b32.xlu0 %v377_v43, %s2777_s30  ;;  %v2717_v43 = vld [vmem:[%s4833_s1 + $0x4a0] sm:$0xff] }
 0x368   :  { %417 = vrot.lane.b32.xlu0 %v405_v58, %s2777_s30 }
 0x36c   :  { %448 = vrot.lane.b32.xlu0 %v438_v7, %s2777_s30 }
 0x370   :  { %475 = vrot.lane.b32.xlu0 %v463_v55, %s2777_s30 }
 0x374   :  { %506 = vrot.lane.b32.xlu0 %v496_v41, %s2777_s30  ;;  %v2719_v41 = vld [vmem:[%s4833_s1 + $0x4b0] sm:$0xff] }
 0x378   :  { %533 = vrot.lane.b32.xlu0 %v521_v29, %s2777_s30 }
 0x37c   :  { %1876 = vrot.lane.b32.xlu0 %v2726_v52, %s2774_s12  ;;  %v317_v52 = vrot.slane %v3337_v51, %v3378_v56 }
 0x380   :  { %1880 = vrot.lane.b32.xlu0 %v2728_v34, %s2774_s12  ;;  %v381_v34 = vrot.slane %v3337_v51, %v3389_v27 }
 0x384   :  { %1941 = vrot.lane.b32.xlu0 %v2730_v54, %s2775_s19 }
 0x388   :  { %1945 = vrot.lane.b32.xlu0 %v2732_v24, %s2775_s19  ;;  %v442_v24 = vrot.slane %v3337_v51, %v3397_v63 }
 0x38c   :  { %2006 = vrot.lane.b32.xlu0 %v2734_v59, %s2776_s24 }
 0x390   :  { %2010 = vrot.lane.b32.xlu0 %v2736_v42, %s2776_s24  ;;  %v500_v42 = vrot.slane %v3337_v51, %v3405_v37  ;;  %v409_v51 = vrot.slane %v3373_v40, %v3348_v10 }
 0x394   :  { %2071 = vrot.lane.b32.xlu0 %v2738_v18, %s2777_s30  ;;  %v309_v18 = vrot.slane %v3381_v6, %v3378_v56 }
 0x398   :  { %2075 = vrot.lane.b32.xlu0 %v2740_v0, %s2777_s30 }
 0x3a6   :  { %v3455_v28 = vpop.permute.xlu1 %1672 }
 0x3a7   :  { %4920 = vst [vmem:[#allocation38_spill] sm:$0xff] %v3455_v28 }
 0x3aa   :  { %v3457_v57 = vpop.permute.xlu0 %1678  ;;  %v3459_v1 = vpop.permute.xlu1 %1709 }
 0x3ab   :  { %4921 = vst [vmem:[#allocation39_spill] sm:$0xff] %v3457_v57  ;;  %4922 = vst [vmem:[#allocation40_spill] sm:$0xff] %v3459_v1  ;;  %v1725_v16 = vmul.f32 0.0, %v3459_v1 }
 0x3ad   :  { %1737 = vrot.lane.b32.xlu1 %v1725_v16, %s2778_s20  ;;  %v345_v16 = vrot.slane %v3373_v40, %v3339_v8 }
 0x3ae   :  { %v3463_v36 = vpop.permute.xlu0 %1711  ;;  %v3468_v58 = vpop.permute.xlu1 %1713 }
 0x3af   :  { %4923 = vst [vmem:[#allocation41_spill] sm:$0xff] %v3463_v36  ;;  %4924 = vst [vmem:[#allocation42_spill] sm:$0xff] %v3468_v58  ;;  %v1728_v7 = vmul.f32 0.0, %v3468_v58 }
 0x3b1   :  { %1774 = vrot.lane.b32.xlu1 %v2717_v43, %s2773_s8  ;;  %1743 = vrot.lane.b32.xlu0 %v1728_v7, %s2778_s20  ;;  %v373_v7 = vrot.slane %v3381_v6, %v3389_v27 }
 0x3b2   :  { %v3473_v55 = vpop.permute.xlu0 %1715 }
 0x3b3   :  { %4925 = vst [vmem:[#allocation43_spill] sm:$0xff] %v3473_v55 }
 0x3b5   :  { %1778 = vrot.lane.b32.xlu1 %v2719_v41, %s2773_s8 }
 0x3b6   :  { %v3479_v29 = vpop.permute.xlu0 %1776 }
 0x3b7   :  { %4926 = vst [vmem:[#allocation44_spill] sm:$0xff] %v3479_v29 }
 0x3b9   :  { %325 = vrot.lane.b32.xlu1 %v317_v52, %s2777_s30  ;;  %v434_v52 = vrot.slane %v3381_v6, %v3397_v63 }
 0x3ba   :  { %v3486_v54 = vpop.permute.xlu0 %1780 }
 0x3bb   :  { %4927 = vst [vmem:[#allocation45_spill] sm:$0xff] %v3486_v54 }
 0x3bd   :  { %389 = vrot.lane.b32.xlu1 %v381_v34, %s2777_s30 }
 0x3be   :  { %v3492_v59 = vpop.permute.xlu0 %357 }
 0x3c1   :  { %450 = vrot.lane.b32.xlu1 %v442_v24, %s2777_s30  ;;  %v467_v24 = vrot.slane %v3373_v40, %v3357_v33 }
 0x3c2   :  { %v3499_v0 = vpop.permute.xlu0 %421 }
 0x3c5   :  { %508 = vrot.lane.b32.xlu1 %v500_v42, %s2777_s30  ;;  %v492_v42 = vrot.slane %v3381_v6, %v3405_v37  ;;  %v2727_v6 = vld [vmem:[%s4833_s1 + $0x4f0] sm:$0xff] }
 0x3c6   :  { %v3505_v43 = vpop.permute.xlu0 %479 }
 0x3c9   :  { %321 = vrot.lane.b32.xlu1 %v309_v18, %s2777_s30 }
 0x3ca   :  { %v3512_v41 = vpop.permute.xlu0 %537 }
 0x3cd   :  { %355 = vrot.lane.b32.xlu1 %v345_v16, %s2777_s30  ;;  %v525_v16 = vrot.slane %v3373_v40, %v3366_v21  ;;  %v2729_v40 = vld [vmem:[%s4833_s1 + $0x500] sm:$0xff] }
 0x3ce   :  { %v3518_v34 = vpop.permute.xlu0 %323 }
 0x3d1   :  { %385 = vrot.lane.b32.xlu1 %v373_v7, %s2777_s30  ;;  %v2725_v7 = vld [vmem:[%s4833_s1 + $0x4e0] sm:$0xff] }
 0x3d2   :  { %v3525_v18 = vpop.permute.xlu0 %353 }
 0x3d5   :  { %419 = vrot.lane.b32.xlu1 %v409_v51, %s2777_s30 }
 0x3d6   :  { %v3534_v51 = vpop.permute.xlu0 %387 }
 0x3d9   :  { %446 = vrot.lane.b32.xlu1 %v434_v52, %s2777_s30 }
 0x3da   :  { %v3540_v52 = vpop.permute.xlu0 %417 }
 0x3dd   :  { %477 = vrot.lane.b32.xlu1 %v467_v24, %s2777_s30  ;;  %v2731_v24 = vld [vmem:[%s4833_s1 + $0x510] sm:$0xff] }
 0x3e1   :  { %504 = vrot.lane.b32.xlu1 %v492_v42, %s2777_s30  ;;  %v3550_v42 = vpop.permute.xlu0 %448 }
 0x3e5   :  { %535 = vrot.lane.b32.xlu1 %v525_v16, %s2777_s30  ;;  %v2733_v16 = vld [vmem:[%s4833_s1 + $0x520] sm:$0xff] }
 0x3e9   :  { %1874 = vrot.lane.b32.xlu1 %v2725_v7, %s2774_s12  ;;  %v3556_v7 = vpop.permute.xlu0 %475 }
 0x3ed   :  { %1878 = vrot.lane.b32.xlu1 %v2727_v6, %s2774_s12  ;;  %v2735_v6 = vld [vmem:[%s4833_s1 + $0x530] sm:$0xff]  ;;  %v3566_v57 = vpop.permute.xlu0 %506 }
 0x3f1   :  { %1939 = vrot.lane.b32.xlu1 %v2729_v40, %s2775_s19  ;;  %v2737_v40 = vld [vmem:[%s4833_s1 + $0x540] sm:$0xff]  ;;  %v3572_v38 = vpop.permute.xlu0 %533 }
 0x3f5   :  { %1943 = vrot.lane.b32.xlu1 %v2731_v24, %s2775_s19  ;;  %v2739_v24 = vld [vmem:[%s4833_s1 + $0x550] sm:$0xff] }
 0x3f9   :  { %2004 = vrot.lane.b32.xlu1 %v2733_v16, %s2776_s24  ;;  %v3575_v16 = vpop.permute.xlu0 %1876 }
 0x3fa   :  { %4928 = vst [vmem:[#allocation46_spill] sm:$0xff] %v3575_v16 }
 0x3fd   :  { %2008 = vrot.lane.b32.xlu1 %v2735_v6, %s2776_s24  ;;  %v3577_v28 = vpop.permute.xlu0 %1880 }
 0x3fe   :  { %4929 = vst [vmem:[#allocation47_spill] sm:$0xff] %v3577_v28 }
 0x401   :  { %2069 = vrot.lane.b32.xlu1 %v2737_v40, %s2777_s30  ;;  %v3579_v6 = vpop.permute.xlu0 %1941 }
 0x402   :  { %4930 = vst [vmem:[#allocation48_spill] sm:$0xff] %v3579_v6  ;;  %v1957_v26 = vmul.f32 0.0, %v3579_v6 }
 0x405   :  { %2073 = vrot.lane.b32.xlu1 %v2739_v24, %s2777_s30  ;;  %v3581_v53 = vpop.permute.xlu0 %1945  ;;  %v1892_v24 = vmul.f32 0.0, %v3575_v16 }
 0x406   :  { %4931 = vst [vmem:[#allocation49_spill] sm:$0xff] %v3581_v53 }
 0x409   :  { %v3585_v29 = vpop.permute.xlu0 %2006 }
 0x40a   :  { %4933 = vst [vmem:[#allocation51_spill] sm:$0xff] %v3585_v29  ;;  %v2022_v16 = vmul.f32 0.0, %v3585_v29 }
 0x40d   :  { %v3594_v1 = vpop.permute.xlu0 %2010 }
 0x40e   :  { %4936 = vst [vmem:[#allocation54_spill] sm:$0xff] %v3594_v1 }
 0x41f   :  { %v3583_v54 = vpop.permute.xlu1 %1737 }
 0x420   :  { %4932 = vst [vmem:[#allocation50_spill] sm:$0xff] %v3583_v54  ;;  %v1895_v54 = vmul.f32 0.0, %v3577_v28 }
 0x423   :  { %v3587_v40 = vpop.permute.xlu1 %1774 }
 0x424   :  { %4934 = vst [vmem:[#allocation52_spill] sm:$0xff] %v3587_v40  ;;  %v1790_v58 = vmul.f32 0.0, %v3587_v40  ;;  %v3601_v40 = vpop.permute.xlu0 %2071 }
 0x425   :  { %4937 = vst [vmem:[#allocation55_spill] sm:$0xff] %v3601_v40  ;;  %v2087_v6 = vmul.f32 0.0, %v3601_v40 }
 0x426   :  { %1802 = vrot.lane.b32.xlu1 %v1790_v58, %s2770_s13  ;;  %v1960_v58 = vmul.f32 0.0, %v3581_v53  ;;  %v2645_v53 = vld [vmem:[%s4833_s1 + $0x120] sm:$0xff] }
 0x427   :  { %v3592_v55 = vpop.permute.xlu1 %1778 }
 0x428   :  { %4935 = vst [vmem:[#allocation53_spill] sm:$0xff] %v3592_v55  ;;  %v1793_v36 = vmul.f32 0.0, %v3592_v55  ;;  %v3611_v28 = vpop.permute.xlu0 %2075 }
 0x429   :  { %4938 = vst [vmem:[#allocation56_spill] sm:$0xff] %v3611_v28  ;;  %v2090_v29 = vmul.f32 0.0, %v3611_v28 }
 0x42a   :  { %1808 = vrot.lane.b32.xlu0 %v1793_v36, %s2770_s13  ;;  %1906 = vrot.lane.b32.xlu1 %v1892_v24, %s2779_s21  ;;  %v2025_v36 = vmul.f32 0.0, %v3594_v1 }
 0x42b   :  { %v326_v61 = vpop.permute.xlu1 %325 }
 0x42e   :  { %1912 = vrot.lane.b32.xlu0 %v1895_v54, %s2779_s21  ;;  %1971 = vrot.lane.b32.xlu1 %v1957_v26, %s2780_s22 }
 0x42f   :  { %v390_v55 = vpop.permute.xlu1 %389 }
 0x432   :  { %1977 = vrot.lane.b32.xlu0 %v1960_v58, %s2780_s22  ;;  %2036 = vrot.lane.b32.xlu1 %v2022_v16, %s2781_s23  ;;  %v2648_v58 = vld [vmem:[%s4833_s1 + $0x148] sm:$0xff] }
 0x433   :  { %v451_v24 = vpop.permute.xlu1 %450  ;;  %v2646_v16 = vld [vmem:[%s4833_s1 + $0x128] sm:$0xff] }
 0x436   :  { %2042 = vrot.lane.b32.xlu0 %v2025_v36, %s2781_s23  ;;  %2101 = vrot.lane.b32.xlu1 %v2087_v6, %s2782_s26  ;;  %v328_v36 = vsel %vm277_vm6, %v3518_v34, %v326_v61  ;;  %v2647_v6 = vld [vmem:[%s4833_s1 + $0x140] sm:$0xff] }
 0x437   :  { %v509_v54 = vpop.permute.xlu1 %508  ;;  %v2649_v61 = vld [vmem:[%s4833_s1 + $0x160] sm:$0xff]  ;;  %v332_v37 = vmul.f32 %v2646_v16, %v328_v36  ;;  %v2652_v36 = vld [vmem:[%s4833_s1 + $0x188] sm:$0xff] }
 0x43a   :  { %2107 = vrot.lane.b32.xlu0 %v2090_v29, %s2782_s26 }
 0x43b   :  { %v322_v26 = vpop.permute.xlu1 %321 }
 0x43c   :  { %v327_v50 = vsel %vm277_vm6, %v322_v26, %v3518_v34  ;;  %v2651_v26 = vld [vmem:[%s4833_s1 + $0x180] sm:$0xff] }
 0x43f   :  { %v356_v40 = vpop.permute.xlu1 %355 }
 0x440   :  { %v359_v29 = vsel %vm277_vm6, %v3525_v18, %v356_v40  ;;  %v360_v28 = vsel %vm277_vm6, %v356_v40, %v3492_v59  ;;  %v2650_v18 = vld [vmem:[%s4833_s1 + $0x168] sm:$0xff]  ;;  %v331_v40 = vmul.f32 %v2645_v53, %v327_v50 }
 0x441   :  { %v364_v1 = vmul.f32 %v2648_v58, %v360_v28  ;;  %v363_v21 = vmul.f32 %v2647_v6, %v359_v29  ;;  %v392_v28 = vsel %vm277_vm6, %v3534_v51, %v390_v55 }
 0x442   :  { %v396_v29 = vmul.f32 %v2650_v18, %v392_v28 }
 0x443   :  { %v386_v25 = vpop.permute.xlu1 %385  ;;  %v366_v63 = vadd.f32 %v364_v1, %v332_v37  ;;  %v365_v33 = vadd.f32 %v363_v21, %v331_v40  ;;  %v617_v21 = vsel %vm51_vm0, %v2998_v11, %v3064_v44 }
 0x444   :  { %v391_v59 = vsel %vm277_vm6, %v386_v25, %v3534_v51 }
 0x445   :  { %v395_v34 = vmul.f32 %v2649_v61, %v391_v59  ;;  %v398_v37 = vadd.f32 %v396_v29, %v366_v63 }
 0x447   :  { %v420_v27 = vpop.permute.xlu1 %419  ;;  %v397_v50 = vadd.f32 %v395_v34, %v365_v33 }
 0x448   :  { %v423_v55 = vsel %vm277_vm6, %v3540_v52, %v420_v27  ;;  %v424_v25 = vsel %vm277_vm6, %v420_v27, %v3499_v0  ;;  %v453_v27 = vsel %vm277_vm6, %v3550_v42, %v451_v24  ;;  %v511_v24 = vsel %vm277_vm6, %v3566_v57, %v509_v54 }
 0x449   :  { %v427_v1 = vmul.f32 %v2651_v26, %v423_v55  ;;  %v428_v51 = vmul.f32 %v2652_v36, %v424_v25 }
 0x44b   :  { %v429_v59 = vadd.f32 %v427_v1, %v397_v50  ;;  %v430_v10 = vadd.f32 %v428_v51, %v398_v37  ;;  %v447_v56 = vpop.permute.xlu1 %446 }
 0x44c   :  { %v452_v11 = vsel %vm277_vm6, %v447_v56, %v3550_v42 }
 0x44d   :  { %v3657_v8 = vmax.f32 %v429_v59, 0.0  ;;  %v3659_v5 = vmax.f32 %v430_v10, 0.0  ;;  %v456_v29 = vmul.f32 %v2645_v53, %v452_v11 }
 0x44f   :  { %v478_v28 = vpop.permute.xlu1 %477  ;;  %v627_v52 = vmul.f32 %v3064_v44, %v3659_v5  ;;  %v626_v33 = vmul.f32 %v617_v21, %v3657_v8  ;;  %v457_v44 = vmul.f32 %v2646_v16, %v453_v27 }
 0x450   :  { %v481_v63 = vsel %vm277_vm6, %v3556_v7, %v478_v28  ;;  %v482_v10 = vsel %vm277_vm6, %v478_v28, %v3505_v43 }
 0x451   :  { %v486_v0 = vmul.f32 %v2648_v58, %v482_v10  ;;  %641 = vrot.lane.b32.xlu1 %v627_v52, %s2773_s8  ;;  %639 = vrot.lane.b32.xlu0 %v626_v33, %s2773_s8  ;;  %v485_v40 = vmul.f32 %v2647_v6, %v481_v63  ;;  %v515_v58 = vmul.f32 %v2650_v18, %v511_v24  ;;  %v2672_v33 = vld [vmem:[%s4833_s1 + $0x2b8] sm:$0xff] }
 0x452   :  { %v692_v18 = vmul.f32 %v3068_v46, %v3659_v5  ;;  %v847_v10 = vsel %vm172_vm3, %v3182_v39, %v3104_v2  ;;  %v912_v2 = vsel %vm207_vm4, %v3246_v35, %v3130_v20 }
 0x453   :  { %v505_v34 = vpop.permute.xlu1 %504  ;;  %v488_v55 = vadd.f32 %v486_v0, %v457_v44  ;;  %v487_v25 = vadd.f32 %v485_v40, %v456_v29  ;;  %v855_v0 = vmul.f32 %v3182_v39, %v3657_v8  ;;  %v856_v11 = vmul.f32 %v847_v10, %v3659_v5 }
 0x454   :  { %v510_v7 = vsel %vm277_vm6, %v505_v34, %v3566_v57  ;;  %v618_v57 = vsel %vm51_vm0, %v3002_v13, %v3066_v45  ;;  %v683_v13 = vsel %vm86_vm1, %v3010_v17, %v3070_v47  ;;  %v748_v17 = vsel %vm68_vm2, %v3021_v22, %v3074_v49 }
 0x455   :  { %v514_v43 = vmul.f32 %v2649_v61, %v510_v7  ;;  %v517_v16 = vadd.f32 %v515_v58, %v488_v55  ;;  %v848_v44 = vsel %vm172_vm3, %v3242_v31, %v3108_v4  ;;  %v920_v39 = vmul.f32 %v3246_v35, %v3657_v8 }
 0x456   :  { %v921_v24 = vmul.f32 %v912_v2, %v3659_v5  ;;  %v913_v4 = vsel %vm207_vm4, %v3248_v62, %v3134_v23  ;;  %v977_v35 = vsel %vm242_vm5, %v3252_v60, %v3156_v30  ;;  %v985_v29 = vmul.f32 %v3252_v60, %v3657_v8  ;;  %v4955_v2 = vld [vmem:[#allocation5_spill] sm:$0xff] }
 0x457   :  { %v536_v50 = vpop.permute.xlu1 %535  ;;  %v516_v42 = vadd.f32 %v514_v43, %v487_v25  ;;  %v986_v23 = vmul.f32 %v977_v35, %v3659_v5  ;;  %v1042_v60 = vsel %vm277_vm6, %v3258_v14, %v3184_v3  ;;  %v1050_v25 = vmul.f32 %v3258_v14, %v3657_v8 }
 0x458   :  { %v539_v37 = vsel %vm277_vm6, %v3572_v38, %v536_v50  ;;  %v540_v56 = vsel %vm277_vm6, %v536_v50, %v3512_v41  ;;  %v682_v41 = vsel %vm86_vm1, %v3006_v15, %v3068_v46  ;;  %v747_v15 = vsel %vm68_vm2, %v3014_v19, %v3072_v48  ;;  %v2669_v19 = vld [vmem:[%s4833_s1 + $0x2a0] sm:$0xff] }
 0x459   :  { %v543_v6 = vmul.f32 %v2651_v26, %v539_v37  ;;  %v544_v1 = vmul.f32 %v2652_v36, %v540_v56  ;;  %v691_v26 = vmul.f32 %v682_v41, %v3657_v8  ;;  %v757_v46 = vmul.f32 %v3072_v48, %v3659_v5  ;;  %v2670_v48 = vld [vmem:[%s4833_s1 + $0x2a8] sm:$0xff] }
 0x45a   :  { %v756_v21 = vmul.f32 %v747_v15, %v3657_v8  ;;  %v800_v52 = vmul.f32 %v2669_v19, %v3657_v8  ;;  %v801_v22 = vmul.f32 %v2670_v48, %v3659_v5 }
 0x45b   :  { %v545_v54 = vadd.f32 %v543_v6, %v516_v42  ;;  %v546_v51 = vadd.f32 %v544_v1, %v517_v16  ;;  %v3827_v6 = vpop.permute.xlu0 %1743 }
 0x45c   :  { %4943 = vst [vmem:[#allocation59_spill] sm:$0xff] %v3827_v6 }
 0x45d   :  { %v3685_v59 = vmax.f32 %v545_v54, 0.0  ;;  %v3687_v53 = vmax.f32 %v546_v51, 0.0 }
 0x45f   :  { %v629_v61 = vmul.f32 %v618_v57, %v3685_v59  ;;  %v630_v38 = vmul.f32 %v3066_v45, %v3687_v53  ;;  %v694_v45 = vmul.f32 %v683_v13, %v3685_v59  ;;  %v695_v36 = vmul.f32 %v3070_v47, %v3687_v53 }
 0x460   :  { %v759_v47 = vmul.f32 %v748_v17, %v3685_v59  ;;  %v760_v28 = vmul.f32 %v3074_v49, %v3687_v53  ;;  %v2671_v49 = vld [vmem:[%s4833_s1 + $0x2b0] sm:$0xff]  ;;  %v803_v63 = vmul.f32 %v2672_v33, %v3687_v53  ;;  %v859_v40 = vmul.f32 %v848_v44, %v3687_v53 }
 0x461   :  { %645 = vrot.lane.b32.xlu1 %v629_v61, %s2773_s8  ;;  %647 = vrot.lane.b32.xlu0 %v630_v38, %s2773_s8  ;;  %v802_v27 = vmul.f32 %v2671_v49, %v3685_v59  ;;  %v858_v34 = vmul.f32 %v3242_v31, %v3685_v59  ;;  %v3776_v31 = vpop.permute.xlu1 %1874  ;;  %v924_v7 = vmul.f32 %v913_v4, %v3687_v53 }
 0x462   :  { %v923_v20 = vmul.f32 %v3248_v62, %v3685_v59  ;;  %v978_v62 = vsel %vm242_vm5, %v3254_v9, %v3160_v32  ;;  %v988_v30 = vmul.f32 %v3254_v9, %v3685_v59  ;;  %v1051_v32 = vmul.f32 %v1042_v60, %v3659_v5  ;;  %v4939_v9 = vld [vmem:[#allocation19_spill] sm:$0xff]  ;;  %v4957_v60 = vld [vmem:[#allocation17_spill] sm:$0xff] }
 0x463   :  { %v989_v43 = vmul.f32 %v978_v62, %v3687_v53  ;;  %v1043_v50 = vsel %vm277_vm6, %v4939_v9, %v3190_v12  ;;  %v1053_v3 = vmul.f32 %v4939_v9, %v3685_v59  ;;  %v4956_v62 = vld [vmem:[#allocation16_spill] sm:$0xff] }
 0x464   :  { %v1054_v37 = vmul.f32 %v1043_v50, %v3687_v53  ;;  %v4958_v50 = vld [vmem:[#allocation18_spill] sm:$0xff] }
 0x465   :  { %706 = vrot.lane.b32.xlu1 %v692_v18, %s2778_s20  ;;  %704 = vrot.lane.b32.xlu0 %v691_v26, %s2778_s20  ;;  %v3789_v55 = vpop.permute.xlu1 %1878 }
 0x469   :  { %710 = vrot.lane.b32.xlu1 %v694_v45, %s2778_s20  ;;  %712 = vrot.lane.b32.xlu0 %v695_v36, %s2778_s20  ;;  %v3804_v58 = vpop.permute.xlu1 %1939 }
 0x46d   :  { %771 = vrot.lane.b32.xlu1 %v757_v46, %s2770_s13  ;;  %769 = vrot.lane.b32.xlu0 %v756_v21, %s2770_s13  ;;  %v3817_v56 = vpop.permute.xlu1 %1943 }
 0x471   :  { %775 = vrot.lane.b32.xlu1 %v759_v47, %s2770_s13  ;;  %777 = vrot.lane.b32.xlu0 %v760_v28, %s2770_s13  ;;  %v3821_v14 = vpop.permute.xlu1 %2004 }
 0x472   :  { %4940 = vst [vmem:[#allocation19_spill] sm:$0xff] %v3821_v14 }
 0x475   :  { %808 = vrot.lane.b32.xlu1 %v800_v52, %s2771_s14  ;;  %810 = vrot.lane.b32.xlu0 %v801_v22, %s2771_s14  ;;  %v3823_v42 = vpop.permute.xlu1 %2008 }
 0x476   :  { %4941 = vst [vmem:[#allocation57_spill] sm:$0xff] %v3823_v42  ;;  %v4975_v42 = vld [vmem:[#allocation14_spill] sm:$0xff] }
 0x479   :  { %812 = vrot.lane.b32.xlu1 %v802_v27, %s2771_s14  ;;  %814 = vrot.lane.b32.xlu0 %v803_v63, %s2771_s14  ;;  %v3825_v16 = vpop.permute.xlu1 %2069 }
 0x47a   :  { %4942 = vst [vmem:[#allocation58_spill] sm:$0xff] %v3825_v16 }
 0x47d   :  { %867 = vrot.lane.b32.xlu1 %v855_v0, %s2779_s21  ;;  %869 = vrot.lane.b32.xlu0 %v856_v11, %s2779_s21  ;;  %v3829_v12 = vpop.permute.xlu1 %2073 }
 0x47e   :  { %4944 = vst [vmem:[#allocation60_spill] sm:$0xff] %v3829_v12  ;;  %v4970_v12 = vld [vmem:[#allocation33_spill] sm:$0xff] }
 0x481   :  { %875 = vrot.lane.b32.xlu1 %v859_v40, %s2779_s21  ;;  %873 = vrot.lane.b32.xlu0 %v858_v34, %s2779_s21 }
 0x485   :  { %932 = vrot.lane.b32.xlu1 %v920_v39, %s2780_s22  ;;  %934 = vrot.lane.b32.xlu0 %v921_v24, %s2780_s22  ;;  %v590_v39 = vmul.f32 %v4955_v2, %v3659_v5 }
 0x489   :  { %940 = vrot.lane.b32.xlu1 %v924_v7, %s2780_s22  ;;  %938 = vrot.lane.b32.xlu0 %v923_v20, %s2780_s22 }
 0x48d   :  { %997 = vrot.lane.b32.xlu1 %v985_v29, %s2781_s23  ;;  %999 = vrot.lane.b32.xlu0 %v986_v23, %s2781_s23 }
 0x491   :  { %1005 = vrot.lane.b32.xlu1 %v989_v43, %s2781_s23  ;;  %1003 = vrot.lane.b32.xlu0 %v988_v30, %s2781_s23 }
 0x495   :  { %1062 = vrot.lane.b32.xlu1 %v1050_v25, %s2782_s26  ;;  %1064 = vrot.lane.b32.xlu0 %v1051_v32, %s2782_s26 }
 0x498   :  { %v3833_v54 = vpop.permute.xlu1 %1802 }
 0x499   :  { %1070 = vrot.lane.b32.xlu1 %v1054_v37, %s2782_s26  ;;  %1068 = vrot.lane.b32.xlu0 %v1053_v3, %s2782_s26  ;;  %4946 = vst [vmem:[#allocation62_spill] sm:$0xff] %v3833_v54 }
 0x49c   :  { %v3831_v1 = vpop.permute.xlu0 %1808  ;;  %v3837_v57 = vpop.permute.xlu1 %1906 }
 0x49d   :  { %4945 = vst [vmem:[#allocation61_spill] sm:$0xff] %v3831_v1  ;;  %4948 = vst [vmem:[#allocation64_spill] sm:$0xff] %v3837_v57  ;;  %v4969_v1 = vld [vmem:[#allocation31_spill] sm:$0xff] }
 0x4a0   :  { %v3835_v51 = vpop.permute.xlu0 %1912  ;;  %v3839_v61 = vpop.permute.xlu1 %1971 }
 0x4a1   :  { %4947 = vst [vmem:[#allocation63_spill] sm:$0xff] %v3835_v51  ;;  %4949 = vst [vmem:[#allocation65_spill] sm:$0xff] %v3839_v61 }
 0x4a4   :  { %v3841_v38 = vpop.permute.xlu0 %1977  ;;  %v3843_v41 = vpop.permute.xlu1 %2036 }
 0x4a5   :  { %4950 = vst [vmem:[#allocation66_spill] sm:$0xff] %v3841_v38  ;;  %4951 = vst [vmem:[#allocation67_spill] sm:$0xff] %v3843_v41  ;;  %v4966_v41 = vld [vmem:[#allocation11_spill] sm:$0xff] }
 0x4a8   :  { %v3845_v18 = vpop.permute.xlu0 %2042  ;;  %v3847_v26 = vpop.permute.xlu1 %2101 }
 0x4a9   :  { %4952 = vst [vmem:[#allocation68_spill] sm:$0xff] %v3845_v18  ;;  %4953 = vst [vmem:[#allocation69_spill] sm:$0xff] %v3847_v26 }
 0x4ac   :  { %v3849_v13 = vpop.permute.xlu0 %2107 }
 0x4ad   :  { %4954 = vst [vmem:[#allocation70_spill] sm:$0xff] %v3849_v13 }
 0x4c3   :  { %v3851_v45 = vpop.permute.xlu1 %641  ;;  %v3853_v36 = vpop.permute.xlu0 %639 }
 0x4c4   :  { %v661_v24 = vadd.f32 %v3851_v45, %v590_v39 }
 0x4d3   :  { %v3855_v15 = vpop.permute.xlu1 %645  ;;  %v3857_v46 = vpop.permute.xlu0 %647 }
 0x4d7   :  { %v3859_v21 = vpop.permute.xlu1 %706  ;;  %v3861_v17 = vpop.permute.xlu0 %704 }
 0x4d8   :  { %v726_v20 = vadd.f32 %v3859_v21, %v661_v24  ;;  %v4959_v24 = vld [vmem:[#allocation6_spill] sm:$0xff] }
 0x4db   :  { %v3863_v47 = vpop.permute.xlu1 %710  ;;  %v3865_v28 = vpop.permute.xlu0 %712 }
 0x4df   :  { %v3867_v19 = vpop.permute.xlu1 %771  ;;  %v3869_v48 = vpop.permute.xlu0 %769 }
 0x4e0   :  { %v791_v35 = vadd.f32 %v3867_v19, %v726_v20  ;;  %v593_v20 = vmul.f32 %v4959_v24, %v3687_v53 }
 0x4e3   :  { %v3871_v52 = vpop.permute.xlu1 %775  ;;  %v3873_v22 = vpop.permute.xlu0 %777 }
 0x4e7   :  { %v3875_v49 = vpop.permute.xlu1 %808  ;;  %v3877_v33 = vpop.permute.xlu0 %810 }
 0x4e8   :  { %v826_v30 = vadd.f32 %v3877_v33, %v791_v35  ;;  %v4960_v35 = vld [vmem:[#allocation20_spill] sm:$0xff] }
 0x4eb   :  { %v3879_v27 = vpop.permute.xlu1 %812  ;;  %v3881_v63 = vpop.permute.xlu0 %814 }
 0x4ef   :  { %v3883_v10 = vpop.permute.xlu1 %867  ;;  %v3885_v0 = vpop.permute.xlu0 %869 }
 0x4f0   :  { %v880_v43 = vsel %vm189_vm8, %v3885_v0, %v4956_v62 }
 0x4f1   :  { %v891_v32 = vadd.f32 %v880_v43, %v826_v30  ;;  %v664_v43 = vadd.f32 %v3857_v46, %v593_v20 }
 0x4f3   :  { %v3887_v11 = vpop.permute.xlu1 %875  ;;  %v3889_v44 = vpop.permute.xlu0 %873  ;;  %v729_v13 = vadd.f32 %v3865_v28, %v664_v43 }
 0x4f5   :  { %v794_v38 = vadd.f32 %v3873_v22, %v729_v13 }
 0x4f7   :  { %v3891_v40 = vpop.permute.xlu1 %932  ;;  %v3893_v34 = vpop.permute.xlu0 %934  ;;  %v829_v20 = vadd.f32 %v3881_v63, %v794_v38 }
 0x4f8   :  { %v945_v25 = vsel %vm224_vm10, %v3893_v34, %v4957_v60 }
 0x4f9   :  { %v956_v3 = vadd.f32 %v945_v25, %v891_v32  ;;  %v4961_v25 = vld [vmem:[#allocation25_spill] sm:$0xff] }
 0x4fb   :  { %v3898_v4 = vpop.permute.xlu1 %940  ;;  %v3900_v7 = vpop.permute.xlu0 %938 }
 0x4fc   :  { %v947_v51 = vsel %vm224_vm10, %v3898_v4, %v4966_v41 }
 0x4ff   :  { %v3904_v29 = vpop.permute.xlu1 %997  ;;  %v3906_v23 = vpop.permute.xlu0 %999 }
 0x500   :  { %v1010_v37 = vsel %vm259_vm11, %v3906_v23, %v4958_v50  ;;  %v4962_v50 = vld [vmem:[#allocation29_spill] sm:$0xff] }
 0x501   :  { %v1021_v62 = vadd.f32 %v1010_v37, %v956_v3  ;;  %v4963_v37 = vld [vmem:[#allocation10_spill] sm:$0xff] }
 0x502   :  { %v882_v3 = vsel %vm189_vm8, %v3887_v11, %v4963_v37  ;;  %v4968_v37 = vld [vmem:[#allocation27_spill] sm:$0xff] }
 0x503   :  { %v3915_v9 = vpop.permute.xlu0 %1003  ;;  %v3920_v39 = vpop.permute.xlu1 %1005  ;;  %v894_v61 = vadd.f32 %v882_v3, %v829_v20  ;;  %v4971_v20 = vld [vmem:[#allocation3_spill] sm:$0xff] }
 0x505   :  { %v959_v38 = vadd.f32 %v947_v51, %v894_v61  ;;  %v4972_v51 = vld [vmem:[#allocation13_spill] sm:$0xff] }
 0x506   :  { %v649_v61 = vsel %vm68_vm2, %v4972_v51, %v3853_v36 }
 0x507   :  { %v3924_v54 = vpop.permute.xlu0 %1064  ;;  %v3931_v26 = vpop.permute.xlu1 %1062 }
 0x508   :  { %v1075_v60 = vsel %vm294_vm12, %v3924_v54, %v4960_v35 }
 0x509   :  { %v1086_v30 = vadd.f32 %v1075_v60, %v1021_v62  ;;  %v4964_v62 = vld [vmem:[#allocation26_spill] sm:$0xff] }
 0x50a   :  { %v4965_v60 = vld [vmem:[#allocation30_spill] sm:$0xff] }
 0x50b   :  { %v1136_v32 = vrot.slane %v1086_v30, %v4961_v25  ;;  %v1104_v18 = vrot.slane %v1086_v30, %v4962_v50  ;;  %v1200_v35 = vrot.slane %v1086_v30, %v4964_v62  ;;  %v1168_v43 = vrot.slane %v1086_v30, %v4965_v60  ;;  %v3947_v13 = vpop.permute.xlu1 %1070 }
 0x50c   :  { %v1264_v57 = vrot.slane %v1086_v30, %v4968_v37  ;;  %v1232_v6 = vrot.slane %v1086_v30, %v4969_v1  ;;  %v1077_v41 = vsel %vm294_vm12, %v3947_v13, %v4970_v12 }
 0x50d   :  { %1144 = vrot.lane.b32.xlu0 %v1136_v32, %s2777_s30  ;;  %1112 = vrot.lane.b32.xlu1 %v1104_v18, %s2777_s30  ;;  %v4967_v18 = vld [vmem:[#allocation12_spill] sm:$0xff] }
 0x50e   :  { %v1012_v32 = vsel %vm259_vm11, %v3920_v39, %v4967_v18  ;;  %v650_v18 = vsel %vm68_vm2, %v3853_v36, %v3851_v45  ;;  %v4976_v45 = vld [vmem:[#allocation15_spill] sm:$0xff] }
 0x50f   :  { %v1024_v3 = vadd.f32 %v1012_v32, %v959_v38  ;;  %v779_v36 = vsel %vm51_vm0, %v4976_v45, %v3869_v48 }
 0x511   :  { %1208 = vrot.lane.b32.xlu0 %v1200_v35, %s2777_s30  ;;  %1176 = vrot.lane.b32.xlu1 %v1168_v43, %s2777_s30  ;;  %v580_v35 = vsel %vm31_vm7, %v4971_v20, %v4955_v2  ;;  %v588_v43 = vmul.f32 0.0, %v4971_v20  ;;  %v1089_v32 = vadd.f32 %v1077_v41, %v1024_v3  ;;  %v714_v2 = vsel %vm103_vm9, %v4975_v42, %v3861_v17 }
 0x512   :  { %v589_v12 = vmul.f32 %v580_v35, %v3657_v8  ;;  %v715_v20 = vsel %vm103_vm9, %v3861_v17, %v3859_v21  ;;  %v816_v17 = vsel %vm31_vm7, %v3875_v49, %v3877_v33  ;;  %v944_v33 = vsel %vm224_vm10, %v3891_v40, %v3893_v34 }
 0x513   :  { %v659_v51 = vadd.f32 %v649_v61, %v588_v43  ;;  %v1386_v3 = vrot.slane %v1089_v32, %v4961_v25  ;;  %v1357_v21 = vrot.slane %v1089_v32, %v4962_v50  ;;  %v1444_v43 = vrot.slane %v1089_v32, %v4964_v62 }
 0x514   :  { %v660_v14 = vadd.f32 %v650_v18, %v589_v12  ;;  %v1415_v61 = vrot.slane %v1089_v32, %v4965_v60 }
 0x515   :  { %1272 = vrot.lane.b32.xlu0 %v1264_v57, %s2777_s30  ;;  %1240 = vrot.lane.b32.xlu1 %v1232_v6, %s2777_s30  ;;  %v4973_v57 = vld [vmem:[#allocation28_spill] sm:$0xff]  ;;  %v724_v41 = vadd.f32 %v714_v2, %v659_v51  ;;  %v1502_v2 = vrot.slane %v1089_v32, %v4968_v37 }
 0x516   :  { %v1328_v38 = vrot.slane %v1086_v30, %v4973_v57  ;;  %v4974_v6 = vld [vmem:[#allocation32_spill] sm:$0xff]  ;;  %v725_v42 = vadd.f32 %v715_v20, %v660_v14  ;;  %v1473_v20 = vrot.slane %v1089_v32, %v4969_v1  ;;  %v1560_v45 = vrot.slane %v1089_v32, %v4973_v57 }
 0x517   :  { %v1296_v16 = vrot.slane %v1086_v30, %v4974_v6  ;;  %v780_v30 = vsel %vm51_vm0, %v3869_v48, %v3867_v19  ;;  %v789_v35 = vadd.f32 %v779_v36, %v724_v41  ;;  %v879_v19 = vsel %vm189_vm8, %v3883_v10, %v3885_v0 }
 0x518   :  { %v1531_v36 = vrot.slane %v1089_v32, %v4974_v6 }
 0x519   :  { %1336 = vrot.lane.b32.xlu0 %v1328_v38, %s2777_s30  ;;  %1304 = vrot.lane.b32.xlu1 %v1296_v16, %s2777_s30  ;;  %v790_v16 = vadd.f32 %v780_v30, %v725_v42  ;;  %v824_v14 = vadd.f32 %v3875_v49, %v789_v35  ;;  %v1009_v49 = vsel %vm259_vm11, %v3904_v29, %v3906_v23  ;;  %v4977_v42 = vld [vmem:[#allocation4_spill] sm:$0xff] }
 0x51a   :  { %v652_v35 = vsel %vm68_vm2, %v3855_v15, %v3857_v46  ;;  %v4980_v46 = vld [vmem:[#allocation9_spill] sm:$0xff] }
 0x51b   :  { %v825_v48 = vadd.f32 %v816_v17, %v790_v16  ;;  %v889_v18 = vadd.f32 %v3883_v10, %v824_v14  ;;  %v1074_v10 = vsel %vm294_vm12, %v3931_v26, %v3924_v54  ;;  %v591_v16 = vmul.f32 0.0, %v4977_v42 }
 0x51d   :  { %1394 = vrot.lane.b32.xlu0 %v1386_v3, %s2777_s30  ;;  %1365 = vrot.lane.b32.xlu1 %v1357_v21, %s2777_s30  ;;  %v890_v12 = vadd.f32 %v879_v19, %v825_v48  ;;  %v954_v0 = vadd.f32 %v3891_v40, %v889_v18  ;;  %v581_v3 = vsel %vm31_vm7, %v4977_v42, %v4959_v24  ;;  %v4978_v21 = vld [vmem:[#allocation7_spill] sm:$0xff]  ;;  %v4979_v24 = vld [vmem:[#allocation8_spill] sm:$0xff] }
 0x51e   :  { %v651_v17 = vsel %vm68_vm2, %v4978_v21, %v3855_v15  ;;  %v592_v19 = vmul.f32 %v581_v3, %v3685_v59  ;;  %v781_v18 = vsel %vm51_vm0, %v4980_v46, %v3871_v52 }
 0x51f   :  { %v955_v38 = vadd.f32 %v944_v33, %v890_v12  ;;  %v1019_v34 = vadd.f32 %v3904_v29, %v954_v0  ;;  %v662_v33 = vadd.f32 %v651_v17, %v591_v16  ;;  %v782_v12 = vsel %vm51_vm0, %v3871_v52, %v3873_v22 }
 0x520   :  { %v663_v15 = vadd.f32 %v652_v35, %v592_v19  ;;  %v881_v52 = vsel %vm189_vm8, %v3889_v44, %v3887_v11 }
 0x521   :  { %1452 = vrot.lane.b32.xlu0 %v1444_v43, %s2777_s30  ;;  %1423 = vrot.lane.b32.xlu1 %v1415_v61, %s2777_s30  ;;  %v1020_v51 = vadd.f32 %v1009_v49, %v955_v38  ;;  %v4020_v23 = vadd.f32 %v3931_v26, %v1019_v34  ;;  %v716_v43 = vsel %vm103_vm9, %v4979_v24, %v3863_v47 }
 0x522   :  { %v717_v61 = vsel %vm103_vm9, %v3863_v47, %v3865_v28  ;;  %v727_v49 = vadd.f32 %v716_v43, %v662_v33  ;;  %v817_v28 = vsel %vm31_vm7, %v3879_v27, %v3881_v63  ;;  %v946_v63 = vsel %vm224_vm10, %v3900_v7, %v3898_v4 }
 0x523   :  { %v4022_v40 = vadd.f32 %v1074_v10, %v1020_v51  ;;  %v1096_v54 = vrot.slane %v4020_v23, %v4962_v50  ;;  %v1128_v32 = vrot.slane %v4020_v23, %v4961_v25  ;;  %v1160_v30 = vrot.slane %v4020_v23, %v4965_v60 }
 0x524   :  { %v1192_v48 = vrot.slane %v4020_v23, %v4964_v62  ;;  %v728_v0 = vadd.f32 %v717_v61, %v663_v15  ;;  %v1224_v38 = vrot.slane %v4020_v23, %v4969_v1  ;;  %v1256_v51 = vrot.slane %v4020_v23, %v4968_v37 }
 0x525   :  { %1510 = vrot.lane.b32.xlu0 %v1502_v2, %s2777_s30  ;;  %1481 = vrot.lane.b32.xlu1 %v1473_v20, %s2777_s30  ;;  %v1100_v29 = vrot.slane %v4022_v40, %v4962_v50  ;;  %v1132_v26 = vrot.slane %v4022_v40, %v4961_v25  ;;  %v1164_v41 = vrot.slane %v4022_v40, %v4965_v60 }
 0x526   :  { %v1196_v14 = vrot.slane %v4022_v40, %v4964_v62  ;;  %v1228_v47 = vrot.slane %v4022_v40, %v4969_v1  ;;  %v792_v2 = vadd.f32 %v781_v18, %v727_v49  ;;  %v793_v20 = vadd.f32 %v782_v12, %v728_v0 }
 0x527   :  { %v1260_v34 = vrot.slane %v4022_v40, %v4968_v37  ;;  %v1292_v4 = vrot.slane %v4022_v40, %v4974_v6  ;;  %v1320_v42 = vrot.slane %v4020_v23, %v4973_v57 }
 0x528   :  { %v827_v22 = vadd.f32 %v3879_v27, %v792_v2  ;;  %v828_v10 = vadd.f32 %v817_v28, %v793_v20  ;;  %v1011_v27 = vsel %vm259_vm11, %v3915_v9, %v3920_v39 }
 0x529   :  { %1568 = vrot.lane.b32.xlu0 %v1560_v45, %s2777_s30  ;;  %1539 = vrot.lane.b32.xlu1 %v1531_v36, %s2777_s30 }
 0x52a   :  { %v892_v45 = vadd.f32 %v3889_v44, %v827_v22  ;;  %v893_v36 = vadd.f32 %v881_v52, %v828_v10 }
 0x52c   :  { %v957_v11 = vadd.f32 %v3900_v7, %v892_v45  ;;  %v1324_v7 = vrot.slane %v4022_v40, %v4973_v57 }
 0x52d   :  { %1108 = vrot.lane.b32.xlu1 %v1096_v54, %s2777_s30  ;;  %1110 = vrot.lane.b32.xlu0 %v1100_v29, %s2777_s30  ;;  %v1069_v54 = vpop.permute.xlu0 %1068  ;;  %v958_v29 = vadd.f32 %v946_v63, %v893_v36 }
 0x52e   :  { %v1076_v44 = vsel %vm294_vm12, %v1069_v54, %v3947_v13 }
 0x531   :  { %1142 = vrot.lane.b32.xlu1 %v1132_v26, %s2777_s30  ;;  %1140 = vrot.lane.b32.xlu0 %v1128_v32, %s2777_s30  ;;  %v1288_v26 = vrot.slane %v4020_v23, %v4974_v6  ;;  %v1022_v32 = vadd.f32 %v3915_v9, %v957_v11 }
 0x533   :  { %v1087_v39 = vadd.f32 %v1069_v54, %v1022_v32 }
 0x535   :  { %1172 = vrot.lane.b32.xlu1 %v1160_v30, %s2777_s30  ;;  %1174 = vrot.lane.b32.xlu0 %v1164_v41, %s2777_s30  ;;  %v1023_v30 = vadd.f32 %v1011_v27, %v958_v29  ;;  %v1349_v13 = vrot.slane %v1087_v39, %v4962_v50  ;;  %v1378_v21 = vrot.slane %v1087_v39, %v4961_v25 }
 0x536   :  { %v1407_v23 = vrot.slane %v1087_v39, %v4965_v60  ;;  %v1436_v35 = vrot.slane %v1087_v39, %v4964_v62  ;;  %v1465_v16 = vrot.slane %v1087_v39, %v4969_v1  ;;  %v1523_v24 = vrot.slane %v1087_v39, %v4974_v6 }
 0x537   :  { %v1088_v41 = vadd.f32 %v1076_v44, %v1023_v30  ;;  %v1552_v33 = vrot.slane %v1087_v39, %v4973_v57  ;;  %v4173_v44 = vld [vmem:[%s4833_s1 + $0x360] sm:$0xff]  ;;  %v4179_v30 = vld [vmem:[%s4833_s1 + $0x368] sm:$0xff] }
 0x539   :  { %1206 = vrot.lane.b32.xlu1 %v1196_v14, %s2777_s30  ;;  %1204 = vrot.lane.b32.xlu0 %v1192_v48, %s2777_s30  ;;  %v1353_v9 = vrot.slane %v1088_v41, %v4962_v50  ;;  %v1382_v3 = vrot.slane %v1088_v41, %v4961_v25  ;;  %v1411_v40 = vrot.slane %v1088_v41, %v4965_v60 }
 0x53a   :  { %v1440_v17 = vrot.slane %v1088_v41, %v4964_v62  ;;  %v1469_v19 = vrot.slane %v1088_v41, %v4969_v1  ;;  %v1498_v14 = vrot.slane %v1088_v41, %v4968_v37  ;;  %v1494_v48 = vrot.slane %v1087_v39, %v4968_v37  ;;  %v4184_v39 = vld [vmem:[%s4833_s1 + $0x380] sm:$0xff] }
 0x53b   :  { %v1527_v43 = vrot.slane %v1088_v41, %v4974_v6  ;;  %v1556_v61 = vrot.slane %v1088_v41, %v4973_v57 }
 0x53d   :  { %1236 = vrot.lane.b32.xlu1 %v1224_v38, %s2777_s30  ;;  %1238 = vrot.lane.b32.xlu0 %v1228_v47, %s2777_s30 }
 0x541   :  { %1270 = vrot.lane.b32.xlu1 %v1260_v34, %s2777_s30  ;;  %1268 = vrot.lane.b32.xlu0 %v1256_v51, %s2777_s30 }
 0x545   :  { %1300 = vrot.lane.b32.xlu1 %v1288_v26, %s2777_s30  ;;  %1302 = vrot.lane.b32.xlu0 %v1292_v4, %s2777_s30 }
 0x549   :  { %1334 = vrot.lane.b32.xlu1 %v1324_v7, %s2777_s30  ;;  %1332 = vrot.lane.b32.xlu0 %v1320_v42, %s2777_s30  ;;  %v4191_v42 = vld [vmem:[%s4833_s1 + $0x388] sm:$0xff] }
 0x54d   :  { %1361 = vrot.lane.b32.xlu1 %v1349_v13, %s2777_s30  ;;  %1363 = vrot.lane.b32.xlu0 %v1353_v9, %s2777_s30 }
 0x551   :  { %1392 = vrot.lane.b32.xlu1 %v1382_v3, %s2777_s30  ;;  %1390 = vrot.lane.b32.xlu0 %v1378_v21, %s2777_s30  ;;  %v4198_v3 = vld [vmem:[%s4833_s1 + $0x340] sm:$0xff]  ;;  %v4203_v21 = vld [vmem:[%s4833_s1 + $0x348] sm:$0xff] }
 0x555   :  { %1419 = vrot.lane.b32.xlu1 %v1407_v23, %s2777_s30  ;;  %1421 = vrot.lane.b32.xlu0 %v1411_v40, %s2777_s30 }
 0x559   :  { %1450 = vrot.lane.b32.xlu1 %v1440_v17, %s2777_s30  ;;  %1448 = vrot.lane.b32.xlu0 %v1436_v35, %s2777_s30 }
 0x55d   :  { %1477 = vrot.lane.b32.xlu1 %v1465_v16, %s2777_s30  ;;  %1479 = vrot.lane.b32.xlu0 %v1469_v19, %s2777_s30  ;;  %v4210_v16 = vld [vmem:[%s4833_s1 + $0x3a8] sm:$0xff] }
 0x561   :  { %1508 = vrot.lane.b32.xlu1 %v1498_v14, %s2777_s30  ;;  %1506 = vrot.lane.b32.xlu0 %v1494_v48, %s2777_s30  ;;  %v4216_v14 = vld [vmem:[%s4833_s1 + $0x3a0] sm:$0xff] }
 0x565   :  { %1535 = vrot.lane.b32.xlu1 %v1523_v24, %s2777_s30  ;;  %1537 = vrot.lane.b32.xlu0 %v1527_v43, %s2777_s30 }
 0x569   :  { %1566 = vrot.lane.b32.xlu1 %v1556_v61, %s2777_s30  ;;  %1564 = vrot.lane.b32.xlu0 %v1552_v33, %s2777_s30 }
 0x57f   :  { %v1113_v15 = vpop.permute.xlu1 %1112  ;;  %v1145_v46 = vpop.permute.xlu0 %1144 }
 0x583   :  { %v1177_v18 = vpop.permute.xlu1 %1176  ;;  %v1209_v12 = vpop.permute.xlu0 %1208 }
 0x587   :  { %v1241_v49 = vpop.permute.xlu1 %1240  ;;  %v1273_v0 = vpop.permute.xlu0 %1272 }
 0x58b   :  { %v4149_v38 = vpop.permute.xlu1 %1304  ;;  %v4151_v47 = vpop.permute.xlu0 %1336 }
 0x58f   :  { %v4153_v28 = vpop.permute.xlu1 %1365  ;;  %v4155_v2 = vpop.permute.xlu0 %1394 }
 0x593   :  { %v4157_v20 = vpop.permute.xlu1 %1423  ;;  %v4159_v52 = vpop.permute.xlu0 %1452 }
 0x597   :  { %v4161_v22 = vpop.permute.xlu1 %1481  ;;  %v4163_v10 = vpop.permute.xlu0 %1510 }
 0x59b   :  { %v4165_v34 = vpop.permute.xlu1 %1539  ;;  %v4167_v51 = vpop.permute.xlu0 %1568 }
 0x59f   :  { %v1109_v63 = vpop.permute.xlu1 %1108  ;;  %v1111_v45 = vpop.permute.xlu0 %1110 }
 0x5a0   :  { %v1114_v41 = vsel %vm277_vm6, %v1109_v63, %v1111_v45  ;;  %v1115_v7 = vsel %vm277_vm6, %v1111_v45, %v1113_v15  ;;  %v4226_v15 = vld [vmem:[%s4833_s1 + $0x3c0] sm:$0xff] }
 0x5a1   :  { %v1118_v61 = vmul.f32 %v4198_v3, %v1114_v41  ;;  %v1119_v33 = vmul.f32 %v4203_v21, %v1115_v7 }
 0x5a3   :  { %v1143_v36 = vpop.permute.xlu1 %1142  ;;  %v1141_v54 = vpop.permute.xlu0 %1140 }
 0x5a4   :  { %v1147_v4 = vsel %vm277_vm6, %v1143_v36, %v1145_v46  ;;  %v1146_v32 = vsel %vm277_vm6, %v1141_v54, %v1143_v36  ;;  %v4231_v46 = vld [vmem:[%s4833_s1 + $0x3c8] sm:$0xff] }
 0x5a5   :  { %v1150_v23 = vmul.f32 %v4173_v44, %v1146_v32  ;;  %v1151_v35 = vmul.f32 %v4179_v30, %v1147_v4  ;;  %v4246_v4 = vld [vmem:[%s4833_s1 + $0x3e0] sm:$0xff] }
 0x5a7   :  { %v1173_v27 = vpop.permute.xlu1 %1172  ;;  %v1175_v11 = vpop.permute.xlu0 %1174 }
 0x5a8   :  { %v1178_v13 = vsel %vm277_vm6, %v1173_v27, %v1175_v11  ;;  %v1179_v9 = vsel %vm277_vm6, %v1175_v11, %v1177_v18  ;;  %v1152_v27 = vadd.f32 %v1150_v23, %v1118_v61  ;;  %v1153_v11 = vadd.f32 %v1151_v35, %v1119_v33 }
 0x5a9   :  { %v1182_v24 = vmul.f32 %v4184_v39, %v1178_v13  ;;  %v1183_v43 = vmul.f32 %v4191_v42, %v1179_v9  ;;  %v4254_v9 = vld [vmem:[%s4833_s1 + $0x400] sm:$0xff] }
 0x5ab   :  { %v1207_v29 = vpop.permute.xlu1 %1206  ;;  %v1205_v26 = vpop.permute.xlu0 %1204  ;;  %v1184_v7 = vadd.f32 %v1182_v24, %v1152_v27  ;;  %v1185_v13 = vadd.f32 %v1183_v43, %v1153_v11 }
 0x5ac   :  { %v1211_v19 = vsel %vm277_vm6, %v1207_v29, %v1209_v12  ;;  %v1210_v48 = vsel %vm277_vm6, %v1205_v26, %v1207_v29  ;;  %v4240_v29 = vld [vmem:[%s4833_s1 + $0x3e8] sm:$0xff] }
 0x5ad   :  { %v1215_v63 = vmul.f32 %v4210_v16, %v1211_v19  ;;  %v1214_v45 = vmul.f32 %v4216_v14, %v1210_v48 }
 0x5af   :  { %v1237_v40 = vpop.permute.xlu1 %1236  ;;  %v1239_v17 = vpop.permute.xlu0 %1238  ;;  %v1216_v19 = vadd.f32 %v1214_v45, %v1184_v7  ;;  %v1217_v48 = vadd.f32 %v1215_v63, %v1185_v13  ;;  %v4276_v63 = vld [vmem:[%s4833_s1 + $0x420] sm:$0xff] }
 0x5b0   :  { %v1242_v18 = vsel %vm277_vm6, %v1237_v40, %v1239_v17  ;;  %v1243_v12 = vsel %vm277_vm6, %v1239_v17, %v1241_v49 }
 0x5b1   :  { %v1246_v32 = vmul.f32 %v4226_v15, %v1242_v18  ;;  %v1247_v41 = vmul.f32 %v4231_v46, %v1243_v12 }
 0x5b3   :  { %v1271_v36 = vpop.permute.xlu1 %1270  ;;  %v1269_v54 = vpop.permute.xlu0 %1268  ;;  %v1248_v18 = vadd.f32 %v1246_v32, %v1216_v19  ;;  %v1249_v12 = vadd.f32 %v1247_v41, %v1217_v48 }
 0x5b4   :  { %v1275_v26 = vsel %vm277_vm6, %v1271_v36, %v1273_v0  ;;  %v1274_v49 = vsel %vm277_vm6, %v1269_v54, %v1271_v36  ;;  %v4259_v0 = vld [vmem:[%s4833_s1 + $0x408] sm:$0xff] }
 0x5b5   :  { %v1279_v23 = vmul.f32 %v4240_v29, %v1275_v26  ;;  %v1278_v40 = vmul.f32 %v4246_v4, %v1274_v49  ;;  %v4271_v36 = vld [vmem:[%s4833_s1 + $0x428] sm:$0xff] }
 0x5b7   :  { %v1301_v17 = vpop.permute.xlu1 %1300  ;;  %v1303_v35 = vpop.permute.xlu0 %1302  ;;  %v1280_v27 = vadd.f32 %v1278_v40, %v1248_v18  ;;  %v4981_v18 = vld [vmem:[#allocation36_spill] sm:$0xff] }
 0x5b8   :  { %v1306_v24 = vsel %vm277_vm6, %v1301_v17, %v1303_v35  ;;  %v1307_v43 = vsel %vm277_vm6, %v1303_v35, %v4149_v38  ;;  %v1281_v38 = vadd.f32 %v1279_v23, %v1249_v12  ;;  %v4982_v12 = vld [vmem:[#allocation23_spill] sm:$0xff] }
 0x5b9   :  { %v1310_v61 = vmul.f32 %v4254_v9, %v1306_v24  ;;  %v1311_v33 = vmul.f32 %v4259_v0, %v1307_v43 }
 0x5bb   :  { %v1335_v45 = vpop.permute.xlu1 %1334  ;;  %v1333_v54 = vpop.permute.xlu0 %1332  ;;  %v1312_v41 = vadd.f32 %v1310_v61, %v1280_v27  ;;  %v1313_v7 = vadd.f32 %v1311_v33, %v1281_v38 }
 0x5bc   :  { %v1339_v11 = vsel %vm277_vm6, %v1335_v45, %v4151_v47  ;;  %v1338_v26 = vsel %vm277_vm6, %v1333_v54, %v1335_v45  ;;  %v1652_v45 = vsel %vm51_vm0, %v4982_v12, %v4981_v18 }
 0x5bd   :  { %v1343_v49 = vmul.f32 %v4271_v36, %v1339_v11  ;;  %v1342_v32 = vmul.f32 %v4276_v63, %v1338_v26 }
 0x5bf   :  { %v1362_v13 = vpop.permute.xlu1 %1361  ;;  %v1344_v17 = vadd.f32 %v1342_v32, %v1312_v41  ;;  %v1364_v35 = vpop.permute.xlu0 %1363  ;;  %v1345_v19 = vadd.f32 %v1343_v49, %v1313_v7 }
 0x5c0   :  { %v1367_v26 = vsel %vm277_vm6, %v1362_v13, %v1364_v35  ;;  %v1368_v49 = vsel %vm277_vm6, %v1364_v35, %v4153_v28 }
 0x5c1   :  { %v1578_v48 = vadd.f32 %v1344_v17, %v3657_v8  ;;  %v1579_v40 = vadd.f32 %v1345_v19, %v3659_v5  ;;  %v1371_v13 = vmul.f32 %v4198_v3, %v1367_v26  ;;  %v1372_v28 = vmul.f32 %v4203_v21, %v1368_v49 }
 0x5c3   :  { %v4285_v23 = vmax.f32 %v1578_v48, 0.0  ;;  %v1393_v24 = vpop.permute.xlu1 %1392  ;;  %v4287_v47 = vmax.f32 %v1579_v40, 0.0  ;;  %v1391_v43 = vpop.permute.xlu0 %1390 }
 0x5c4   :  { %v1397_v38 = vsel %vm277_vm6, %v1393_v24, %v4155_v2  ;;  %v1396_v11 = vsel %vm277_vm6, %v1391_v43, %v1393_v24 }
 0x5c5   :  { %v1662_v61 = vmul.f32 %v4981_v18, %v4287_v47  ;;  %v1661_v33 = vmul.f32 %v1652_v45, %v4285_v23  ;;  %v1401_v7 = vmul.f32 %v4179_v30, %v1397_v38  ;;  %v1400_v17 = vmul.f32 %v4173_v44, %v1396_v11 }
 0x5c7   :  { %v1420_v54 = vpop.permute.xlu1 %1419  ;;  %1676 = vrot.lane.b32.xlu1 %v1662_v61, %s2773_s8  ;;  %1674 = vrot.lane.b32.xlu0 %v1661_v33, %s2773_s8  ;;  %v1422_v5 = vpop.permute.xlu0 %1421  ;;  %v1403_v30 = vadd.f32 %v1401_v7, %v1372_v28  ;;  %v1402_v43 = vadd.f32 %v1400_v17, %v1371_v13  ;;  %v4983_v28 = vld [vmem:[#allocation37_spill] sm:$0xff] }
 0x5c8   :  { %v1425_v32 = vsel %vm277_vm6, %v1420_v54, %v1422_v5  ;;  %v1426_v41 = vsel %vm277_vm6, %v1422_v5, %v4157_v20 }
 0x5c9   :  { %v1429_v35 = vmul.f32 %v4184_v39, %v1425_v32  ;;  %v1430_v24 = vmul.f32 %v4191_v42, %v1426_v41 }
 0x5cb   :  { %v1451_v8 = vpop.permute.xlu1 %1450  ;;  %v1449_v27 = vpop.permute.xlu0 %1448  ;;  %v1431_v21 = vadd.f32 %v1429_v35, %v1402_v43  ;;  %v1432_v42 = vadd.f32 %v1430_v24, %v1403_v30  ;;  %v4987_v30 = vld [vmem:[#allocation43_spill] sm:$0xff]  ;;  %v4988_v43 = vld [vmem:[#allocation42_spill] sm:$0xff] }
 0x5cc   :  { %v1455_v2 = vsel %vm277_vm6, %v1451_v8, %v4159_v52  ;;  %v1454_v40 = vsel %vm277_vm6, %v1449_v27, %v1451_v8 }
 0x5cd   :  { %v1459_v18 = vmul.f32 %v4210_v16, %v1455_v2  ;;  %v1458_v52 = vmul.f32 %v4216_v14, %v1454_v40 }
 0x5cf   :  { %v1478_v19 = vpop.permute.xlu1 %1477  ;;  %v1480_v48 = vpop.permute.xlu0 %1479  ;;  %v1460_v54 = vadd.f32 %v1458_v52, %v1431_v21 }
 0x5d0   :  { %v1483_v20 = vsel %vm277_vm6, %v1478_v19, %v1480_v48  ;;  %v1484_v44 = vsel %vm277_vm6, %v1480_v48, %v4161_v22  ;;  %v1461_v22 = vadd.f32 %v1459_v18, %v1432_v42  ;;  %v1718_v18 = vsel %vm86_vm1, %v4988_v43, %v4987_v30 }
 0x5d1   :  { %v1487_v61 = vmul.f32 %v4226_v15, %v1483_v20  ;;  %v1488_v33 = vmul.f32 %v4231_v46, %v1484_v44 }
 0x5d3   :  { %v1509_v12 = vpop.permute.xlu1 %1508  ;;  %v1507_v45 = vpop.permute.xlu0 %1506  ;;  %v1489_v38 = vadd.f32 %v1487_v61, %v1460_v54  ;;  %v1490_v11 = vadd.f32 %v1488_v33, %v1461_v22  ;;  %v4991_v61 = vld [vmem:[#allocation45_spill] sm:$0xff] }
 0x5d4   :  { %v1513_v3 = vsel %vm277_vm6, %v1509_v12, %v4163_v10  ;;  %v1512_v39 = vsel %vm277_vm6, %v1507_v45, %v1509_v12  ;;  %v4989_v45 = vld [vmem:[#allocation44_spill] sm:$0xff]  ;;  %v4992_v33 = vld [vmem:[#allocation53_spill] sm:$0xff] }
 0x5d5   :  { %v1517_v5 = vmul.f32 %v4240_v29, %v1513_v3  ;;  %v1516_v16 = vmul.f32 %v4246_v4, %v1512_v39  ;;  %v4990_v3 = vld [vmem:[#allocation52_spill] sm:$0xff]  ;;  %v1792_v42 = vmul.f32 %v4989_v45, %v4287_v47  ;;  %v1783_v22 = vsel %vm68_vm2, %v4992_v33, %v4991_v61 }
 0x5d6   :  { %v1782_v39 = vsel %vm68_vm2, %v4990_v3, %v4989_v45 }
 0x5d7   :  { %v1536_v14 = vpop.permute.xlu1 %1535  ;;  %v1538_v8 = vpop.permute.xlu0 %1537  ;;  %v1519_v46 = vadd.f32 %v1517_v5, %v1490_v11  ;;  %v1518_v49 = vadd.f32 %v1516_v16, %v1489_v38  ;;  %v1791_v21 = vmul.f32 %v1782_v39, %v4285_v23  ;;  %v2722_v16 = vld [vmem:[%s4833_s1 + $0x4c8] sm:$0xff]  ;;  %v2723_v38 = vld [vmem:[%s4833_s1 + $0x4d0] sm:$0xff] }
 0x5d8   :  { %v1541_v27 = vsel %vm277_vm6, %v1536_v14, %v1538_v8  ;;  %v1542_v10 = vsel %vm277_vm6, %v1538_v8, %v4165_v34  ;;  %v2721_v14 = vld [vmem:[%s4833_s1 + $0x4c0] sm:$0xff]  ;;  %v1836_v8 = vmul.f32 %v2722_v16, %v4287_v47  ;;  %v5007_v16 = vld [vmem:[#allocation38_spill] sm:$0xff] }
 0x5d9   :  { %v1545_v26 = vmul.f32 %v4254_v9, %v1541_v27  ;;  %v1546_v15 = vmul.f32 %v4259_v0, %v1542_v10  ;;  %v1835_v27 = vmul.f32 %v2721_v14, %v4285_v23  ;;  %v2724_v10 = vld [vmem:[%s4833_s1 + $0x4d8] sm:$0xff] }
 0x5db   :  { %v1567_v32 = vpop.permute.xlu1 %1566  ;;  %v1565_v41 = vpop.permute.xlu0 %1564  ;;  %v1547_v7 = vadd.f32 %v1545_v26, %v1518_v49  ;;  %v1548_v17 = vadd.f32 %v1546_v15, %v1519_v46  ;;  %v4993_v15 = vld [vmem:[#allocation46_spill] sm:$0xff] }
 0x5dc   :  { %v1571_v29 = vsel %vm277_vm6, %v1567_v32, %v4167_v51  ;;  %v1570_v4 = vsel %vm277_vm6, %v1565_v41, %v1567_v32  ;;  %v4984_v51 = vld [vmem:[#allocation24_spill] sm:$0xff]  ;;  %v1882_v46 = vsel %vm172_vm3, %v3776_v31, %v4993_v15  ;;  %v1890_v32 = vmul.f32 %v3776_v31, %v4285_v23  ;;  %v4994_v41 = vld [vmem:[#allocation47_spill] sm:$0xff] }
 0x5dd   :  { %v1575_v19 = vmul.f32 %v4271_v36, %v1571_v29  ;;  %v1574_v34 = vmul.f32 %v4276_v63, %v1570_v4  ;;  %v1653_v35 = vsel %vm51_vm0, %v4984_v51, %v4983_v28  ;;  %v4986_v63 = vld [vmem:[#allocation40_spill] sm:$0xff]  ;;  %v1891_v49 = vmul.f32 %v1882_v46, %v4287_v47  ;;  %v5008_v46 = vld [vmem:[#allocation35_spill] sm:$0xff] }
 0x5de   :  { %v1883_v29 = vsel %vm172_vm3, %v3789_v55, %v4994_v41  ;;  %v5010_v41 = vld [vmem:[#allocation39_spill] sm:$0xff] }
 0x5df   :  { %v1577_v48 = vadd.f32 %v1575_v19, %v1548_v17  ;;  %v1576_v2 = vadd.f32 %v1574_v34, %v1547_v7  ;;  %v4995_v17 = vld [vmem:[#allocation48_spill] sm:$0xff]  ;;  %v1955_v34 = vmul.f32 %v3804_v58, %v4285_v23 }
 0x5e0   :  { %v1947_v31 = vsel %vm207_vm4, %v3804_v58, %v4995_v17 }
 0x5e1   :  { %v1581_v9 = vadd.f32 %v1577_v48, %v3687_v53  ;;  %v1580_v0 = vadd.f32 %v1576_v2, %v3685_v59  ;;  %v4985_v53 = vld [vmem:[#allocation41_spill] sm:$0xff]  ;;  %v1956_v19 = vmul.f32 %v1947_v31, %v4287_v47 }
 0x5e2   :  { %v1717_v59 = vsel %vm86_vm1, %v4986_v63, %v4985_v53  ;;  %v1727_v44 = vmul.f32 %v4985_v53, %v4287_v47 }
 0x5e3   :  { %v4339_v40 = vmax.f32 %v1581_v9, 0.0  ;;  %v4341_v13 = vmax.f32 %v1580_v0, 0.0  ;;  %v1726_v20 = vmul.f32 %v1717_v59, %v4285_v23  ;;  %v4997_v0 = vld [vmem:[#allocation51_spill] sm:$0xff] }
 0x5e4   :  { %v5001_v59 = vld [vmem:[#allocation55_spill] sm:$0xff] }
 0x5e5   :  { %v1665_v24 = vmul.f32 %v4983_v28, %v4339_v40  ;;  %v1664_v36 = vmul.f32 %v1653_v35, %v4341_v13  ;;  %v1730_v52 = vmul.f32 %v4987_v30, %v4339_v40  ;;  %v1729_v12 = vmul.f32 %v1718_v18, %v4341_v13  ;;  %v4998_v28 = vld [vmem:[#allocation19_spill] sm:$0xff]  ;;  %v5003_v18 = vld [vmem:[#allocation56_spill] sm:$0xff] }
 0x5e6   :  { %v1795_v54 = vmul.f32 %v4991_v61, %v4339_v40  ;;  %v1794_v5 = vmul.f32 %v1783_v22, %v4341_v13  ;;  %v1838_v11 = vmul.f32 %v2724_v10, %v4339_v40  ;;  %v1837_v26 = vmul.f32 %v2723_v38, %v4341_v13  ;;  %v5005_v22 = vld [vmem:[#allocation34_spill] sm:$0xff] }
 0x5e7   :  { %1682 = vrot.lane.b32.xlu0 %v1665_v24, %s2773_s8  ;;  %1680 = vrot.lane.b32.xlu1 %v1664_v36, %s2773_s8  ;;  %v1893_v4 = vmul.f32 %v3789_v55, %v4341_v13  ;;  %v1894_v7 = vmul.f32 %v1883_v29, %v4339_v40  ;;  %v4996_v55 = vld [vmem:[#allocation49_spill] sm:$0xff]  ;;  %v1958_v2 = vmul.f32 %v3817_v56, %v4341_v13 }
 0x5e8   :  { %v1948_v48 = vsel %vm207_vm4, %v3817_v56, %v4996_v55  ;;  %v2012_v58 = vsel %vm242_vm5, %v4998_v28, %v4997_v0  ;;  %v2020_v35 = vmul.f32 %v4998_v28, %v4285_v23  ;;  %v4999_v56 = vld [vmem:[#allocation54_spill] sm:$0xff]  ;;  %v5000_v24 = vld [vmem:[#allocation57_spill] sm:$0xff]  ;;  %v5012_v28 = vld [vmem:[#allocation59_spill] sm:$0xff] }
 0x5e9   :  { %v1959_v9 = vmul.f32 %v1948_v48, %v4339_v40  ;;  %v2021_v51 = vmul.f32 %v2012_v58, %v4287_v47  ;;  %v2013_v36 = vsel %vm242_vm5, %v5000_v24, %v4999_v56  ;;  %v2023_v53 = vmul.f32 %v5000_v24, %v4341_v13 }
 0x5ea   :  { %v2024_v63 = vmul.f32 %v2013_v36, %v4339_v40 }
 0x5eb   :  { %1739 = vrot.lane.b32.xlu0 %v1726_v20, %s2778_s20  ;;  %1741 = vrot.lane.b32.xlu1 %v1727_v44, %s2778_s20  ;;  %v5002_v20 = vld [vmem:[#allocation58_spill] sm:$0xff] }
 0x5ec   :  { %v2077_v44 = vsel %vm277_vm6, %v5002_v20, %v5001_v59  ;;  %v2085_v43 = vmul.f32 %v5002_v20, %v4285_v23  ;;  %v5013_v59 = vld [vmem:[#allocation61_spill] sm:$0xff] }
 0x5ed   :  { %v2086_v30 = vmul.f32 %v2077_v44, %v4287_v47 }
 0x5ef   :  { %1747 = vrot.lane.b32.xlu0 %v1730_v52, %s2778_s20  ;;  %1745 = vrot.lane.b32.xlu1 %v1729_v12, %s2778_s20  ;;  %v5004_v52 = vld [vmem:[#allocation60_spill] sm:$0xff] }
 0x5f0   :  { %v2078_v12 = vsel %vm277_vm6, %v5004_v52, %v5003_v18  ;;  %v2088_v45 = vmul.f32 %v5004_v52, %v4341_v13 }
 0x5f1   :  { %v2089_v3 = vmul.f32 %v2078_v12, %v4339_v40 }
 0x5f3   :  { %1804 = vrot.lane.b32.xlu0 %v1791_v21, %s2770_s13  ;;  %1806 = vrot.lane.b32.xlu1 %v1792_v42, %s2770_s13 }
 0x5f7   :  { %1812 = vrot.lane.b32.xlu0 %v1795_v54, %s2770_s13  ;;  %1810 = vrot.lane.b32.xlu1 %v1794_v5, %s2770_s13  ;;  %v5006_v54 = vld [vmem:[#allocation21_spill] sm:$0xff] }
 0x5f8   :  { %v1615_v5 = vsel %vm31_vm7, %v5006_v54, %v5005_v22 }
 0x5f9   :  { %v1624_v10 = vmul.f32 %v1615_v5, %v4285_v23 }
 0x5fb   :  { %1845 = vrot.lane.b32.xlu0 %v1836_v8, %s2771_s14  ;;  %1843 = vrot.lane.b32.xlu1 %v1835_v27, %s2771_s14  ;;  %v1623_v27 = vmul.f32 0.0, %v5006_v54 }
 0x5ff   :  { %1849 = vrot.lane.b32.xlu0 %v1838_v11, %s2771_s14  ;;  %1847 = vrot.lane.b32.xlu1 %v1837_v26, %s2771_s14 }
 0x603   :  { %1904 = vrot.lane.b32.xlu0 %v1891_v49, %s2779_s21  ;;  %1902 = vrot.lane.b32.xlu1 %v1890_v32, %s2779_s21  ;;  %v5009_v49 = vld [vmem:[#allocation22_spill] sm:$0xff] }
 0x604   :  { %v1616_v32 = vsel %vm31_vm7, %v5009_v49, %v5008_v46  ;;  %v1626_v31 = vmul.f32 0.0, %v5009_v49 }
 0x607   :  { %1908 = vrot.lane.b32.xlu0 %v1893_v4, %s2779_s21  ;;  %1910 = vrot.lane.b32.xlu1 %v1894_v7, %s2779_s21  ;;  %v5011_v4 = vld [vmem:[#allocation50_spill] sm:$0xff] }
 0x60b   :  { %1969 = vrot.lane.b32.xlu0 %v1956_v19, %s2780_s22  ;;  %1967 = vrot.lane.b32.xlu1 %v1955_v34, %s2780_s22  ;;  %v1627_v19 = vmul.f32 %v1616_v32, %v4341_v13 }
 0x60f   :  { %1973 = vrot.lane.b32.xlu0 %v1958_v2, %s2780_s22  ;;  %1975 = vrot.lane.b32.xlu1 %v1959_v9, %s2780_s22 }
 0x613   :  { %2034 = vrot.lane.b32.xlu0 %v2021_v51, %s2781_s23  ;;  %2032 = vrot.lane.b32.xlu1 %v2020_v35, %s2781_s23 }
 0x617   :  { %2038 = vrot.lane.b32.xlu0 %v2023_v53, %s2781_s23  ;;  %2040 = vrot.lane.b32.xlu1 %v2024_v63, %s2781_s23 }
 0x61b   :  { %2099 = vrot.lane.b32.xlu0 %v2086_v30, %s2782_s26  ;;  %2097 = vrot.lane.b32.xlu1 %v2085_v43, %s2782_s26 }
 0x61f   :  { %2103 = vrot.lane.b32.xlu0 %v2088_v45, %s2782_s26  ;;  %2105 = vrot.lane.b32.xlu1 %v2089_v3, %s2782_s26 }
 0x639   :  { %v1677_v39 = vpop.permute.xlu1 %1676  ;;  %v1675_v21 = vpop.permute.xlu0 %1674 }
 0x63a   :  { %v1685_v42 = vsel %vm68_vm2, %v1675_v21, %v1677_v39  ;;  %v1684_v14 = vsel %vm68_vm2, %v5007_v16, %v1675_v21 }
 0x63b   :  { %v1694_v38 = vadd.f32 %v1684_v14, %v1623_v27  ;;  %v1695_v11 = vadd.f32 %v1685_v42, %v1624_v10 }
 0x659   :  { %v1681_v61 = vpop.permute.xlu1 %1680  ;;  %v1683_v33 = vpop.permute.xlu0 %1682 }
 0x65a   :  { %v1687_v8 = vsel %vm68_vm2, %v1681_v61, %v1683_v33  ;;  %v1686_v29 = vsel %vm68_vm2, %v5010_v41, %v1681_v61 }
 0x65b   :  { %v1697_v48 = vadd.f32 %v1686_v29, %v1626_v31  ;;  %v1698_v2 = vadd.f32 %v1687_v8, %v1627_v19  ;;  %v1625_v8 = vmul.f32 %v5005_v22, %v4287_v47 }
 0x65d   :  { %v1742_v26 = vpop.permute.xlu1 %1741  ;;  %v1740_v15 = vpop.permute.xlu0 %1739  ;;  %v1696_v27 = vadd.f32 %v1677_v39, %v1625_v8  ;;  %v5015_v39 = vld [vmem:[#allocation65_spill] sm:$0xff] }
 0x65e   :  { %v1749_v7 = vsel %vm103_vm9, %v5011_v4, %v1740_v15  ;;  %v1750_v17 = vsel %vm103_vm9, %v1740_v15, %v1742_v26  ;;  %v5014_v4 = vld [vmem:[#allocation64_spill] sm:$0xff] }
 0x65f   :  { %v4486_v34 = vadd.f32 %v1749_v7, %v1694_v38  ;;  %v4488_v55 = vadd.f32 %v1750_v17, %v1695_v11  ;;  %v1628_v11 = vmul.f32 %v5008_v46, %v4339_v40  ;;  %v1761_v15 = vadd.f32 %v1742_v26, %v1696_v27 }
 0x661   :  { %v1746_v9 = vpop.permute.xlu1 %1745  ;;  %v1748_v0 = vpop.permute.xlu0 %1747  ;;  %v1699_v49 = vadd.f32 %v1683_v33, %v1628_v11  ;;  %v5016_v33 = vld [vmem:[#allocation63_spill] sm:$0xff] }
 0x662   :  { %v1751_v58 = vsel %vm103_vm9, %v5012_v28, %v1746_v9  ;;  %v1752_v51 = vsel %vm103_vm9, %v1746_v9, %v1748_v0  ;;  %v5017_v9 = vld [vmem:[#allocation67_spill] sm:$0xff] }
 0x663   :  { %v1762_v35 = vadd.f32 %v1751_v58, %v1697_v48  ;;  %v1763_v56 = vadd.f32 %v1752_v51, %v1698_v2  ;;  %v1764_v17 = vadd.f32 %v1748_v0, %v1699_v49  ;;  %v5018_v0 = vld [vmem:[#allocation66_spill] sm:$0xff] }
 0x665   :  { %v4493_v24 = vpop.permute.xlu1 %1806  ;;  %v4495_v36 = vpop.permute.xlu0 %1804 }
 0x666   :  { %v1826_v32 = vadd.f32 %v4493_v24, %v1761_v15 }
 0x669   :  { %v1811_v53 = vpop.permute.xlu1 %1810  ;;  %v1813_v63 = vpop.permute.xlu0 %1812 }
 0x66a   :  { %v1816_v20 = vsel %vm51_vm0, %v5013_v59, %v1811_v53  ;;  %v1817_v44 = vsel %vm51_vm0, %v1811_v53, %v1813_v63  ;;  %v1829_v19 = vadd.f32 %v1813_v63, %v1764_v17 }
 0x66b   :  { %v4500_v30 = vadd.f32 %v1816_v20, %v1762_v35  ;;  %v1828_v43 = vadd.f32 %v1817_v44, %v1763_v56  ;;  %v5019_v20 = vld [vmem:[#allocation68_spill] sm:$0xff] }
 0x66d   :  { %v4502_v18 = vpop.permute.xlu1 %1843  ;;  %v1846_v52 = vpop.permute.xlu0 %1845 }
 0x66e   :  { %v1861_v22 = vadd.f32 %v1846_v52, %v1826_v32  ;;  %v5021_v32 = vld [vmem:[#allocation70_spill] sm:$0xff] }
 0x671   :  { %v4504_v12 = vpop.permute.xlu1 %1847  ;;  %v1850_v45 = vpop.permute.xlu0 %1849 }
 0x672   :  { %v1852_v3 = vsel %vm31_vm7, %v4504_v12, %v1850_v45  ;;  %v1864_v58 = vadd.f32 %v1850_v45, %v1829_v19  ;;  %v1815_v19 = vsel %vm51_vm0, %v4495_v36, %v4493_v24 }
 0x673   :  { %v4508_v21 = vadd.f32 %v1852_v3, %v1828_v43  ;;  %v5020_v43 = vld [vmem:[#allocation69_spill] sm:$0xff] }
 0x675   :  { %v4510_v42 = vpop.permute.xlu1 %1902  ;;  %v1905_v61 = vpop.permute.xlu0 %1904 }
 0x676   :  { %v1915_v7 = vsel %vm189_vm8, %v1905_v61, %v5014_v4  ;;  %v1914_v24 = vsel %vm189_vm8, %v4510_v42, %v1905_v61 }
 0x677   :  { %v1926_v48 = vadd.f32 %v1915_v7, %v1861_v22 }
 0x679   :  { %v4512_v54 = vpop.permute.xlu1 %1910  ;;  %v4514_v5 = vpop.permute.xlu0 %1908 }
 0x67a   :  { %v1917_v26 = vsel %vm189_vm8, %v4512_v54, %v5016_v33 }
 0x67b   :  { %v1929_v56 = vadd.f32 %v1917_v26, %v1864_v58  ;;  %v1851_v26 = vsel %vm31_vm7, %v4502_v18, %v1846_v52 }
 0x67d   :  { %v4516_v16 = vpop.permute.xlu1 %1967  ;;  %v1970_v14 = vpop.permute.xlu0 %1969 }
 0x67e   :  { %v1980_v31 = vsel %vm224_vm10, %v1970_v14, %v5015_v39 }
 0x67f   :  { %v1991_v51 = vadd.f32 %v1980_v31, %v1926_v48 }
 0x681   :  { %v4520_v10 = vpop.permute.xlu1 %1975  ;;  %v4522_v38 = vpop.permute.xlu0 %1973 }
 0x682   :  { %v1982_v35 = vsel %vm224_vm10, %v4520_v10, %v5018_v0 }
 0x683   :  { %v1994_v8 = vadd.f32 %v1982_v35, %v1929_v56 }
 0x685   :  { %v4527_v41 = vpop.permute.xlu1 %2032  ;;  %v2035_v29 = vpop.permute.xlu0 %2034 }
 0x686   :  { %v2045_v28 = vsel %vm259_vm11, %v2035_v29, %v5017_v9  ;;  %v1825_v9 = vadd.f32 %v1815_v19, %v4488_v55  ;;  %v1979_v55 = vsel %vm224_vm10, %v4516_v16, %v1970_v14 }
 0x687   :  { %v2056_v53 = vadd.f32 %v2045_v28, %v1991_v51  ;;  %v5022_v28 = vld [vmem:[#allocation62_spill] sm:$0xff] }
 0x688   :  { %v1814_v58 = vsel %vm51_vm0, %v5022_v28, %v4495_v36  ;;  %v1860_v51 = vadd.f32 %v1851_v26, %v1825_v9  ;;  %v2044_v36 = vsel %vm259_vm11, %v4527_v41, %v2035_v29 }
 0x689   :  { %v4533_v2 = vpop.permute.xlu1 %2040  ;;  %v4535_v46 = vpop.permute.xlu0 %2038  ;;  %v1824_v52 = vadd.f32 %v1814_v58, %v4486_v34 }
 0x68a   :  { %v2047_v44 = vsel %vm259_vm11, %v4533_v2, %v5019_v20  ;;  %v1925_v56 = vadd.f32 %v1914_v24, %v1860_v51 }
 0x68b   :  { %v2059_v11 = vadd.f32 %v2047_v44, %v1994_v8  ;;  %v1859_v61 = vadd.f32 %v4502_v18, %v1824_v52 }
 0x68d   :  { %v2098_v63 = vpop.permute.xlu1 %2097  ;;  %v2100_v59 = vpop.permute.xlu0 %2099  ;;  %v1924_v34 = vadd.f32 %v4510_v42, %v1859_v61  ;;  %v1862_v42 = vadd.f32 %v4504_v12, %v4500_v30 }
 0x68e   :  { %v2110_v3 = vsel %vm294_vm12, %v2100_v59, %v5020_v43  ;;  %v2109_v14 = vsel %vm294_vm12, %v2098_v63, %v2100_v59 }
 0x68f   :  { %v2121_v27 = vadd.f32 %v2110_v3, %v2056_v53  ;;  %v1990_v53 = vadd.f32 %v1979_v55, %v1925_v56  ;;  %v1989_v3 = vadd.f32 %v4516_v16, %v1924_v34 }
 0x691   :  { %v4550_v45 = vpop.permute.xlu1 %2105  ;;  %v2171_v15 = vrot.slane %v2121_v27, %v4961_v25  ;;  %v2139_v49 = vrot.slane %v2121_v27, %v4962_v50  ;;  %v2203_v22 = vrot.slane %v2121_v27, %v4965_v60  ;;  %v2235_v33 = vrot.slane %v2121_v27, %v4964_v62 }
 0x692   :  { %v2112_v4 = vsel %vm294_vm12, %v4550_v45, %v5021_v32  ;;  %v2267_v35 = vrot.slane %v2121_v27, %v4969_v1  ;;  %v2299_v44 = vrot.slane %v2121_v27, %v4968_v37  ;;  %v2055_v43 = vadd.f32 %v2044_v36, %v1990_v53 }
 0x693   :  { %v4557_v7 = vadd.f32 %v2112_v4, %v2059_v11  ;;  %2179 = vrot.lane.b32.xlu0 %v2171_v15, %s2777_s30  ;;  %2147 = vrot.lane.b32.xlu1 %v2139_v49, %s2777_s30  ;;  %v2331_v8 = vrot.slane %v2121_v27, %v4974_v6  ;;  %v2054_v11 = vadd.f32 %v4527_v41, %v1989_v3 }
 0x694   :  { %v4607_v29 = vadd.f32 %v2109_v14, %v2055_v43  ;;  %v2363_v16 = vrot.slane %v2121_v27, %v4973_v57  ;;  %v1927_v49 = vadd.f32 %v4514_v5, %v1862_v42  ;;  %v1916_v41 = vsel %vm189_vm8, %v4514_v5, %v4512_v54  ;;  %v2104_v27 = vpop.permute.xlu0 %2103 }
 0x695   :  { %v2392_v17 = vrot.slane %v4557_v7, %v4962_v50  ;;  %v2450_v39 = vrot.slane %v4557_v7, %v4965_v60  ;;  %v2421_v31 = vrot.slane %v4557_v7, %v4961_v25  ;;  %v2479_v48 = vrot.slane %v4557_v7, %v4964_v62 }
 0x696   :  { %v2508_v0 = vrot.slane %v4557_v7, %v4969_v1  ;;  %v2537_v20 = vrot.slane %v4557_v7, %v4968_v37  ;;  %v2566_v18 = vrot.slane %v4557_v7, %v4974_v6  ;;  %v4617_v59 = vadd.f32 %v2098_v63, %v2054_v11 }
 0x697   :  { %2400 = vrot.lane.b32.xlu0 %v2392_v17, %s2777_s30  ;;  %2211 = vrot.lane.b32.xlu1 %v2203_v22, %s2777_s30  ;;  %v2135_v15 = vrot.slane %v4607_v29, %v4962_v50  ;;  %v1992_v32 = vadd.f32 %v4522_v38, %v1927_v49  ;;  %v1981_v63 = vsel %vm224_vm10, %v4522_v38, %v4520_v10 }
 0x698   :  { %v2131_v30 = vrot.slane %v4617_v59, %v4962_v50  ;;  %v2163_v12 = vrot.slane %v4617_v59, %v4961_v25  ;;  %v1928_v4 = vadd.f32 %v1916_v41, %v4508_v21  ;;  %v2046_v54 = vsel %vm259_vm11, %v4535_v46, %v4533_v2 }
 0x699   :  { %v2057_v17 = vadd.f32 %v4535_v46, %v1992_v32  ;;  %v2199_v10 = vrot.slane %v4607_v29, %v4965_v60  ;;  %v2111_v21 = vsel %vm294_vm12, %v2104_v27, %v4550_v45  ;;  %v2195_v2 = vrot.slane %v4617_v59, %v4965_v60 }
 0x69a   :  { %v1993_v5 = vadd.f32 %v1981_v63, %v1928_v4  ;;  %v2231_v26 = vrot.slane %v4607_v29, %v4964_v62  ;;  %v2227_v28 = vrot.slane %v4617_v59, %v4964_v62  ;;  %v2259_v24 = vrot.slane %v4617_v59, %v4969_v1  ;;  %v2744_v63 = vld [vmem:[%s4833_s1 + $0x588] sm:$0xff] }
 0x69b   :  { %2458 = vrot.lane.b32.xlu0 %v2450_v39, %s2777_s30  ;;  %2429 = vrot.lane.b32.xlu1 %v2421_v31, %s2777_s30  ;;  %v2122_v22 = vadd.f32 %v2104_v27, %v2057_v17  ;;  %v2167_v39 = vrot.slane %v4607_v29, %v4961_v25  ;;  %v2295_v51 = vrot.slane %v4607_v29, %v4968_v37 }
 0x69c   :  { %v2058_v38 = vadd.f32 %v2046_v54, %v1993_v5  ;;  %v2327_v55 = vrot.slane %v4607_v29, %v4974_v6  ;;  %v2323_v56 = vrot.slane %v4617_v59, %v4974_v6  ;;  %v2359_v36 = vrot.slane %v4607_v29, %v4973_v57  ;;  %v2746_v54 = vld [vmem:[%s4833_s1 + $0x5a8] sm:$0xff] }
 0x69d   :  { %v2384_v46 = vrot.slane %v2122_v22, %v4962_v50  ;;  %v2442_v45 = vrot.slane %v2122_v22, %v4965_v60  ;;  %v2355_v53 = vrot.slane %v4617_v59, %v4973_v57 }
 0x69e   :  { %v2123_v31 = vadd.f32 %v2111_v21, %v2058_v38 }
 0x69f   :  { %2487 = vrot.lane.b32.xlu0 %v2479_v48, %s2777_s30  ;;  %2243 = vrot.lane.b32.xlu1 %v2235_v33, %s2777_s30  ;;  %v2413_v33 = vrot.slane %v2122_v22, %v4961_v25 }
 0x6a0   :  { %v2417_v19 = vrot.slane %v2123_v31, %v4961_v25  ;;  %v2388_v48 = vrot.slane %v2123_v31, %v4962_v50  ;;  %v2446_v9 = vrot.slane %v2123_v31, %v4965_v60  ;;  %v2471_v50 = vrot.slane %v2122_v22, %v4964_v62 }
 0x6a1   :  { %v2263_v25 = vrot.slane %v4607_v29, %v4969_v1  ;;  %v2475_v58 = vrot.slane %v2123_v31, %v4964_v62  ;;  %v2500_v60 = vrot.slane %v2122_v22, %v4969_v1  ;;  %v2529_v62 = vrot.slane %v2122_v22, %v4968_v37 }
 0x6a2   :  { %v2533_v52 = vrot.slane %v2123_v31, %v4968_v37  ;;  %v2562_v61 = vrot.slane %v2123_v31, %v4974_v6 }
 0x6a3   :  { %2516 = vrot.lane.b32.xlu0 %v2508_v0, %s2777_s30  ;;  %2275 = vrot.lane.b32.xlu1 %v2267_v35, %s2777_s30  ;;  %v2504_v0 = vrot.slane %v2123_v31, %v4969_v1  ;;  %v2291_v35 = vrot.slane %v4617_v59, %v4968_v37  ;;  %v2558_v1 = vrot.slane %v2122_v22, %v4974_v6 }
 0x6a4   :  { %v2587_v37 = vrot.slane %v2122_v22, %v4973_v57 }
 0x6a7   :  { %2545 = vrot.lane.b32.xlu0 %v2537_v20, %s2777_s30  ;;  %2307 = vrot.lane.b32.xlu1 %v2299_v44, %s2777_s30  ;;  %v2595_v20 = vrot.slane %v4557_v7, %v4973_v57  ;;  %v2591_v44 = vrot.slane %v2123_v31, %v4973_v57 }
 0x6ab   :  { %2574 = vrot.lane.b32.xlu0 %v2566_v18, %s2777_s30  ;;  %2339 = vrot.lane.b32.xlu1 %v2331_v8, %s2777_s30 }
 0x6af   :  { %2371 = vrot.lane.b32.xlu1 %v2363_v16, %s2777_s30  ;;  %2145 = vrot.lane.b32.xlu0 %v2135_v15, %s2777_s30 }
 0x6b3   :  { %2143 = vrot.lane.b32.xlu1 %v2131_v30, %s2777_s30  ;;  %2175 = vrot.lane.b32.xlu0 %v2163_v12, %s2777_s30  ;;  %v2742_v30 = vld [vmem:[%s4833_s1 + $0x568] sm:$0xff] }
 0x6b7   :  { %2177 = vrot.lane.b32.xlu1 %v2167_v39, %s2777_s30  ;;  %2209 = vrot.lane.b32.xlu0 %v2199_v10, %s2777_s30 }
 0x6bb   :  { %2207 = vrot.lane.b32.xlu1 %v2195_v2, %s2777_s30  ;;  %2396 = vrot.lane.b32.xlu0 %v2384_v46, %s2777_s30 }
 0x6bf   :  { %2427 = vrot.lane.b32.xlu0 %v2417_v19, %s2777_s30  ;;  %2398 = vrot.lane.b32.xlu1 %v2388_v48, %s2777_s30 }
 0x6c3   :  { %2454 = vrot.lane.b32.xlu0 %v2442_v45, %s2777_s30  ;;  %2425 = vrot.lane.b32.xlu1 %v2413_v33, %s2777_s30 }
 0x6c7   :  { %2241 = vrot.lane.b32.xlu0 %v2231_v26, %s2777_s30  ;;  %2456 = vrot.lane.b32.xlu1 %v2446_v9, %s2777_s30 }
 0x6cb   :  { %2483 = vrot.lane.b32.xlu0 %v2471_v50, %s2777_s30  ;;  %2239 = vrot.lane.b32.xlu1 %v2227_v28, %s2777_s30 }
 0x6cf   :  { %2273 = vrot.lane.b32.xlu0 %v2263_v25, %s2777_s30  ;;  %2485 = vrot.lane.b32.xlu1 %v2475_v58, %s2777_s30  ;;  %v2748_v25 = vld [vmem:[%s4833_s1 + $0x5c8] sm:$0xff] }
 0x6d3   :  { %2512 = vrot.lane.b32.xlu0 %v2500_v60, %s2777_s30  ;;  %2271 = vrot.lane.b32.xlu1 %v2259_v24, %s2777_s30 }
 0x6d7   :  { %2305 = vrot.lane.b32.xlu0 %v2295_v51, %s2777_s30  ;;  %2514 = vrot.lane.b32.xlu1 %v2504_v0, %s2777_s30 }
 0x6db   :  { %2541 = vrot.lane.b32.xlu0 %v2529_v62, %s2777_s30  ;;  %2303 = vrot.lane.b32.xlu1 %v2291_v35, %s2777_s30 }
 0x6df   :  { %2337 = vrot.lane.b32.xlu0 %v2327_v55, %s2777_s30  ;;  %2543 = vrot.lane.b32.xlu1 %v2533_v52, %s2777_s30 }
 0x6e3   :  { %2570 = vrot.lane.b32.xlu0 %v2558_v1, %s2777_s30  ;;  %2335 = vrot.lane.b32.xlu1 %v2323_v56, %s2777_s30 }
 0x6e7   :  { %2369 = vrot.lane.b32.xlu0 %v2359_v36, %s2777_s30  ;;  %2572 = vrot.lane.b32.xlu1 %v2562_v61, %s2777_s30 }
 0x6eb   :  { %2599 = vrot.lane.b32.xlu0 %v2587_v37, %s2777_s30  ;;  %2367 = vrot.lane.b32.xlu1 %v2355_v53, %s2777_s30 }
 0x6ef   :  { %2603 = vrot.lane.b32.xlu0 %v2595_v20, %s2777_s30  ;;  %2601 = vrot.lane.b32.xlu1 %v2591_v44, %s2777_s30 }
 0x705   :  { %v2148_v6 = vpop.permute.xlu1 %2147  ;;  %v2180_v14 = vpop.permute.xlu0 %2179 }
 0x709   :  { %v2212_v34 = vpop.permute.xlu1 %2211  ;;  %v2401_v43 = vpop.permute.xlu0 %2400 }
 0x70d   :  { %v2430_v3 = vpop.permute.xlu1 %2429  ;;  %v2459_v29 = vpop.permute.xlu0 %2458 }
 0x711   :  { %v2244_v18 = vpop.permute.xlu1 %2243  ;;  %v2488_v8 = vpop.permute.xlu0 %2487 }
 0x715   :  { %v4719_v11 = vpop.permute.xlu1 %2275  ;;  %v2517_v42 = vpop.permute.xlu0 %2516 }
 0x719   :  { %v4721_v59 = vpop.permute.xlu1 %2307  ;;  %v4723_v7 = vpop.permute.xlu0 %2545 }
 0x71d   :  { %v4725_v57 = vpop.permute.xlu1 %2339  ;;  %v4727_v16 = vpop.permute.xlu0 %2574 }
 0x721   :  { %v4729_v15 = vpop.permute.xlu1 %2371  ;;  %v2146_v49 = vpop.permute.xlu0 %2145 }
 0x722   :  { %v2150_v12 = vsel %vm277_vm6, %v2146_v49, %v2148_v6 }
 0x723   :  { %v2154_v22 = vmul.f32 %v2742_v30, %v2150_v12 }
 0x725   :  { %v2144_v41 = vpop.permute.xlu1 %2143  ;;  %v2176_v32 = vpop.permute.xlu0 %2175 }
 0x729   :  { %v2178_v27 = vpop.permute.xlu1 %2177  ;;  %v2210_v4 = vpop.permute.xlu0 %2209 }
 0x72a   :  { %v2182_v17 = vsel %vm277_vm6, %v2178_v27, %v2180_v14  ;;  %v2214_v5 = vsel %vm277_vm6, %v2210_v4, %v2212_v34  ;;  %v2743_v34 = vld [vmem:[%s4833_s1 + $0x580] sm:$0xff] }
 0x72b   :  { %v2186_v39 = vmul.f32 %v2744_v63, %v2182_v17  ;;  %v2218_v21 = vmul.f32 %v2746_v54, %v2214_v5 }
 0x72d   :  { %v2188_v10 = vadd.f32 %v2186_v39, %v2154_v22  ;;  %v2208_v38 = vpop.permute.xlu1 %2207  ;;  %v2397_v31 = vpop.permute.xlu0 %2396  ;;  %v2747_v39 = vld [vmem:[%s4833_s1 + $0x5c0] sm:$0xff] }
 0x72f   :  { %v2220_v2 = vadd.f32 %v2218_v21, %v2188_v10 }
 0x731   :  { %v2399_v46 = vpop.permute.xlu1 %2398  ;;  %v2428_v19 = vpop.permute.xlu0 %2427 }
 0x732   :  { %v2403_v48 = vsel %vm277_vm6, %v2399_v46, %v2401_v43  ;;  %v2432_v45 = vsel %vm277_vm6, %v2428_v19, %v2430_v3  ;;  %v2181_v43 = vsel %vm277_vm6, %v2176_v32, %v2178_v27  ;;  %v2750_v3 = vld [vmem:[%s4833_s1 + $0x5e8] sm:$0xff]  ;;  %v2213_v32 = vsel %vm277_vm6, %v2208_v38, %v2210_v4 }
 0x733   :  { %v2407_v33 = vmul.f32 %v2742_v30, %v2403_v48  ;;  %v2436_v26 = vmul.f32 %v2744_v63, %v2432_v45  ;;  %v2149_v30 = vsel %vm277_vm6, %v2144_v41, %v2146_v49  ;;  %v2185_v12 = vmul.f32 %v2743_v34, %v2181_v43  ;;  %v2745_v63 = vld [vmem:[%s4833_s1 + $0x5a0] sm:$0xff] }
 0x734   :  { %v2217_v22 = vmul.f32 %v2745_v63, %v2213_v32  ;;  %v2402_v21 = vsel %vm277_vm6, %v2397_v31, %v2399_v46 }
 0x735   :  { %v2438_v9 = vadd.f32 %v2436_v26, %v2407_v33  ;;  %v2426_v50 = vpop.permute.xlu1 %2425  ;;  %v2455_v28 = vpop.permute.xlu0 %2454  ;;  %v2752_v33 = vld [vmem:[%s4833_s1 + $0x608] sm:$0xff] }
 0x739   :  { %v2457_v58 = vpop.permute.xlu1 %2456  ;;  %v2242_v60 = vpop.permute.xlu0 %2241 }
 0x73a   :  { %v2461_v24 = vsel %vm277_vm6, %v2457_v58, %v2459_v29  ;;  %v2246_v51 = vsel %vm277_vm6, %v2242_v60, %v2244_v18  ;;  %v2460_v4 = vsel %vm277_vm6, %v2455_v28, %v2457_v58  ;;  %v2754_v58 = vld [vmem:[%s4833_s1 + $0x628] sm:$0xff] }
 0x73b   :  { %v2465_v0 = vmul.f32 %v2746_v54, %v2461_v24  ;;  %v2250_v62 = vmul.f32 %v2748_v25, %v2246_v51 }
 0x73d   :  { %v2467_v35 = vadd.f32 %v2465_v0, %v2438_v9  ;;  %v2252_v55 = vadd.f32 %v2250_v62, %v2220_v2  ;;  %v2240_v52 = vpop.permute.xlu1 %2239  ;;  %v2484_v1 = vpop.permute.xlu0 %2483 }
 0x73e   :  { %v2245_v49 = vsel %vm277_vm6, %v2240_v52, %v2242_v60  ;;  %v2751_v52 = vld [vmem:[%s4833_s1 + $0x600] sm:$0xff] }
 0x73f   :  { %v2249_v46 = vmul.f32 %v2747_v39, %v2245_v49 }
 0x741   :  { %v2486_v56 = vpop.permute.xlu1 %2485  ;;  %v2274_v36 = vpop.permute.xlu0 %2273 }
 0x742   :  { %v2490_v61 = vsel %vm277_vm6, %v2486_v56, %v2488_v8  ;;  %v2741_v8 = vld [vmem:[%s4833_s1 + $0x560] sm:$0xff]  ;;  %v2278_v41 = vsel %vm277_vm6, %v2274_v36, %v4719_v11  ;;  %v2489_v24 = vsel %vm277_vm6, %v2484_v1, %v2486_v56 }
 0x743   :  { %v2494_v37 = vmul.f32 %v2748_v25, %v2490_v61  ;;  %v2153_v5 = vmul.f32 %v2741_v8, %v2149_v30  ;;  %v2282_v26 = vmul.f32 %v2750_v3, %v2278_v41  ;;  %v2406_v28 = vmul.f32 %v2741_v8, %v2402_v21  ;;  %v2753_v1 = vld [vmem:[%s4833_s1 + $0x620] sm:$0xff] }
 0x744   :  { %v2464_v25 = vmul.f32 %v2745_v63, %v2460_v4 }
 0x745   :  { %v2496_v53 = vadd.f32 %v2494_v37, %v2467_v35  ;;  %v2272_v20 = vpop.permute.xlu1 %2271  ;;  %v2513_v44 = vpop.permute.xlu0 %2512  ;;  %v2187_v10 = vadd.f32 %v2185_v12, %v2153_v5  ;;  %v2284_v37 = vadd.f32 %v2282_v26, %v2252_v55 }
 0x746   :  { %v2277_v45 = vsel %vm277_vm6, %v2272_v20, %v2274_v36 }
 0x749   :  { %v2515_v6 = vpop.permute.xlu1 %2514  ;;  %v2306_v14 = vpop.permute.xlu0 %2305 }
 0x74a   :  { %v2519_v29 = vsel %vm277_vm6, %v2515_v6, %v2517_v42  ;;  %v2431_v42 = vsel %vm277_vm6, %v2426_v50, %v2428_v19  ;;  %v2749_v19 = vld [vmem:[%s4833_s1 + $0x5e0] sm:$0xff]  ;;  %v2310_v11 = vsel %vm277_vm6, %v2306_v14, %v4721_v59  ;;  %v2219_v50 = vadd.f32 %v2217_v22, %v2187_v10 }
 0x74b   :  { %v2523_v18 = vmul.f32 %v2750_v3, %v2519_v29  ;;  %v2435_v48 = vmul.f32 %v2743_v34, %v2431_v42  ;;  %v2281_v51 = vmul.f32 %v2749_v19, %v2277_v45  ;;  %v2314_v59 = vmul.f32 %v2752_v33, %v2310_v11  ;;  %v2756_v34 = vld [vmem:[%s4833_s1 + $0x648] sm:$0xff]  ;;  %v2755_v42 = vld [vmem:[%s4833_s1 + $0x640] sm:$0xff] }
 0x74c   :  { %v2251_v61 = vadd.f32 %v2249_v46, %v2219_v50 }
 0x74d   :  { %v2525_v27 = vadd.f32 %v2523_v18, %v2496_v53  ;;  %v2304_v17 = vpop.permute.xlu1 %2303  ;;  %v2542_v54 = vpop.permute.xlu0 %2541  ;;  %v2437_v35 = vadd.f32 %v2435_v48, %v2406_v28  ;;  %v2518_v53 = vsel %vm277_vm6, %v2513_v44, %v2515_v6  ;;  %v2316_v29 = vadd.f32 %v2314_v59, %v2284_v37 }
 0x74e   :  { %v2309_v36 = vsel %vm277_vm6, %v2304_v17, %v2306_v14  ;;  %v2283_v3 = vadd.f32 %v2281_v51, %v2251_v61  ;;  %v2522_v8 = vmul.f32 %v2749_v19, %v2518_v53 }
 0x74f   :  { %v2466_v43 = vadd.f32 %v2464_v25, %v2437_v35  ;;  %v2313_v14 = vmul.f32 %v2751_v52, %v2309_v36 }
 0x751   :  { %v2544_v38 = vpop.permute.xlu1 %2543  ;;  %v2338_v2 = vpop.permute.xlu0 %2337  ;;  %v2315_v22 = vadd.f32 %v2313_v14, %v2283_v3 }
 0x752   :  { %v2548_v31 = vsel %vm277_vm6, %v2544_v38, %v4723_v7  ;;  %v2342_v60 = vsel %vm277_vm6, %v2338_v2, %v4725_v57  ;;  %v2493_v57 = vmul.f32 %v2747_v39, %v2489_v24  ;;  %v2547_v44 = vsel %vm277_vm6, %v2542_v54, %v2544_v38 }
 0x753   :  { %v2552_v9 = vmul.f32 %v2752_v33, %v2548_v31  ;;  %v2346_v20 = vmul.f32 %v2754_v58, %v2342_v60  ;;  %v2551_v39 = vmul.f32 %v2751_v52, %v2547_v44 }
 0x754   :  { %v2495_v17 = vadd.f32 %v2493_v57, %v2466_v43 }
 0x755   :  { %v2554_v0 = vadd.f32 %v2552_v9, %v2525_v27  ;;  %v2336_v62 = vpop.permute.xlu1 %2335  ;;  %v2571_v7 = vpop.permute.xlu0 %2570  ;;  %v2348_v12 = vadd.f32 %v2346_v20, %v2316_v29 }
 0x756   :  { %v2341_v56 = vsel %vm277_vm6, %v2336_v62, %v2338_v2  ;;  %v2524_v10 = vadd.f32 %v2522_v8, %v2495_v17 }
 0x757   :  { %v2345_v63 = vmul.f32 %v2753_v1, %v2341_v56 }
 0x758   :  { %v2553_v48 = vadd.f32 %v2551_v39, %v2524_v10 }
 0x759   :  { %v2573_v18 = vpop.permute.xlu1 %2572  ;;  %v2370_v55 = vpop.permute.xlu0 %2369  ;;  %v2347_v21 = vadd.f32 %v2345_v63, %v2315_v22 }
 0x75a   :  { %v2577_v6 = vsel %vm277_vm6, %v2573_v18, %v4727_v16  ;;  %v2374_v30 = vsel %vm277_vm6, %v2370_v55, %v4729_v15  ;;  %v2576_v5 = vsel %vm277_vm6, %v2571_v7, %v2573_v18 }
 0x75b   :  { %v2581_v32 = vmul.f32 %v2754_v58, %v2577_v6  ;;  %v2378_v27 = vmul.f32 %v2756_v34, %v2374_v30  ;;  %v2580_v4 = vmul.f32 %v2753_v1, %v2576_v5 }
 0x75d   :  { %v2583_v54 = vadd.f32 %v2581_v32, %v2554_v0  ;;  %v2380_v49 = vadd.f32 %v2378_v27, %v2348_v12  ;;  %v2368_v41 = vpop.permute.xlu1 %2367  ;;  %v2600_v16 = vpop.permute.xlu0 %2599  ;;  %v2582_v26 = vadd.f32 %v2580_v4, %v2553_v48 }
 0x75e   :  { %v2373_v15 = vsel %vm277_vm6, %v2368_v41, %v2370_v55 }
 0x75f   :  { %v2614_v38 = vadd.f32 %v2380_v49, %v4287_v47  ;;  %v2377_v2 = vmul.f32 %v2755_v42, %v2373_v15 }
 0x761   :  { %v2618_v19 = vmax.f32 %v2614_v38, 0.0  ;;  %v2379_v45 = vadd.f32 %v2377_v2, %v2347_v21  ;;  %v2602_v33 = vpop.permute.xlu1 %2601  ;;  %v2604_v11 = vpop.permute.xlu0 %2603 }
 0x762   :  { %v2605_v31 = vsel %vm277_vm6, %v2600_v16, %v2602_v33  ;;  %v2606_v46 = vsel %vm277_vm6, %v2602_v33, %v2604_v11 }
 0x763   :  { %2622 = vst [vmem:[%s4835_s2 + $0x8] sm:$0xff] %v2618_v19  ;;  %v2613_v9 = vadd.f32 %v2379_v45, %v4285_v23  ;;  %v2609_v50 = vmul.f32 %v2755_v42, %v2605_v31  ;;  %v2610_v28 = vmul.f32 %v2756_v34, %v2606_v46 }
 0x765   :  { %v2617_v47 = vmax.f32 %v2613_v9, 0.0  ;;  %v2611_v25 = vadd.f32 %v2609_v50, %v2582_v26  ;;  %v2612_v58 = vadd.f32 %v2610_v28, %v2583_v54 }
 0x767   :  { %2621 = vst [vmem:[%s4835_s2] sm:$0xff] %v2617_v47  ;;  %v2615_v60 = vadd.f32 %v2611_v25, %v4341_v13  ;;  %v2616_v24 = vadd.f32 %v2612_v58, %v4339_v40 }
 0x769   :  { %v2619_v51 = vmax.f32 %v2615_v60, 0.0  ;;  %v2620_v59 = vmax.f32 %v2616_v24, 0.0 }
 0x76b   :  { %2623 = vst [vmem:[%s4835_s2 + $0x10] sm:$0xff] %v2619_v51  ;;  %2624 = vst [vmem:[%s4835_s2 + $0x18] sm:$0xff] %v2620_v59 }

</bundles_post_ra>
